<compile_context>
chip_gen: v7x
topology: tpu7x:2x2x1
jax: 0.10.0
libtpu: 0.0.40
codegen_flags: <defaults>
</compile_context>

<pallas_src>
import math

import jax
import jax.numpy as jnp
from jax.experimental import pallas as pl
from jax.experimental.pallas import tpu as pltpu


def _make_kernel(num_pos_feats: int):
    """Kernel factory closing over compile-time constants."""
    half = num_pos_feats // 2

    def kernel(inv_ref, emb_ref, out_ref):
        # inv_ref: (half, 1) f32  -- precomputed 1 / dim_t[2i]
        # emb_ref: (3, TILE_N) f32 -- rows are x/y/z position values (lane-dense)
        # out_ref: (3*F, TILE_N)   -- feature-major, positions on lanes
        inv = inv_ref[...]                                       # (half, 1)
        if half % 8 == 0:
            # Sublane-aligned static row slices -> unmasked vector stores.
            for c in range(3):                                   # x, y, z
                val = inv * emb_ref[c:c + 1, :]                  # (half, TILE_N)
                base = c * num_pos_feats
                # torch: stack((sin(pos[...,0::2]), cos(pos[...,1::2])), dim=4).flatten(4)
                # on a 5-D tensor => per coordinate: [sin block | cos block]
                out_ref[base:base + half, :] = jnp.sin(val).astype(out_ref.dtype)
                out_ref[base + half:base + num_pos_feats, :] = jnp.cos(val).astype(out_ref.dtype)
        else:
            # half not a multiple of 8: avoid misaligned masked row stores by
            # assembling the full block once and doing a single full-tile store.
            parts = []
            for c in range(3):
                val = inv * emb_ref[c:c + 1, :]
                parts.append(jnp.sin(val))
                parts.append(jnp.cos(val))
            out_ref[...] = jnp.concatenate(parts, axis=0).astype(out_ref.dtype)

    return kernel


def _pick_tile(n_per: int, max_tile: int):
    """Pick a lane-tile (multiple of 128).  Prefer one that divides n_per so no
    padding / trim-slice is needed; otherwise pad up."""
    max_tile = max(128, (max_tile // 128) * 128)
    if n_per % 128 == 0:
        t = min(max_tile, n_per)
        t = max(128, (t // 128) * 128)
        while t > 128 and n_per % t != 0:
            t -= 128
        if n_per % t == 0:
            return t, n_per
    t = min(max_tile, pl.cdiv(n_per, 128) * 128)
    n_padded = pl.cdiv(n_per, t) * t
    return t, n_padded


def position_embedding_sine(x, mask=None, *, num_pos_feats=64, temperature=10000.0,
                            normalize=False, scale=None, out_dtype=jnp.float32):
    if scale is not None and normalize is False:
        raise ValueError("normalize should be True if scale is passed")
    if scale is None:
        scale = 2 * math.pi
    assert num_pos_feats % 2 == 0 and num_pos_feats >= 2, "num_pos_feats must be even"

    B, _, X, Y, Z = x.shape
    if mask is None:
        mask = jnp.zeros((B, X, Y, Z), dtype=bool)

    # --- tiny prologue (kept in JAX; data-dependent prefix sums over the mask) ---
    not_mask = (~mask).astype(jnp.float32)
    x_embed = jnp.cumsum(not_mask, axis=1)
    y_embed = jnp.cumsum(not_mask, axis=2)
    z_embed = jnp.cumsum(not_mask, axis=3)
    if normalize:
        eps = 1e-6
        x_embed = x_embed / (x_embed[:, -1:, :, :] + eps) * scale
        y_embed = y_embed / (y_embed[:, :, -1:, :] + eps) * scale
        z_embed = z_embed / (z_embed[:, :, :, -1:] + eps) * scale

    half = num_pos_feats // 2
    out_feats = 3 * num_pos_feats
    n_per = X * Y * Z
    dsize = jnp.dtype(out_dtype).itemsize

    # --- generation-aware block budget (v7x: 64 MiB VMEM; v5e/v6e: 128 MiB) ---
    try:
        vmem_cap = int(pltpu.get_tpu_info().vmem_capacity_bytes)
    except Exception:  # pragma: no cover - conservative fallback
        vmem_cap = 128 * 1024 * 1024
    block_budget = (7 << 20) if vmem_cap <= (64 << 20) else (14 << 20)
    max_tile = max(128, block_budget // (out_feats * dsize))

    tile_n, n_padded = _pick_tile(n_per, max_tile)

    # Pack the three coordinate streams into one lane-dense (B, 3, Np) input.
    emb = jnp.stack([x_embed.reshape(B, n_per),
                     y_embed.reshape(B, n_per),
                     z_embed.reshape(B, n_per)], axis=1)
    if n_padded > n_per:
        emb = jnp.pad(emb, ((0, 0), (0, 0), (0, n_padded - n_per)))

    # Hoisted reciprocal frequencies: inv_dim_t[i] = 1 / T**(2*i/F) == 1/dim_t[2i].
    idx = jnp.arange(half, dtype=jnp.float32)
    inv_dim_t = (1.0 / jnp.power(jnp.float32(temperature),
                                 2.0 * idx / num_pos_feats)).reshape(half, 1)

    out_block_bytes = out_feats * tile_n * dsize
    in_block_bytes = 3 * tile_n * 4 + half * 4
    vmem_limit = min(vmem_cap * 3 // 4,
                     max(32 << 20, 2 * (out_block_bytes + in_block_bytes) + (16 << 20)))

    kernel = _make_kernel(num_pos_feats)

    out = pl.pallas_call(
        kernel,
        out_shape=jax.ShapeDtypeStruct((B, out_feats, n_padded), out_dtype),
        grid_spec=pltpu.PrefetchScalarGridSpec(
            num_scalar_prefetch=0,
            grid=(B, n_padded // tile_n),
            in_specs=[
                pl.BlockSpec((half, 1), lambda b, i: (0, 0)),
                pl.BlockSpec((None, 3, tile_n), lambda b, i: (b, 0, i)),
            ],
            out_specs=pl.BlockSpec((None, out_feats, tile_n), lambda b, i: (b, 0, i)),
        ),
        compiler_params=pltpu.CompilerParams(
            dimension_semantics=("parallel", "parallel"),
            vmem_limit_bytes=int(vmem_limit)),
    )(inv_dim_t, emb)

    if n_padded > n_per:
        out = out[:, :, :n_per]
    # Trailing-dim split only -> no data movement.
    return out.reshape(B, out_feats, X, Y, Z)


def _reference(x, mask=None, *, num_pos_feats=64, temperature=10000.0,
               normalize=False, scale=None):
    """Pure-JAX transliteration of the torch forward, for validation."""
    if scale is None:
        scale = 2 * math.pi
    B, _, X, Y, Z = x.shape
    if mask is None:
        mask = jnp.zeros((B, X, Y, Z), dtype=bool)
    not_mask = (~mask).astype(jnp.float32)
    x_embed = jnp.cumsum(not_mask, axis=1)
    y_embed = jnp.cumsum(not_mask, axis=2)
    z_embed = jnp.cumsum(not_mask, axis=3)
    if normalize:
        eps = 1e-6
        x_embed = x_embed / (x_embed[:, -1:, :, :] + eps) * scale
        y_embed = y_embed / (y_embed[:, :, -1:, :] + eps) * scale
        z_embed = z_embed / (z_embed[:, :, :, -1:] + eps) * scale
    dim_t = jnp.arange(num_pos_feats, dtype=jnp.float32)
    dim_t = temperature ** (2.0 * jnp.floor(dim_t / 2.0) / num_pos_feats)

    def enc(e):
        p = e[..., None] / dim_t
        # torch.stack(..., dim=4).flatten(4) on a 5-D input => [sin block | cos block]
        stacked = jnp.stack([jnp.sin(p[..., 0::2]), jnp.cos(p[..., 1::2])], axis=4)
        return stacked.reshape(*p.shape[:-1], num_pos_feats)

    pos = jnp.concatenate([enc(x_embed), enc(y_embed), enc(z_embed)], axis=4)
    return jnp.transpose(pos, (0, 4, 1, 2, 3))


if __name__ == "__main__":
    key = jax.random.PRNGKey(0)
    B, C, X, Y, Z = 2, 4, 8, 8, 8
    num_pos_feats = 32
    x = jax.random.normal(key, (B, C, X, Y, Z), dtype=jnp.float32)

    # Default path (mask=None, no normalize); X*Y*Z divisible by 128 -> no pad.
    pos = position_embedding_sine(x, num_pos_feats=num_pos_feats)
    pos = jax.block_until_ready(pos)
    ref = _reference(x, num_pos_feats=num_pos_feats)
    assert pos.shape == (B, 3 * num_pos_feats, X, Y, Z), pos.shape
    assert jnp.allclose(pos, ref, atol=1e-5, rtol=1e-5), "mismatch vs reference"

    # Masked + normalized path.
    mask = jax.random.bernoulli(jax.random.PRNGKey(1), 0.2, (B, X, Y, Z))
    pos2 = position_embedding_sine(x, mask=mask, num_pos_feats=num_pos_feats,
                                   normalize=True)
    pos2 = jax.block_until_ready(pos2)
    ref2 = _reference(x, mask=mask, num_pos_feats=num_pos_feats, normalize=True)
    assert jnp.allclose(pos2, ref2, atol=1e-5, rtol=1e-5), "mismatch (normalize/mask)"

    # Non-128-divisible spatial extent -> exercises the pad + trim fallback.
    x3 = jax.random.normal(jax.random.PRNGKey(2), (1, C, 5, 6, 7), dtype=jnp.float32)
    pos3 = position_embedding_sine(x3, num_pos_feats=num_pos_feats)
    pos3 = jax.block_until_ready(pos3)
    ref3 = _reference(x3, num_pos_feats=num_pos_feats)
    assert pos3.shape == (1, 3 * num_pos_feats, 5, 6, 7), pos3.shape
    assert jnp.allclose(pos3, ref3, atol=1e-5, rtol=1e-5), "mismatch (padded path)"

    print("KERNEL_OK")
</pallas_src>

<mosaic_0001>
module attributes {stable_mosaic.version = 11 : i64} {
  func.func @kernel(%arg0: i32, %arg1: i32, %arg2: memref<16x1xf32, #tpu.memory_space<vmem>>, %arg3: memref<1x3x512xf32, #tpu.memory_space<vmem>>, %arg4: memref<1x96x512xf32, #tpu.memory_space<vmem>>) attributes {dimension_semantics = [#tpu.dimension_semantics<parallel>, #tpu.dimension_semantics<parallel>], iteration_bounds = array<i64: 2, 1>, scalar_prefetch = 0 : i64, scratch_operands = 0 : i64, tpu.core_type = #tpu.core_type<tc>, window_params = [{pipeline_mode = #tpu.pipeline_mode<synchronous>, transform_indices = @transform_0, window_bounds = array<i64: 16, 1>}, {transform_indices = @transform_1, window_bounds = array<i64: 1, 3, 512>}, {transform_indices = @transform_2, window_bounds = array<i64: 1, 96, 512>}]} {
    %c0 = arith.constant 0 : index
    %c0_0 = arith.constant 0 : index
    %0 = vector.load %arg2[%c0, %c0_0] : memref<16x1xf32, #tpu.memory_space<vmem>>, vector<16x1xf32>
    %c0_1 = arith.constant 0 : index
    %c0_2 = arith.constant 0 : index
    %c0_3 = arith.constant 0 : index
    %1 = vector.load %arg3[%c0_1, %c0_2, %c0_3] : memref<1x3x512xf32, #tpu.memory_space<vmem>>, vector<1x1x512xf32>
    %2 = vector.shape_cast %1 : vector<1x1x512xf32> to vector<1x512xf32>
    %3 = vector.broadcast %0 : vector<16x1xf32> to vector<16x512xf32>
    %4 = vector.broadcast %2 : vector<1x512xf32> to vector<16x512xf32>
    %5 = arith.mulf %3, %4 : vector<16x512xf32>
    %6 = math.sin %5 : vector<16x512xf32>
    %c0_4 = arith.constant 0 : index
    %c0_5 = arith.constant 0 : index
    %c0_6 = arith.constant 0 : index
    %7 = vector.load %arg4[%c0_4, %c0_5, %c0_6] : memref<1x96x512xf32, #tpu.memory_space<vmem>>, vector<1x16x512xf32>
    %8 = vector.shape_cast %7 : vector<1x16x512xf32> to vector<16x512xf32>
    %9 = vector.shape_cast %6 : vector<16x512xf32> to vector<1x16x512xf32>
    tpu.vector_store %arg4[%c0_4, %c0_5, %c0_6], %9 {strides = array<i32>} : memref<1x96x512xf32, #tpu.memory_space<vmem>>, vector<1x16x512xf32>,
    %10 = math.cos %5 : vector<16x512xf32>
    %c0_7 = arith.constant 0 : index
    %c16 = arith.constant 16 : index
    %c0_8 = arith.constant 0 : index
    %11 = vector.load %arg4[%c0_7, %c16, %c0_8] : memref<1x96x512xf32, #tpu.memory_space<vmem>>, vector<1x16x512xf32>
    %12 = vector.shape_cast %11 : vector<1x16x512xf32> to vector<16x512xf32>
    %13 = vector.shape_cast %10 : vector<16x512xf32> to vector<1x16x512xf32>
    tpu.vector_store %arg4[%c0_7, %c16, %c0_8], %13 {strides = array<i32>} : memref<1x96x512xf32, #tpu.memory_space<vmem>>, vector<1x16x512xf32>,
    %c0_9 = arith.constant 0 : index
    %c1 = arith.constant 1 : index
    %c0_10 = arith.constant 0 : index
    %14 = vector.load %arg3[%c0_9, %c1, %c0_10] : memref<1x3x512xf32, #tpu.memory_space<vmem>>, vector<1x1x512xf32>
    %15 = vector.shape_cast %14 : vector<1x1x512xf32> to vector<1x512xf32>
    %16 = vector.broadcast %0 : vector<16x1xf32> to vector<16x512xf32>
    %17 = vector.broadcast %15 : vector<1x512xf32> to vector<16x512xf32>
    %18 = arith.mulf %16, %17 : vector<16x512xf32>
    %19 = math.sin %18 : vector<16x512xf32>
    %c0_11 = arith.constant 0 : index
    %c32 = arith.constant 32 : index
    %c0_12 = arith.constant 0 : index
    %20 = vector.load %arg4[%c0_11, %c32, %c0_12] : memref<1x96x512xf32, #tpu.memory_space<vmem>>, vector<1x16x512xf32>
    %21 = vector.shape_cast %20 : vector<1x16x512xf32> to vector<16x512xf32>
    %22 = vector.shape_cast %19 : vector<16x512xf32> to vector<1x16x512xf32>
    tpu.vector_store %arg4[%c0_11, %c32, %c0_12], %22 {strides = array<i32>} : memref<1x96x512xf32, #tpu.memory_space<vmem>>, vector<1x16x512xf32>,
    %23 = math.cos %18 : vector<16x512xf32>
    %c0_13 = arith.constant 0 : index
    %c48 = arith.constant 48 : index
    %c0_14 = arith.constant 0 : index
    %24 = vector.load %arg4[%c0_13, %c48, %c0_14] : memref<1x96x512xf32, #tpu.memory_space<vmem>>, vector<1x16x512xf32>
    %25 = vector.shape_cast %24 : vector<1x16x512xf32> to vector<16x512xf32>
    %26 = vector.shape_cast %23 : vector<16x512xf32> to vector<1x16x512xf32>
    tpu.vector_store %arg4[%c0_13, %c48, %c0_14], %26 {strides = array<i32>} : memref<1x96x512xf32, #tpu.memory_space<vmem>>, vector<1x16x512xf32>,
    %c0_15 = arith.constant 0 : index
    %c2 = arith.constant 2 : index
    %c0_16 = arith.constant 0 : index
    %27 = vector.load %arg3[%c0_15, %c2, %c0_16] : memref<1x3x512xf32, #tpu.memory_space<vmem>>, vector<1x1x512xf32>
    %28 = vector.shape_cast %27 : vector<1x1x512xf32> to vector<1x512xf32>
    %29 = vector.broadcast %0 : vector<16x1xf32> to vector<16x512xf32>
    %30 = vector.broadcast %28 : vector<1x512xf32> to vector<16x512xf32>
    %31 = arith.mulf %29, %30 : vector<16x512xf32>
    %32 = math.sin %31 : vector<16x512xf32>
    %c0_17 = arith.constant 0 : index
    %c64 = arith.constant 64 : index
    %c0_18 = arith.constant 0 : index
    %33 = vector.load %arg4[%c0_17, %c64, %c0_18] : memref<1x96x512xf32, #tpu.memory_space<vmem>>, vector<1x16x512xf32>
    %34 = vector.shape_cast %33 : vector<1x16x512xf32> to vector<16x512xf32>
    %35 = vector.shape_cast %32 : vector<16x512xf32> to vector<1x16x512xf32>
    tpu.vector_store %arg4[%c0_17, %c64, %c0_18], %35 {strides = array<i32>} : memref<1x96x512xf32, #tpu.memory_space<vmem>>, vector<1x16x512xf32>,
    %36 = math.cos %31 : vector<16x512xf32>
    %c0_19 = arith.constant 0 : index
    %c80 = arith.constant 80 : index
    %c0_20 = arith.constant 0 : index
    %37 = vector.load %arg4[%c0_19, %c80, %c0_20] : memref<1x96x512xf32, #tpu.memory_space<vmem>>, vector<1x16x512xf32>
    %38 = vector.shape_cast %37 : vector<1x16x512xf32> to vector<16x512xf32>
    %39 = vector.shape_cast %36 : vector<16x512xf32> to vector<1x16x512xf32>
    tpu.vector_store %arg4[%c0_19, %c80, %c0_20], %39 {strides = array<i32>} : memref<1x96x512xf32, #tpu.memory_space<vmem>>, vector<1x16x512xf32>,
    return
  }
  func.func @transform_0(%arg0: i32, %arg1: i32) -> (i32, i32) {
    %c0_i32 = arith.constant 0 : i32
    %c0_i32_0 = arith.constant 0 : i32
    %c0_i32_1 = arith.constant 0 : i32
    return %c0_i32, %c0_i32_0 : i32, i32
  }
  func.func @transform_1(%arg0: i32, %arg1: i32) -> (i32, i32, i32) {
    %c0_i32 = arith.constant 0 : i32
    %c0_i32_0 = arith.constant 0 : i32
    return %arg0, %c0_i32, %arg1 : i32, i32, i32
  }
  func.func @transform_2(%arg0: i32, %arg1: i32) -> (i32, i32, i32) {
    %c0_i32 = arith.constant 0 : i32
    %c0_i32_0 = arith.constant 0 : i32
    return %arg0, %c0_i32, %arg1 : i32, i32, i32
  }
}

</mosaic_0001>

<bundles_post_ra>
// kernel: tpu_custom_call.1
= control target key start
LH: loop header
LB: loop body
LE: loop exit
PB: predicated region body
PF: predicated region fallthrough
CT: control target
= control target key end

     0   :  { %7 = vsyncpa [#allocation3], 0  ;;  %s8678_s0 = inlined_call_operand.vmem [shape: f32[16,1], index: 0, kind: input, shape index: {}]   ;;  %s8679_s1 = inlined_call_operand.vmem [shape: f32[2,3,512], index: 1, kind: input, shape index: {}]   ;;  %s8680_s2 = inlined_call_operand.hbm [shape: f32[2,96,512], index: 2, kind: output, shape index: {}]  }
   0x1   :  { %9 = vsyncpa [#allocation3 + $0x1], 0  ;;  %s5957_s9 = smov 0   ;;  %s5959_s10 = smov 0  }
   0x2   :  { %s5961_s11 = smov 0   ;;  %s5963_s12 = smov 0  }
   0x3   :  { %s5965_s13 = smov 0   ;;  %s5967_s14 = smov 0  }
   0x4 LB: > { %s5388_s15 = sadd.s32 4294967295, %s5930_s14   ;;  %s5389_s16 = sadd.s32 4294967294, %s5930_s14   ;;  %s5930_s14 = sphi %s5967_s14, %s15_s14   ;;  %s5926_s13 = sphi %s5965_s13, %s8816_s13   ;;  %s5922_s12 = sphi %s5963_s12, %s8815_s12   ;;  %s5918_s11 = sphi %s5961_s11, %s8814_s11   ;;  %s5914_s10 = sphi %s5959_s10, %s8813_s10   ;;  %s5910_s9 = sphi %s5957_s9, %s8812_s9  }
   0x5   : > { %s27_s17 = sadd.s32 1, %s5926_s13  ;;  %s85_s18 = sadd.s32 1, %s5918_s11 }
   0x6   : > { %p29_p0 = scmp.ge.s32.totalorder %s27_s17, 2  ;;  %p95_p1 = scmp.ne.s32.totalorder %s5918_s11, %s5914_s10 }
   0x7   : > { %p96_p2 = scmp.eq.s32.totalorder %s5388_s15, 1  ;;  %p101_p3 = scmp.ne.s32.totalorder %s5914_s10, %s5910_s9 }
   0x8   : > { %s8818_s17 = smov (%p29_p0, %s27_s17), 0  ;;  %p102_p5 = scmp.eq.s32.totalorder %s5389_s16, 1 }
   0x9   : > { %p5997_p4 = por %p96_p2, %p95_p1  ;;  %s80_s20 = ssub.s32 %s5926_s13, %s8818_s17 }
   0xa   : > { %p5392_p6 = scmp.ge.s32.totalorder %s5930_s14, 1  ;;  %p83_p7 = scmp.eq.s32.totalorder %s80_s20, 0 }
   0xb   : > { %p6004_p8 = por %p102_p5, %p101_p3  ;;  %p136_p9 = scmp.lt.s32.totalorder %s5930_s14, 3 }
   0xc   : > { %s6010_s22 = scalar_select %p83_p7, %s5918_s11, %s85_s18  }
   0xd   : > { %p137_p10 = pnand %p5392_p6, %p136_p9 }
   0xf   : > { %140 = sbr.rel (%p137_p10) target bundleno = 847 (0x34f), region = 28 }
  0x16   : > { %v173_v0 = vld [vmem:[%s8678_s0] sm:$0xff]  ;;  %v5932_v1 = vmov 0   ;;  %v174_v2 = vld [vmem:[%s8678_s0 + $0x8] sm:$0xff]  ;;  %p163_p11 = scmp.lt.s32.totalorder %s5922_s12, 1  ;;  %v187_v3 = vlaneseq  ;;  %v8708_v46 = vmov 683565275  }
  0x17   : > { %5755 = vset.pattern.permute.xlu0 %v5932_v1  ;;  %v8691_v50 = vmov 2475754826   ;;  %v8693_v52 = vmov 2131351028   ;;  %v8703_v54 = vmov 2102212464  }
  0x18   : > { %178 = vperm.xlu0 %5755, %v173_v0   ;;  %s164_s27 = scalar_select %p163_p11, %s5922_s12, 1  ;;  %v188_v4 = vshrl.u32 %v187_v3, 7  ;;  %v5937_v56 = vmov 920167782   ;;  %v5938_v63 = vmov 1326507024  }
  0x19   : > { %s159_s4 = sand.u32 1, %s5914_s10   ;;  %s5690_s7 = smul.u32 6144, %s5922_s12 }
  0x1a   : > { %s5592_s28 = sshll.u32 %s164_s27, 4  ;;  %v6025_v5 = vsub.s32 0, %v188_v4  ;;  %v6027_v6 = vsub.s32 1, %v188_v4  ;;  %v6036_v10 = vsub.s32 2, %v188_v4  ;;  %v6055_v19 = vsub.s32 3, %v188_v4  ;;  %s6325_s5 = smul.u32 384, %s159_s4 }
  0x1b   : > { %s6023_s3 = scalar_lea.vmem %s8679_s1, %s5592_s28  ;;  %s8623_s16 = scalar_lea.hbm %s8680_s2, %s5690_s7 }
  0x1c   : > { %183 = vperm.xlu0 %5755, %v174_v2   ;;  %v175_v7 = vld [vmem:[%s6023_s3] ss:$4 sm:$0xf]  ;;  %s6384_s6 = scalar_lea.vmem [#allocation2], %s6325_s5  ;;  %s8632_s18 = scalar_lea.sflag [#allocation3], %s159_s4 }
  0x1d   : > { %v6031_v8 = vrot.slane %v175_v7, %v6025_v5  ;;  %v6034_v9 = vrot.slane %v175_v7, %v6027_v6  ;;  %v6041_v12 = vrot.slane %v175_v7, %v6036_v10  ;;  %v6066_v27 = vrot.slane %v175_v7, %v6055_v19  ;;  %s5309_s8 = sshll.u32 %s6384_s6, 4  ;;  %s5939_s23 = smov [#allocation2]   ;;  %s8626_s8 = int_to_ptr.vmem [resolvable:$true] %s5309_s8 }
  0x1e   : > { %s5852_s20 = scalar_lea.vmem %s8626_s8, 6144  ;;  %s5856_s24 = sshll.u32 %s5939_s23, 4  ;;  %s5857_s24 = int_to_ptr.vmem [resolvable:$false] %s5856_s24 }
  0x1f   : > { %p5853_p12 = scmp.ne.s32.totalorder %s8626_s8, %s5852_s20  ;;  %s5858_s25 = scalar_lea.vmem %s5857_s24, 12288 }
  0x20   : > { %p5859_p1 = scmp.lt.s32.totalorder %s8626_s8, %s5857_s24  ;;  %p5860_p2 = scmp.lt.s32.totalorder %s5858_s25, %s5852_s20 }
  0x21   : > { %p5854_p13 = pnand %p5853_p12, %p5997_p4 }
  0x22   : > { %p5861_p3 = por %p5860_p2, %p5859_p1 }
  0x23   : > { %p5855_p0 = pneg %p5854_p13 }
  0x25   : > { %p5862_p5 = pnand %p5861_p3, %p5855_p0 }
  0x97   : > { %v6038_v11 = vpop.permute.xlu0 %178 }
  0x98   : > { %v6045_v13 = vmul.f32 %v6031_v8, %v6038_v11  ;;  %v6049_v14 = vmul.f32 %v6034_v9, %v6038_v11  ;;  %v6059_v20 = vmul.f32 %v6041_v12, %v6038_v11  ;;  %v6072_v38 = vmul.f32 %v6066_v27, %v6038_v11 }
  0x9a   : > { %v215_v15 = vand.u32 2147483647, %v6045_v13  ;;  %v218_v16 = vand.u32 2139095040, %v6045_v13  ;;  %v319_v17 = vand.u32 2147483647, %v6049_v14  ;;  %v322_v18 = vand.u32 2139095040, %v6049_v14 }
  0x9b   : > { %v426_v28 = vand.u32 2139095040, %v6059_v20  ;;  %v423_v33 = vand.u32 2147483647, %v6059_v20  ;;  %vm217_vm13 = vcmp.lt.s32.totalorder %v6045_v13, 0  ;;  %vm321_vm15 = vcmp.lt.s32.totalorder %v6049_v14, 0 }
  0x9c   : > { %v219_v21 = vshrl.u32 %v218_v16, 23  ;;  %v323_v22 = vshrl.u32 %v322_v18, 23  ;;  %v222_v23 = vand.u32 8388607, %v215_v15  ;;  %v326_v24 = vand.u32 8388607, %v319_v17 }
  0x9d   : > { %v427_v34 = vshrl.u32 %v426_v28, 23  ;;  %v6082_v44 = vand.u32 8388607, %v423_v33  ;;  %vm6186_vm14 = vcmp.le.f32.partialorder %v215_v15, 0.7853982 }
  0x9e   : > { %v5395_v25 = vadd.s32 4294967169, %v219_v21  ;;  %v5399_v26 = vadd.s32 4294967169, %v323_v22  ;;  %v223_v31 = vor.u32 8388608, %v222_v23  ;;  %v327_v32 = vor.u32 8388608, %v326_v24 }
  0x9f   : > { %v5403_v37 = vadd.s32 4294967169, %v427_v34 }
  0xa0   : > { %v225_v29 = vadd.s32 1, %v5395_v25  ;;  %v329_v30 = vadd.s32 1, %v5399_v26  ;;  %v6074_v41 = vshll.u32 %v223_v31, 8  ;;  %v6078_v43 = vshll.u32 %v327_v32, 8 }
  0xa1   : > { %v6085_v49 = vadd.s32 1, %v5403_v37 }
  0xa2   : > { %vm226_vm0 = vcmp.gt.s32.totalorder %v225_v29, 0  ;;  %vm330_vm1 = vcmp.gt.s32.totalorder %v329_v30, 0 }
  0xa3   : > { %v227_v35 = vsel %vm226_vm0, %v225_v29, 0  ;;  %v331_v36 = vsel %vm330_vm1, %v329_v30, 0  ;;  %vm434_vm11 = vcmp.gt.s32.totalorder %v6085_v49, 0 }
  0xa4   : > { %v228_v39 = vshrl.u32 %v227_v35, 5  ;;  %v229_v40 = vand.u32 31, %v227_v35  ;;  %v6076_v42 = vshrl.u32 %v331_v36, 5  ;;  %v333_v48 = vand.u32 31, %v331_v36 }
  0xa6   : > { %v230_v45 = vsub.s32 32, %v229_v40  ;;  %v232_v47 = vshll.u32 %v8708_v46, %v229_v40  ;;  %v235_v51 = vshll.u32 %v8691_v50, %v229_v40  ;;  %v238_v53 = vshll.u32 %v8693_v52, %v229_v40 }
  0xa7   : > { %v241_v55 = vshll.u32 %v8703_v54, %v229_v40  ;;  %v244_v57 = vshll.u32 %v5937_v56, %v229_v40  ;;  %vm247_vm2 = vcmp.lt.s32.totalorder %v228_v39, 1  ;;  %vm248_vm3 = vcmp.lt.s32.totalorder %v228_v39, 2 }
  0xa8   : > { %v233_v58 = vshrl.u32 %v8691_v50, %v230_v45  ;;  %v236_v59 = vshrl.u32 %v8693_v52, %v230_v45  ;;  %v239_v60 = vshrl.u32 %v8703_v54, %v230_v45  ;;  %v231_v61 = vshrl.u32 %v8708_v46, %v230_v45 }
  0xa9   : > { %v242_v62 = vshrl.u32 %v5937_v56, %v230_v45  ;;  %v245_v0 = vshrl.u32 %v5938_v63, %v230_v45  ;;  %v334_v4 = vsub.s32 32, %v333_v48  ;;  %vm249_vm4 = vcmp.lt.s32.totalorder %v228_v39, 3 }
  0xaa   : > { %v234_v1 = vor.u32 %v233_v58, %v232_v47  ;;  %v237_v2 = vor.u32 %v236_v59, %v235_v51  ;;  %v240_v3 = vor.u32 %v239_v60, %v238_v53  ;;  %vm250_vm5 = vcmp.lt.s32.totalorder %v228_v39, 4 }
  0xab   : > { %v243_v7 = vor.u32 %v242_v62, %v241_v55  ;;  %v246_v16 = vor.u32 %v245_v0, %v244_v57  ;;  %v336_v28 = vshll.u32 %v8708_v46, %v333_v48  ;;  %v337_v31 = vshrl.u32 %v8691_v50, %v334_v4 }
  0xac   : > { %v251_v18 = vsel %vm247_vm2, %v231_v61, %v234_v1  ;;  %v252_v21 = vsel %vm250_vm5, %v240_v3, 2102212464  ;;  %v255_v22 = vsel %vm247_vm2, %v234_v1, %v237_v2  ;;  %v259_v23 = vsel %vm247_vm2, %v237_v2, %v240_v3 }
  0xad   : > { %v253_v24 = vsel %vm249_vm4, %v237_v2, %v252_v21  ;;  %v256_v25 = vsel %vm250_vm5, %v243_v7, 920167782  ;;  %v260_v26 = vsel %vm250_vm5, %v246_v16, 1326507024  ;;  %v339_v32 = vshll.u32 %v8691_v50, %v333_v48 }
  0xae   : > { %v257_v29 = vsel %vm249_vm4, %v240_v3, %v256_v25  ;;  %v261_v30 = vsel %vm249_vm4, %v243_v7, %v260_v26  ;;  %v254_v34 = vsel %vm248_vm3, %v251_v18, %v253_v24  ;;  %v340_v37 = vshrl.u32 %v8693_v52, %v334_v4 }
  0xaf   : > { %v258_v35 = vsel %vm248_vm3, %v255_v22, %v257_v29  ;;  %v262_v36 = vsel %vm248_vm3, %v259_v23, %v261_v30  ;;  %v338_v53 = vor.u32 %v337_v31, %v336_v28  ;;  %v342_v57 = vshll.u32 %v8693_v52, %v333_v48 }
  0xb0   : > { %v6108_v40 = vmul.u32.u64.low %v6074_v41, %v262_v36  ;;  %v6109_v45 = vmul.u32.u64.high %v6074_v41, %v262_v36, %v6108_v40  ;;  %v6112_v47 = vmul.u32.u64.low %v6074_v41, %v258_v35  ;;  %v6113_v51 = vmul.u32.u64.high %v6074_v41, %v258_v35, %v6112_v47 }
  0xb1   : > { %v341_v55 = vor.u32 %v340_v37, %v339_v32  ;;  %v343_v58 = vshrl.u32 %v8703_v54, %v334_v4  ;;  %v335_v59 = vshrl.u32 %v8708_v46, %v334_v4  ;;  %v345_v39 = vshll.u32 %v8703_v54, %v333_v48 }
  0xb2   : > { %v346_v60 = vshrl.u32 %v5937_v56, %v334_v4  ;;  %v349_v61 = vshrl.u32 %v5938_v63, %v334_v4  ;;  %v270_v62 = vmul.u32 %v6074_v41, %v254_v34  ;;  %v348_v1 = vshll.u32 %v5937_v56, %v333_v48 }
  0xb3   : > { %v344_v0 = vor.u32 %v343_v58, %v342_v57  ;;  %vm351_vm6 = vcmp.lt.s32.totalorder %v6076_v42, 1  ;;  %vm272_vm7 = vc.u32 %v6109_v45, %v6112_v47  ;;  %v273_v2 = vadd.s32 1, %v6113_v51  ;;  %v6149_v57 = vpop.permute.xlu0 %183 }
  0xb4   : > { %v347_v3 = vor.u32 %v346_v60, %v345_v39  ;;  %vm352_vm8 = vcmp.lt.s32.totalorder %v6076_v42, 2  ;;  %v350_v7 = vor.u32 %v349_v61, %v348_v1  ;;  %vm353_vm9 = vcmp.lt.s32.totalorder %v6076_v42, 3  ;;  %8727 = vst [vmem:[#allocation5_spill] sm:$0xff] %v6149_v57 }
  0xb5   : > { %vm354_vm10 = vcmp.lt.s32.totalorder %v6076_v42, 4  ;;  %v359_v4 = vsel %vm351_vm6, %v338_v53, %v341_v55  ;;  %v274_v41 = vsel %vm272_vm7, %v273_v2, %v6113_v51  ;;  %v363_v48 = vsel %vm351_vm6, %v341_v55, %v344_v0 }
  0xb6   : > { %v356_v16 = vsel %vm354_vm10, %v344_v0, 2102212464  ;;  %v360_v18 = vsel %vm354_vm10, %v347_v3, 920167782  ;;  %v275_v21 = vadd.s32 %v274_v41, %v270_v62  ;;  %v355_v22 = vsel %vm351_vm6, %v335_v59, %v338_v53 }
  0xb7   : > { %v361_v23 = vsel %vm353_vm9, %v344_v0, %v360_v18  ;;  %v364_v24 = vsel %vm354_vm10, %v350_v7, 1326507024  ;;  %v357_v25 = vsel %vm353_vm9, %v341_v55, %v356_v16  ;;  %v435_v36 = vsel %vm434_vm11, %v6085_v49, 0 }
  0xb8   : > { %v362_v26 = vsel %vm352_vm8, %v359_v4, %v361_v23  ;;  %v365_v28 = vsel %vm353_vm9, %v347_v3, %v364_v24  ;;  %v276_v29 = vadd.s32 536870912, %v275_v21  ;;  %v358_v40 = vsel %vm352_vm8, %v355_v22, %v357_v25 }
  0xb9   : > { %v366_v30 = vsel %vm352_vm8, %v363_v48, %v365_v28  ;;  %v6136_v31 = vmul.u32.u64.low %v6078_v43, %v362_v26  ;;  %v6137_v32 = vmul.u32.u64.high %v6078_v43, %v362_v26, %v6136_v31  ;;  %v437_v51 = vand.u32 31, %v435_v36 }
  0xba   : > { %v6141_v34 = vmul.u32.u64.low %v6078_v43, %v366_v30  ;;  %v6142_v35 = vmul.u32.u64.high %v6078_v43, %v366_v30, %v6141_v34  ;;  %v277_v37 = vshrl.u32 %v276_v29, 30  ;;  %v530_v53 = vand.u32 2139095040, %v6072_v38 }
  0xbb   : > { %v527_v55 = vand.u32 2147483647, %v6072_v38  ;;  %v377_v59 = vadd.s32 1, %v6137_v32  ;;  %v431_v39 = vor.u32 8388608, %v6082_v44  ;;  %v374_v60 = vmul.u32 %v6078_v43, %v358_v40 }
  0xbc   : > { %v278_v58 = vshll.u32 %v277_v37, 30  ;;  %vm376_vm12 = vc.u32 %v6142_v35, %v6136_v31  ;;  %v438_v49 = vsub.s32 32, %v437_v51  ;;  %v531_v62 = vshrl.u32 %v530_v53, 23 }
  0xbd   : > { %v378_v61 = vsel %vm376_vm12, %v377_v59, %v6137_v32  ;;  %v6161_v0 = vmul.f32 %v6031_v8, %v6149_v57  ;;  %v6166_v44 = vand.u32 8388607, %v527_v55  ;;  %v271_v43 = vadd.s32 %v6112_v47, %v6109_v45 }
  0xbe   : > { %v6156_v42 = vsub.s32 %v275_v21, %v278_v58  ;;  %v379_v1 = vadd.s32 %v378_v61, %v374_v60  ;;  %v6170_v3 = vshrl.u32 %v435_v36, 5  ;;  %v6172_v7 = vshll.u32 %v431_v39, 8 }
  0xbf   : > { %v301_v4 = vsub.s32 4, %v277_v37  ;;  %v441_v8 = vshrl.u32 %v8691_v50, %v438_v49  ;;  %v444_v16 = vshrl.u32 %v8693_v52, %v438_v49  ;;  %v447_v48 = vshrl.u32 %v8703_v54, %v438_v49 }
  0xc0   : > { %v281_v2 = vsub.s32 0, %v6156_v42  ;;  %v380_v41 = vadd.s32 536870912, %v379_v1  ;;  %v450_v21 = vshrl.u32 %v5937_v56, %v438_v49  ;;  %v6179_v22 = vadd.s32 4294967169, %v531_v62 }
  0xc1   : > { %v440_v47 = vshll.u32 %v8708_v46, %v437_v51  ;;  %v443_v23 = vshll.u32 %v8691_v50, %v437_v51  ;;  %v535_v24 = vor.u32 8388608, %v6166_v44  ;;  %v446_v28 = vshll.u32 %v8693_v52, %v437_v51 }
  0xc2   : > { %v5396_v18 = vmin.u32 %v281_v2, %v6156_v42  ;;  %v381_v45 = vshrl.u32 %v380_v41, 30  ;;  %v449_v29 = vshll.u32 %v8703_v54, %v437_v51  ;;  %v453_v30 = vshrl.u32 %v5938_v63, %v438_v49 }
  0xc3   : > { %v302_v32 = vsel %vm217_vm13, %v301_v4, %v277_v37  ;;  %v442_v36 = vor.u32 %v441_v8, %v440_v47  ;;  %v445_v40 = vor.u32 %v444_v16, %v443_v23  ;;  %v448_v15 = vor.u32 %v447_v48, %v446_v28 }
  0xc4   : > { %v283_v26 = vclz %v5396_v18  ;;  %v382_v34 = vshll.u32 %v381_v45, 30  ;;  %v451_v58 = vor.u32 %v450_v21, %v449_v29  ;;  %v452_v59 = vshll.u32 %v5937_v56, %v437_v51 }
  0xc5   : > { %v405_v60 = vsub.s32 4, %v381_v45  ;;  %v439_v61 = vshrl.u32 %v8708_v46, %v438_v49  ;;  %vm455_vm0 = vcmp.lt.s32.totalorder %v6170_v3, 1  ;;  %vm456_vm2 = vcmp.lt.s32.totalorder %v6170_v3, 2 }
  0xc6   : > { %v5397_v53 = vadd.s32 4294967294, %v283_v26  ;;  %v6197_v39 = vsub.s32 %v379_v1, %v382_v34  ;;  %v454_v62 = vor.u32 %v453_v30, %v452_v59  ;;  %vm457_vm3 = vcmp.lt.s32.totalorder %v6170_v3, 3 }
  0xc7   : > { %vm6205_vm4 = vcmp.le.f32.partialorder %v319_v17, 0.7853982  ;;  %vm458_vm5 = vcmp.lt.s32.totalorder %v6170_v3, 4  ;;  %v463_v49 = vsel %vm455_vm0, %v442_v36, %v445_v40  ;;  %v467_v48 = vsel %vm455_vm0, %v445_v40, %v448_v15 }
  0xc8   : > { %vm5398_vm1 = vcmp.lt.s32.totalorder %v5397_v53, 0  ;;  %v385_v51 = vsub.s32 0, %v6197_v39  ;;  %v460_v41 = vsel %vm458_vm5, %v448_v15, 2102212464  ;;  %v464_v8 = vsel %vm458_vm5, %v451_v58, 920167782 }
  0xc9   : > { %v286_v37 = vsel %vm5398_vm1, 0, %v5397_v53  ;;  %v465_v17 = vsel %vm457_vm3, %v448_v15, %v464_v8  ;;  %v468_v26 = vsel %vm458_vm5, %v454_v62, 1326507024  ;;  %v6223_v28 = vsel %vm6186_vm14, 0, %v302_v32 }
  0xca   : > { %v287_v1 = vsub.s32 32, %v286_v37  ;;  %v291_v4 = vsub.s32 4294967266, %v286_v37  ;;  %v288_v16 = vshll.u32 %v6156_v42, %v286_v37  ;;  %v5400_v18 = vmin.u32 %v385_v51, %v6197_v39 }
  0xcb   : > { %v466_v23 = vsel %vm456_vm2, %v463_v49, %v465_v17  ;;  %v459_v42 = vsel %vm455_vm0, %v439_v61, %v442_v36  ;;  %v461_v30 = vsel %vm457_vm3, %v445_v40, %v460_v41  ;;  %v469_v15 = vsel %vm457_vm3, %v451_v58, %v468_v26 }
  0xcc   : > { %v289_v21 = vshrl.u32 %v271_v43, %v287_v1  ;;  %v292_v47 = vadd.s32 127, %v291_v4  ;;  %v387_v29 = vclz %v5400_v18  ;;  %v406_v43 = vsel %vm321_vm15, %v405_v60, %v381_v45 }
  0xcd   : > { %v470_v32 = vsel %vm456_vm2, %v467_v48, %v469_v15  ;;  %v6236_v62 = vmul.u32.u64.low %v6172_v7, %v466_v23  ;;  %v6237_v37 = vmul.u32.u64.high %v6172_v7, %v466_v23, %v6236_v62  ;;  %v462_v40 = vsel %vm456_vm2, %v459_v42, %v461_v30 }
  0xce   : > { %v290_v34 = vor.u32 %v289_v21, %v288_v16  ;;  %v293_v53 = vshll.u32 %v292_v47, 23  ;;  %v5401_v59 = vadd.s32 4294967294, %v387_v29  ;;  %v308_v45 = vadd.s32 3, %v6223_v28 }
  0xcf   : > { %v6243_v61 = vmul.u32.u64.low %v6172_v7, %v470_v32  ;;  %v6244_v51 = vmul.u32.u64.high %v6172_v7, %v470_v32, %v6243_v61  ;;  %v375_v58 = vadd.s32 %v6136_v31, %v6142_v35  ;;  %v537_v60 = vadd.s32 1, %v6179_v22 }
  0xd0   : > { %v294_v36 = vor.u32 4788187, %v293_v53  ;;  %vm5402_vm6 = vcmp.lt.s32.totalorder %v5401_v59, 0  ;;  %v297_v1 = vcvt.s32.f32 %v290_v34  ;;  %v6252_v41 = vsel %vm6205_vm4, 0, %v406_v43 }
  0xd1   : > { %v390_v4 = vsel %vm5402_vm6, 0, %v5401_v59  ;;  %v478_v16 = vmul.u32 %v6172_v7, %v462_v40  ;;  %v481_v18 = vadd.s32 1, %v6237_v37  ;;  %vm480_vm7 = vc.u32 %v6244_v51, %v6236_v62 }
  0xd2   : > { %v295_v49 = vand.u32 2147483647, %v294_v36  ;;  %v391_v3 = vsub.s32 32, %v390_v4  ;;  %v395_v8 = vsub.s32 4294967266, %v390_v4  ;;  %v392_v48 = vshll.u32 %v6197_v39, %v390_v4 }
  0xd3   : > { %vm538_vm8 = vcmp.gt.s32.totalorder %v537_v60, 0  ;;  %v482_v22 = vsel %vm480_vm7, %v481_v18, %v6237_v37  ;;  %v412_v23 = vadd.s32 3, %v6252_v41  ;;  %v634_v30 = vand.u32 2139095040, %v6161_v0 }
  0xd4   : > { %v298_v17 = vmul.f32 %v297_v1, %v295_v49  ;;  %v393_v31 = vshrl.u32 %v375_v58, %v391_v3  ;;  %v396_v35 = vadd.s32 127, %v395_v8  ;;  %v539_v21 = vsel %vm538_vm8, %v537_v60, 0 }
  0xd5   : > { %v483_v26 = vadd.s32 %v482_v22, %v478_v16  ;;  %v541_v29 = vand.u32 31, %v539_v21  ;;  %v6264_v39 = vmul.f32 %v6034_v9, %v6149_v57  ;;  %v6271_v59 = vand.u32 3, %v308_v45 }
  0xd6   : > { %v299_v47 = vxor.u32 2147483648, %v298_v17  ;;  %v394_v7 = vor.u32 %v393_v31, %v392_v48  ;;  %v397_v42 = vshll.u32 %v396_v35, 23  ;;  %vm425_vm9 = vcmp.lt.s32.totalorder %v6059_v20, 0 }
  0xd7   : > { %v484_v53 = vadd.s32 536870912, %v483_v26  ;;  %v542_v43 = vsub.s32 32, %v541_v29  ;;  %v631_v37 = vand.u32 2147483647, %v6161_v0  ;;  %v6275_v36 = vand.u32 3, %v412_v23 }
  0xd8   : > { %v300_v34 = vsel %vm217_vm13, %v299_v47, %v298_v17  ;;  %v398_v32 = vor.u32 4788187, %v397_v42  ;;  %v6279_v40 = vshll.u32 %v535_v24, 8  ;;  %v401_v58 = vcvt.s32.f32 %v394_v7 }
  0xd9   : > { %v303_v15 = vsel %vm6186_vm14, %v6045_v13, %v300_v34  ;;  %v485_v9 = vshrl.u32 %v484_v53, 30  ;;  %v635_v25 = vshrl.u32 %v634_v30, 23  ;;  %vm6283_vm10 = vcmp.le.f32.partialorder %v423_v33, 0.7853982 }
  0xda   : > { %5756 = vcosq.f32 %v303_v15  ;;  %v399_v61 = vand.u32 2147483647, %v398_v32  ;;  %v6287_v49 = vshrl.u32 %v539_v21, 5  ;;  %v545_v1 = vshrl.u32 %v8691_v50, %v542_v43 }
  0xdb   : > { %5758 = vsinq.f32 %v303_v15  ;;  %v486_v60 = vshll.u32 %v485_v9, 30  ;;  %v548_v4 = vshrl.u32 %v8693_v52, %v542_v43  ;;  %v551_v24 = vshrl.u32 %v8703_v54, %v542_v43 }
  0xdc   : > { %v402_v44 = vmul.f32 %v401_v58, %v399_v61  ;;  %v553_v3 = vshll.u32 %v8703_v54, %v541_v29  ;;  %v554_v8 = vshrl.u32 %v5937_v56, %v542_v43  ;;  %vm314_vm11 = vcmp.eq.s32.totalorder %v6271_v59, 2 }
  0xdd   : > { %v6295_v33 = vsub.s32 %v483_v26, %v486_v60  ;;  %v509_v16 = vsub.s32 4, %v485_v9  ;;  %v544_v18 = vshll.u32 %v8708_v46, %v541_v29  ;;  %v547_v17 = vshll.u32 %v8691_v50, %v541_v29 }
  0xde   : > { %vm311_vm12 = vcmp.eq.s32.totalorder %v6271_v59, 0  ;;  %v403_v48 = vxor.u32 2147483648, %v402_v44  ;;  %v550_v31 = vshll.u32 %v8693_v52, %v541_v29  ;;  %v555_v35 = vor.u32 %v554_v8, %v553_v3 }
  0xdf   : > { %v557_v22 = vshrl.u32 %v5938_v63, %v542_v43  ;;  %vm310_vm13 = vcmp.lt.s32.totalorder %v6271_v59, 2  ;;  %v479_v21 = vadd.s32 %v6236_v62, %v6244_v51  ;;  %v489_v47 = vsub.s32 0, %v6295_v33 }
  0xe0   : > { %v546_v23 = vor.u32 %v545_v1, %v544_v18  ;;  %v549_v26 = vor.u32 %v548_v4, %v547_v17  ;;  %vm307_vm14 = vweird.f32 %v6045_v13  ;;  %v404_v7 = vsel %vm321_vm15, %v403_v48, %v402_v44 }
  0xe1   : > { %v552_v42 = vor.u32 %v551_v24, %v550_v31  ;;  %v556_v30 = vshll.u32 %v5937_v56, %v541_v29  ;;  %v5411_v34 = vadd.s32 4294967169, %v635_v25  ;;  %v407_v53 = vsel %vm6205_vm4, %v6049_v14, %v404_v7 }
  0xe2   : > { %v5404_v62 = vmin.u32 %v489_v47, %v6295_v33  ;;  %v510_v51 = vsel %vm425_vm9, %v509_v16, %v485_v9  ;;  %vm562_vm0 = vcmp.lt.s32.totalorder %v6287_v49, 4  ;;  %5760 = vcosq.f32 %v407_v53 }
  0xe3   : > { %v558_v15 = vor.u32 %v557_v22, %v556_v30  ;;  %vm559_vm1 = vcmp.lt.s32.totalorder %v6287_v49, 1  ;;  %v568_v32 = vsel %vm562_vm0, %v555_v35, 920167782  ;;  %5762 = vsinq.f32 %v407_v53 }
  0xe4   : > { %v6321_v29 = vpop.eup %5756  ;;  %v491_v2 = vclz %v5404_v62  ;;  %vm561_vm15 = vcmp.lt.s32.totalorder %v6287_v49, 3  ;;  %v567_v9 = vsel %vm559_vm1, %v546_v23, %v549_v26  ;;  %v6335_v25 = vsel %vm6283_vm10, 0, %v510_v51 }
  0xe5   : > { %v6330_v61 = vpop.eup %5758  ;;  %v8686_v58 = vxor.u32 2147483648, %v6321_v29  ;;  %v543_v60 = vshrl.u32 %v8708_v46, %v542_v43  ;;  %v569_v1 = vsel %vm561_vm15, %v552_v42, %v568_v32  ;;  %vm560_vm2 = vcmp.lt.s32.totalorder %v6287_v49, 2 }
  0xe6   : > { %v8687_v4 = vxor.u32 2147483648, %v6330_v61  ;;  %v5405_v44 = vadd.s32 4294967294, %v491_v2  ;;  %v564_v24 = vsel %vm562_vm0, %v552_v42, 2102212464  ;;  %v570_v43 = vsel %vm560_vm2, %v567_v9, %v569_v1 }
  0xe7   : > { %v316_v3 = vsel %vm314_vm11, %v8686_v58, %v6330_v61  ;;  %v571_v8 = vsel %vm559_vm1, %v549_v26, %v552_v42  ;;  %v572_v16 = vsel %vm562_vm0, %v558_v15, 1326507024  ;;  %v641_v48 = vadd.s32 1, %v5411_v34 }
  0xe8   : > { %v313_v18 = vsel %vm311_vm12, %v6321_v29, %v8687_v4  ;;  %vm5406_vm3 = vcmp.lt.s32.totalorder %v5405_v44, 0  ;;  %v573_v17 = vsel %vm561_vm15, %v555_v35, %v572_v16  ;;  %vm414_vm4 = vcmp.lt.s32.totalorder %v6275_v36, 2 }
  0xe9   : > { %v317_v31 = vsel %vm310_vm13, %v313_v18, %v316_v3  ;;  %v494_v22 = vsel %vm5406_vm3, 0, %v5405_v44  ;;  %v563_v47 = vsel %vm559_vm1, %v543_v60, %v546_v23  ;;  %v574_v7 = vsel %vm560_vm2, %v571_v8, %v573_v17 }
  0xea   : > { %v318_v42 = vsel %vm307_vm14, nan, %v317_v31  ;;  %vm411_vm5 = vweird.f32 %v6049_v14  ;;  %v495_v30 = vsub.s32 32, %v494_v22  ;;  %v499_v35 = vsub.s32 4294967266, %v494_v22 }
  0xeb   : > { %v565_v59 = vsel %vm561_vm15, %v549_v26, %v564_v24  ;;  %v6375_v34 = vmul.u32.u64.low %v6279_v40, %v574_v7  ;;  %v6376_v53 = vmul.u32.u64.high %v6279_v40, %v574_v7, %v6375_v34  ;;  %1047 = vst [vmem:[%s6384_s6] sm:$0xff] %v318_v42  ;;  %v496_v51 = vshll.u32 %v6295_v33, %v494_v22 }
  0xec   : > { %v6379_v62 = vmul.u32.u64.low %v6279_v40, %v570_v43  ;;  %v6380_v23 = vmul.u32.u64.high %v6279_v40, %v570_v43, %v6379_v62  ;;  %v497_v15 = vshrl.u32 %v479_v21, %v495_v30  ;;  %v500_v32 = vadd.s32 127, %v499_v35  ;;  %v6388_v2 = vpop.eup %5760 }
  0xed   : > { %vm642_vm6 = vcmp.gt.s32.totalorder %v641_v48, 0  ;;  %vm415_vm7 = vcmp.eq.s32.totalorder %v6275_v36, 0  ;;  %v566_v26 = vsel %vm560_vm2, %v563_v47, %v565_v59  ;;  %v638_v9 = vand.u32 8388607, %v631_v37  ;;  %v6395_v1 = vpop.eup %5762 }
  0xee   : > { %v643_v60 = vsel %vm642_vm6, %v641_v48, 0  ;;  %vm418_vm8 = vcmp.eq.s32.totalorder %v6275_v36, 2  ;;  %v8683_v33 = vxor.u32 2147483648, %v6388_v2  ;;  %v498_v21 = vor.u32 %v497_v15, %v496_v51 }
  0xef   : > { %v501_v44 = vshll.u32 %v500_v32, 23  ;;  %v8685_v24 = vxor.u32 2147483648, %v6395_v1  ;;  %v516_v3 = vadd.s32 3, %v6335_v25  ;;  %vm584_vm11 = vc.u32 %v6376_v53, %v6379_v62 }
  0xf0   : > { %v585_v49 = vadd.s32 1, %v6380_v23  ;;  %v420_v43 = vsel %vm418_vm8, %v8683_v33, %v6395_v1  ;;  %v582_v16 = vmul.u32 %v6279_v40, %v566_v26  ;;  %v645_v18 = vand.u32 31, %v643_v60 }
  0xf1   : > { %v502_v8 = vor.u32 4788187, %v501_v44  ;;  %v417_v17 = vsel %vm415_vm7, %v6388_v2, %v8685_v24  ;;  %v505_v48 = vcvt.s32.f32 %v498_v21  ;;  %v639_v22 = vor.u32 8388608, %v638_v9 }
  0xf2   : > { %v586_v31 = vsel %vm584_vm11, %v585_v49, %v6380_v23  ;;  %v421_v47 = vsel %vm414_vm4, %v417_v17, %v420_v43  ;;  %v646_v30 = vsub.s32 32, %v645_v18  ;;  %v6418_v35 = vand.u32 3, %v516_v3 }
  0xf3   : > { %v503_v7 = vand.u32 2147483647, %v502_v8  ;;  %v587_v42 = vadd.s32 %v586_v31, %v582_v16  ;;  %v422_v40 = vsel %vm411_vm5, nan, %v421_v47  ;;  %v644_v59 = vshrl.u32 %v643_v60, 5 }
  0xf4   : > { %v648_v34 = vshll.u32 %v8708_v46, %v645_v18  ;;  %v649_v32 = vshrl.u32 %v8691_v50, %v646_v30  ;;  %v651_v23 = vshll.u32 %v8691_v50, %v645_v18  ;;  %1048 = vst [vmem:[%s6384_s6 + $0x8] sm:$0xff] %v422_v40  ;;  %v652_v36 = vshrl.u32 %v8693_v52, %v646_v30 }
  0xf5   : > { %v506_v51 = vmul.f32 %v505_v48, %v503_v7  ;;  %v588_v15 = vadd.s32 536870912, %v587_v42  ;;  %v654_v26 = vshll.u32 %v8693_v52, %v645_v18  ;;  %v655_v9 = vshrl.u32 %v8703_v54, %v646_v30 }
  0xf6   : > { %v658_v21 = vshrl.u32 %v5937_v56, %v646_v30  ;;  %v650_v60 = vor.u32 %v649_v32, %v648_v34  ;;  %v657_v49 = vshll.u32 %v8703_v54, %v645_v18  ;;  %v653_v43 = vor.u32 %v652_v36, %v651_v23 }
  0xf7   : > { %v507_v44 = vxor.u32 2147483648, %v506_v51  ;;  %v589_v3 = vshrl.u32 %v588_v15, 30  ;;  %v656_v8 = vor.u32 %v655_v9, %v654_v26  ;;  %v660_v16 = vshll.u32 %v5937_v56, %v645_v18 }
  0xf8   : > { %v661_v17 = vshrl.u32 %v5938_v63, %v646_v30  ;;  %v659_v47 = vor.u32 %v658_v21, %v657_v49  ;;  %v6433_v7 = vshll.u32 %v639_v22, 8  ;;  %vm663_vm12 = vcmp.lt.s32.totalorder %v644_v59, 1 }
  0xf9   : > { %v508_v48 = vsel %vm425_vm9, %v507_v44, %v506_v51  ;;  %v590_v31 = vshll.u32 %v589_v3, 30  ;;  %v738_v15 = vand.u32 2139095040, %v6264_v39  ;;  %vm664_vm13 = vcmp.lt.s32.totalorder %v644_v59, 2 }
  0xfa   : > { %v511_v40 = vsel %vm6283_vm10, %v6059_v20, %v508_v48  ;;  %v662_v34 = vor.u32 %v661_v17, %v660_v16  ;;  %vm666_vm0 = vcmp.lt.s32.totalorder %v644_v59, 4  ;;  %v647_v18 = vshrl.u32 %v8708_v46, %v646_v30 }
  0xfb   : > { %5764 = vcosq.f32 %v511_v40  ;;  %v6439_v32 = vsub.s32 %v587_v42, %v590_v31  ;;  %v668_v51 = vsel %vm666_vm0, %v656_v8, 2102212464  ;;  %v671_v22 = vsel %vm663_vm12, %v650_v60, %v653_v43 }
  0xfc   : > { %5766 = vsinq.f32 %v511_v40  ;;  %v613_v36 = vsub.s32 4, %v589_v3  ;;  %vm665_vm9 = vcmp.lt.s32.totalorder %v644_v59, 3  ;;  %v672_v45 = vsel %vm666_vm0, %v659_v47, 920167782 }
  0xfd   : > { %v593_v23 = vsub.s32 0, %v6439_v32  ;;  %v667_v26 = vsel %vm663_vm12, %v647_v18, %v650_v60  ;;  %v673_v9 = vsel %vm665_vm9, %v656_v8, %v672_v45  ;;  %v675_v21 = vsel %vm663_vm12, %v653_v43, %v656_v8 }
  0xfe   : > { %v676_v42 = vsel %vm666_vm0, %v662_v34, 1326507024  ;;  %v669_v49 = vsel %vm665_vm9, %v653_v43, %v668_v51  ;;  %v674_v16 = vsel %vm664_vm13, %v671_v22, %v673_v9  ;;  %vm529_vm10 = vcmp.lt.s32.totalorder %v6072_v38, 0 }
  0xff   : > { %v5408_v44 = vmin.u32 %v593_v23, %v6439_v32  ;;  %v677_v30 = vsel %vm665_vm9, %v659_v47, %v676_v42  ;;  %v6451_v48 = vmul.u32.u64.low %v6433_v7, %v674_v16  ;;  %v6452_v31 = vmul.u32.u64.high %v6433_v7, %v674_v16, %v6451_v48 }
 0x100   : > { %v678_v17 = vsel %vm664_vm13, %v675_v21, %v677_v30  ;;  %v6456_v60 = vmul.f32 %v6041_v12, %v6149_v57  ;;  %v614_v40 = vsel %vm529_vm10, %v613_v36, %v589_v3  ;;  %v8688_v43 = vand.u32 2147483647, %v6264_v39 }
 0x101   : > { %v595_v8 = vclz %v5408_v44  ;;  %v670_v47 = vsel %vm664_vm13, %v667_v26, %v669_v49  ;;  %v6463_v34 = vmul.u32.u64.low %v6433_v7, %v678_v17  ;;  %v6464_v18 = vmul.u32.u64.high %v6433_v7, %v678_v17, %v6463_v34 }
 0x102   : > { %v739_v51 = vshrl.u32 %v738_v15, 23  ;;  %vm518_vm1 = vcmp.lt.s32.totalorder %v6418_v35, 2  ;;  %vm519_vm15 = vcmp.eq.s32.totalorder %v6418_v35, 0  ;;  %vm6470_vm2 = vcmp.le.f32.partialorder %v527_v55, 0.7853982 }
 0x103   : > { %v5409_v3 = vadd.s32 4294967294, %v595_v8  ;;  %vm522_vm3 = vcmp.eq.s32.totalorder %v6418_v35, 2  ;;  %v583_v59 = vadd.s32 %v6379_v62, %v6376_v53  ;;  %v689_v22 = vadd.s32 1, %v6452_v31 }
 0x104   : > { %v5415_v23 = vadd.s32 4294967169, %v739_v51  ;;  %v6482_v36 = vsel %vm6470_vm2, 0, %v614_v40  ;;  %v686_v55 = vmul.u32 %v6433_v7, %v670_v47  ;;  %v742_v45 = vand.u32 8388607, %v8688_v43 }
 0x105   : > { %v6478_v15 = vpop.eup %5764  ;;  %vm5410_vm4 = vcmp.lt.s32.totalorder %v5409_v3, 0  ;;  %vm688_vm6 = vc.u32 %v6464_v18, %v6451_v48  ;;  %v8684_v62 = vand.u32 2147483647, %v6456_v60  ;;  %v842_v49 = vand.u32 2139095040, %v6456_v60 }
 0x106   : > { %v6487_v26 = vpop.eup %5766  ;;  %v8681_v9 = vxor.u32 2147483648, %v6478_v15  ;;  %v598_v53 = vsel %vm5410_vm4, 0, %v5409_v3  ;;  %v690_v30 = vsel %vm688_vm6, %v689_v22, %v6452_v31  ;;  %v745_v17 = vadd.s32 1, %v5415_v23 }
 0x107   : > { %v8682_v21 = vxor.u32 2147483648, %v6487_v26  ;;  %v599_v42 = vsub.s32 32, %v598_v53  ;;  %v603_v44 = vsub.s32 4294967266, %v598_v53  ;;  %v600_v16 = vshll.u32 %v6439_v32, %v598_v53 }
 0x108   : > { %v524_v7 = vsel %vm522_vm3, %v8681_v9, %v6487_v26  ;;  %v691_v34 = vadd.s32 %v690_v30, %v686_v55  ;;  %vm515_vm7 = vweird.f32 %v6059_v20  ;;  %v620_v32 = vadd.s32 3, %v6482_v36 }
 0x109   : > { %v521_v8 = vsel %vm519_vm15, %v6478_v15, %v8682_v21  ;;  %v601_v40 = vshrl.u32 %v583_v59, %v599_v42  ;;  %v604_v47 = vadd.s32 127, %v603_v44  ;;  %vm746_vm8 = vcmp.gt.s32.totalorder %v745_v17, 0 }
 0x10a   : > { %v525_v51 = vsel %vm518_vm1, %v521_v8, %v524_v7  ;;  %v692_v23 = vadd.s32 536870912, %v691_v34  ;;  %v743_v53 = vor.u32 8388608, %v742_v45  ;;  %v747_v9 = vsel %vm746_vm8, %v745_v17, 0 }
 0x10b   : > { %v526_v31 = vsel %vm515_vm7, nan, %v525_v51  ;;  %v602_v3 = vor.u32 %v601_v40, %v600_v16  ;;  %v605_v22 = vshll.u32 %v604_v47, 23  ;;  %v6514_v59 = vand.u32 8388607, %v8684_v62 }
 0x10c   : > { %1049 = vst [vmem:[%s6384_s6 + $0x10] sm:$0xff] %v526_v31  ;;  %v693_v42 = vshrl.u32 %v692_v23, 30  ;;  %v843_v35 = vshrl.u32 %v842_v49, 23  ;;  %v6519_v44 = vmul.f32 %v6066_v27, %v6149_v57  ;;  %v6521_v7 = vand.u32 3, %v620_v32 }
 0x10d   : > { %v606_v55 = vor.u32 4788187, %v605_v22  ;;  %vm633_vm11 = vcmp.lt.s32.totalorder %v6161_v0, 0  ;;  %v749_v16 = vand.u32 31, %v747_v9  ;;  %v609_v45 = vcvt.s32.f32 %v602_v3 }
 0x10e   : > { %vm6526_vm12 = vcmp.le.f32.partialorder %v631_v37, 0.7853982  ;;  %v6531_v8 = vadd.s32 %v6451_v48, %v6464_v18  ;;  %v694_v49 = vshll.u32 %v693_v42, 30  ;;  %v717_v40 = vsub.s32 4, %v693_v42 }
 0x10f   : > { %v607_v30 = vand.u32 2147483647, %v606_v55  ;;  %v750_v27 = vsub.s32 32, %v749_v16  ;;  %v6533_v47 = vshll.u32 %v743_v53, 8  ;;  %v847_v51 = vor.u32 8388608, %v6514_v59 }
 0x110   : > { %v6536_v31 = vsub.s32 %v691_v34, %v694_v49  ;;  %v748_v3 = vshrl.u32 %v747_v9, 5  ;;  %v5419_v22 = vadd.s32 4294967169, %v843_v35  ;;  %v752_v37 = vshll.u32 %v8708_v46, %v749_v16 }
 0x111   : > { %v610_v32 = vmul.f32 %v609_v45, %v607_v30  ;;  %v753_v23 = vshrl.u32 %v8691_v50, %v750_v27  ;;  %v755_v55 = vshll.u32 %v8691_v50, %v749_v16  ;;  %v756_v48 = vshrl.u32 %v8693_v52, %v750_v27 }
 0x112   : > { %v697_v21 = vsub.s32 0, %v6536_v31  ;;  %v758_v53 = vshll.u32 %v8693_v52, %v749_v16  ;;  %v759_v33 = vshrl.u32 %v8703_v54, %v750_v27  ;;  %v718_v34 = vsel %vm633_vm11, %v717_v40, %v693_v42 }
 0x113   : > { %v611_v18 = vxor.u32 2147483648, %v610_v32  ;;  %v754_v9 = vor.u32 %v753_v23, %v752_v37  ;;  %v761_v35 = vshll.u32 %v8703_v54, %v749_v16  ;;  %v762_v30 = vshrl.u32 %v5937_v56, %v750_v27 }
 0x114   : > { %v5412_v49 = vmin.u32 %v697_v21, %v6536_v31  ;;  %v757_v62 = vor.u32 %v756_v48, %v755_v55  ;;  %v764_v24 = vshll.u32 %v5937_v56, %v749_v16  ;;  %v760_v4 = vor.u32 %v759_v33, %v758_v53 }
 0x115   : > { %v612_v45 = vsel %vm529_vm10, %v611_v18, %v610_v32  ;;  %v763_v43 = vor.u32 %v762_v30, %v761_v35  ;;  %v765_v42 = vshrl.u32 %v5938_v63, %v750_v27  ;;  %vm767_vm13 = vcmp.lt.s32.totalorder %v748_v3, 1 }
 0x116   : > { %v615_v58 = vsel %vm6470_vm2, %v6072_v38, %v612_v45  ;;  %v699_v40 = vclz %v5412_v49  ;;  %v849_v37 = vadd.s32 1, %v5419_v22  ;;  %v6559_v32 = vsel %vm6526_vm12, 0, %v718_v34 }
 0x117   : > { %5768 = vcosq.f32 %v615_v58  ;;  %v751_v21 = vshrl.u32 %v8708_v46, %v750_v27  ;;  %v766_v16 = vor.u32 %v765_v42, %v764_v24  ;;  %vm769_vm0 = vcmp.lt.s32.totalorder %v748_v3, 3 }
 0x118   : > { %5770 = vsinq.f32 %v615_v58  ;;  %v5413_v23 = vadd.s32 4294967294, %v699_v40  ;;  %vm770_vm9 = vcmp.lt.s32.totalorder %v748_v3, 4  ;;  %v775_v33 = vsel %vm767_vm13, %v754_v9, %v757_v62 }
 0x119   : > { %v772_v12 = vsel %vm770_vm9, %v760_v4, 2102212464  ;;  %v776_v55 = vsel %vm770_vm9, %v763_v43, 920167782  ;;  %v779_v48 = vsel %vm767_vm13, %v757_v62, %v760_v4  ;;  %v780_v18 = vsel %vm770_vm9, %v766_v16, 1326507024 }
 0x11a   : > { %vm5414_vm10 = vcmp.lt.s32.totalorder %v5413_v23, 0  ;;  %vm768_vm1 = vcmp.lt.s32.totalorder %v748_v3, 2  ;;  %v777_v58 = vsel %vm769_vm0, %v760_v4, %v776_v55  ;;  %v781_v22 = vsel %vm769_vm0, %v763_v43, %v780_v18 }
 0x11b   : > { %vm623_vm15 = vcmp.eq.s32.totalorder %v6521_v7, 0  ;;  %v702_v27 = vsel %vm5414_vm10, 0, %v5413_v23  ;;  %v724_v24 = vadd.s32 3, %v6559_v32  ;;  %v778_v53 = vsel %vm768_vm1, %v775_v33, %v777_v58 }
 0x11c   : > { %v782_v34 = vsel %vm768_vm1, %v779_v48, %v781_v22  ;;  %vm622_vm2 = vcmp.lt.s32.totalorder %v6521_v7, 2  ;;  %v703_v35 = vsub.s32 32, %v702_v27  ;;  %v707_v30 = vsub.s32 4294967266, %v702_v27 }
 0x11d   : > { %v771_v45 = vsel %vm767_vm13, %v751_v21, %v754_v9  ;;  %v773_v49 = vsel %vm769_vm0, %v757_v62, %v772_v12  ;;  %vm619_vm3 = vweird.f32 %v6072_v38  ;;  %v704_v16 = vshll.u32 %v6536_v31, %v702_v27 }
 0x11e   : > { %v6575_v4 = vmul.u32.u64.low %v6533_v47, %v782_v34  ;;  %v6576_v43 = vmul.u32.u64.high %v6533_v47, %v782_v34, %v6575_v4  ;;  %v6579_v42 = vmul.u32.u64.low %v6533_v47, %v778_v53  ;;  %v6580_v40 = vmul.u32.u64.high %v6533_v47, %v778_v53, %v6579_v42 }
 0x11f   : > { %v705_v23 = vshrl.u32 %v6531_v8, %v703_v35  ;;  %v708_v33 = vadd.s32 127, %v707_v30  ;;  %vm850_vm4 = vcmp.gt.s32.totalorder %v849_v37, 0  ;;  %vm626_vm6 = vcmp.eq.s32.totalorder %v6521_v7, 2 }
 0x120   : > { %v774_v62 = vsel %vm768_vm1, %v771_v45, %v773_v49  ;;  %v851_v9 = vsel %vm850_vm4, %v849_v37, 0  ;;  %v6589_v21 = vshll.u32 %v847_v51, 8  ;;  %v6597_v22 = vand.u32 3, %v724_v24 }
 0x121   : > { %v6591_v12 = vpop.eup %5768  ;;  %v706_v55 = vor.u32 %v705_v23, %v704_v16  ;;  %v709_v48 = vshll.u32 %v708_v33, 23  ;;  %v853_v18 = vand.u32 31, %v851_v9  ;;  %vm792_vm8 = vc.u32 %v6576_v43, %v6579_v42 }
 0x122   : > { %v6594_v58 = vpop.eup %5770  ;;  %v8689_v8 = vxor.u32 2147483648, %v6591_v12  ;;  %v793_v59 = vadd.s32 1, %v6580_v40  ;;  %v790_v37 = vmul.u32 %v6533_v47, %v774_v62  ;;  %vm737_vm13 = vcmp.lt.s32.totalorder %v6264_v39, 0 }
 0x123   : > { %v8690_v51 = vxor.u32 2147483648, %v6594_v58  ;;  %v710_v3 = vor.u32 4788187, %v709_v48  ;;  %v854_v27 = vsub.s32 32, %v853_v18  ;;  %v946_v34 = vand.u32 2139095040, %v6519_v44 }
 0x124   : > { %v628_v53 = vsel %vm626_vm6, %v8689_v8, %v6594_v58  ;;  %v794_v24 = vsel %vm792_vm8, %v793_v59, %v6580_v40  ;;  %v6613_v35 = vand.u32 3, %v6223_v28  ;;  %v713_v45 = vcvt.s32.f32 %v706_v55 }
 0x125   : > { %v625_v47 = vsel %vm623_vm15, %v6591_v12, %v8690_v51  ;;  %v711_v30 = vand.u32 2147483647, %v710_v3  ;;  %v795_v49 = vadd.s32 %v794_v24, %v790_v37  ;;  %v856_v40 = vshll.u32 %v8708_v46, %v853_v18 }
 0x126   : > { %v629_v4 = vsel %vm622_vm2, %v625_v47, %v628_v53  ;;  %v857_v16 = vshrl.u32 %v8691_v50, %v854_v27  ;;  %v860_v28 = vshrl.u32 %v8693_v52, %v854_v27  ;;  %v8738_v62 = vand.u32 2147483647, %v6264_v39 }
 0x127   : > { %v630_v23 = vsel %vm619_vm3, nan, %v629_v4  ;;  %v714_v33 = vmul.f32 %v713_v45, %v711_v30  ;;  %v796_v55 = vadd.s32 536870912, %v795_v49  ;;  %v863_v7 = vshrl.u32 %v8703_v54, %v854_v27 }
 0x128   : > { %vm6629_vm0 = vcmp.le.f32.partialorder %v8738_v62, 0.7853982  ;;  %v852_v59 = vshrl.u32 %v851_v9, 5  ;;  %v859_v3 = vshll.u32 %v8691_v50, %v853_v18  ;;  %v862_v37 = vshll.u32 %v8693_v52, %v853_v18  ;;  %1050 = vst [vmem:[%s6384_s6 + $0x18] sm:$0xff] %v630_v23 }
 0x129   : > { %v866_v53 = vshrl.u32 %v5937_v56, %v854_v27  ;;  %v715_v24 = vxor.u32 2147483648, %v714_v33  ;;  %v797_v47 = vshrl.u32 %v796_v55, 30  ;;  %v858_v30 = vor.u32 %v857_v16, %v856_v40 }
 0x12a   : > { %v865_v45 = vshll.u32 %v8703_v54, %v853_v18  ;;  %v861_v4 = vor.u32 %v860_v28, %v859_v3  ;;  %v864_v62 = vor.u32 %v863_v7, %v862_v37  ;;  %v868_v8 = vshll.u32 %v5937_v56, %v853_v18 }
 0x12b   : > { %v869_v51 = vshrl.u32 %v5938_v63, %v854_v27  ;;  %v716_v9 = vsel %vm633_vm11, %v715_v24, %v714_v33  ;;  %v798_v50 = vshll.u32 %v797_v47, 30  ;;  %v821_v31 = vsub.s32 4, %v797_v47 }
 0x12c   : > { %v867_v52 = vor.u32 %v866_v53, %v865_v45  ;;  %v719_v23 = vsel %vm6526_vm12, %v6161_v0, %v716_v9  ;;  %v855_v40 = vshrl.u32 %v8708_v46, %v854_v27  ;;  %vm871_vm9 = vcmp.lt.s32.totalorder %v852_v59, 1 }
 0x12d   : > { %v870_v16 = vor.u32 %v869_v51, %v868_v8  ;;  %5772 = vcosq.f32 %v719_v23  ;;  %v6647_v28 = vsub.s32 %v795_v49, %v798_v50  ;;  %v822_v18 = vsel %vm737_vm13, %v821_v31, %v797_v47 }
 0x12e   : > { %vm874_vm10 = vcmp.lt.s32.totalorder %v852_v59, 4  ;;  %5774 = vsinq.f32 %v719_v23  ;;  %vm872_vm11 = vcmp.lt.s32.totalorder %v852_v59, 2  ;;  %v879_v55 = vsel %vm871_vm9, %v858_v30, %v861_v4 }
 0x12f   : > { %v876_v33 = vsel %vm874_vm10, %v864_v62, 2102212464  ;;  %v801_v7 = vsub.s32 0, %v6647_v28  ;;  %vm873_vm1 = vcmp.lt.s32.totalorder %v852_v59, 3  ;;  %v875_v17 = vsel %vm871_vm9, %v855_v40, %v858_v30 }
 0x130   : > { %v880_v3 = vsel %vm874_vm10, %v867_v52, 920167782  ;;  %v6654_v8 = vsel %vm6629_vm0, 0, %v822_v18  ;;  %v883_v50 = vsel %vm871_vm9, %v861_v4, %v864_v62  ;;  %v884_v27 = vsel %vm874_vm10, %v870_v16, 1326507024 }
 0x131   : > { %v881_v51 = vsel %vm873_vm1, %v864_v62, %v880_v3  ;;  %v5416_v49 = vmin.u32 %v801_v7, %v6647_v28  ;;  %v877_v31 = vsel %vm873_vm1, %v861_v4, %v876_v33  ;;  %v885_v53 = vsel %vm873_vm1, %v867_v52, %v884_v27 }
 0x132   : > { %v882_v37 = vsel %vm872_vm11, %v879_v55, %v881_v51  ;;  %v886_v24 = vsel %vm872_vm11, %v883_v50, %v885_v53  ;;  %v947_v30 = vshrl.u32 %v946_v34, 23  ;;  %vm726_vm12 = vcmp.lt.s32.totalorder %v6597_v22, 2 }
 0x133   : > { %v6660_v47 = vmul.u32.u64.low %v6589_v21, %v882_v37  ;;  %v6661_v45 = vmul.u32.u64.high %v6589_v21, %v882_v37, %v6660_v47  ;;  %vm727_vm15 = vcmp.eq.s32.totalorder %v6597_v22, 0  ;;  %vm730_vm2 = vcmp.eq.s32.totalorder %v6597_v22, 2 }
 0x134   : > { %v803_v62 = vclz %v5416_v49  ;;  %vm723_vm4 = vweird.f32 %v6161_v0  ;;  %v878_v4 = vsel %vm872_vm11, %v875_v17, %v877_v31  ;;  %v5423_v23 = vadd.s32 4294967169, %v947_v30 }
 0x135   : > { %v6669_v52 = vmul.u32.u64.low %v6589_v21, %v886_v24  ;;  %v6670_v9 = vmul.u32.u64.high %v6589_v21, %v886_v24, %v6669_v52  ;;  %v791_v40 = vadd.s32 %v6579_v42, %v6576_v43  ;;  %v828_v16 = vadd.s32 3, %v6654_v8 }
 0x136   : > { %v5417_v34 = vadd.s32 4294967294, %v803_v62  ;;  %v8741_v18 = vand.u32 2147483647, %v6519_v44  ;;  %v897_v55 = vadd.s32 1, %v6661_v45  ;;  %v953_v7 = vadd.s32 1, %v5423_v23 }
 0x137   : > { %vm1150_vm6 = vcmp.eq.s32.totalorder %v6613_v35, 0  ;;  %vm1153_vm8 = vcmp.eq.s32.totalorder %v6613_v35, 2  ;;  %v6680_v59 = vpop.eup %5772  ;;  %v894_v17 = vmul.u32 %v6589_v21, %v878_v4  ;;  %v8742_v43 = vxor.u32 2147483648, %v6330_v61 }
 0x138   : > { %v950_v33 = vand.u32 8388607, %v8741_v18  ;;  %vm5418_vm9 = vcmp.lt.s32.totalorder %v5417_v34, 0  ;;  %v8743_v3 = vxor.u32 2147483648, %v6321_v29  ;;  %v6689_v50 = vpop.eup %5774  ;;  %v8695_v27 = vxor.u32 2147483648, %v6680_v59 }
 0x139   : > { %v1152_v42 = vsel %vm1150_vm6, %v6321_v29, %v8742_v43  ;;  %v806_v49 = vsel %vm5418_vm9, 0, %v5417_v34  ;;  %vm896_vm10 = vc.u32 %v6670_v9, %v6660_v47  ;;  %vm1149_vm11 = vcmp.lt.s32.totalorder %v6613_v35, 2 }
 0x13a   : > { %v1155_v51 = vsel %vm1153_vm8, %v8743_v3, %v6330_v61  ;;  %v728_v31 = vxor.u32 2147483648, %v6689_v50  ;;  %v807_v21 = vsub.s32 32, %v806_v49  ;;  %v808_v37 = vshll.u32 %v6647_v28, %v806_v49 }
 0x13b   : > { %v811_v53 = vsub.s32 4294967266, %v806_v49  ;;  %v732_v29 = vsel %vm730_vm2, %v8695_v27, %v6689_v50  ;;  %v898_v61 = vsel %vm896_vm10, %v897_v55, %v6661_v45  ;;  %vm954_vm1 = vcmp.gt.s32.totalorder %v953_v7, 0 }
 0x13c   : > { %v1156_v24 = vsel %vm1149_vm11, %v1152_v42, %v1155_v51  ;;  %v729_v35 = vsel %vm727_vm15, %v6680_v59, %v728_v31  ;;  %v809_v28 = vshrl.u32 %v791_v40, %v807_v21  ;;  %v899_v62 = vadd.s32 %v898_v61, %v894_v17 }
 0x13d   : > { %v812_v30 = vadd.s32 127, %v811_v53  ;;  %v733_v4 = vsel %vm726_vm12, %v729_v35, %v732_v29  ;;  %v951_v52 = vor.u32 8388608, %v950_v33  ;;  %v955_v23 = vsel %vm954_vm1, %v953_v7, 0 }
 0x13e   : > { %v1157_v45 = vsel %vm307_vm14, nan, %v1156_v24  ;;  %v734_v34 = vsel %vm723_vm4, nan, %v733_v4  ;;  %v810_v18 = vor.u32 %v809_v28, %v808_v37  ;;  %v900_v43 = vadd.s32 536870912, %v899_v62 }
 0x13f   : > { %v813_v55 = vshll.u32 %v812_v30, 23  ;;  %1879 = vst [vmem:[%s6384_s6 + $0x40] sm:$0xff] %v1157_v45  ;;  %v957_v42 = vand.u32 31, %v955_v23  ;;  %1051 = vst [vmem:[%s6384_s6 + $0x20] sm:$0xff] %v734_v34  ;;  %v6716_v40 = vand.u32 3, %v6252_v41  ;;  %v6718_v22 = vand.u32 3, %v828_v16 }
 0x140   : > { %vm841_vm12 = vcmp.lt.s32.totalorder %v6456_v60, 0  ;;  %v901_v33 = vshrl.u32 %v900_v43, 30  ;;  %v6722_v13 = vadd.s32 %v6660_v47, %v6670_v9  ;;  %v6724_v3 = vshll.u32 %v951_v52, 8 }
 0x141   : > { %v814_v17 = vor.u32 4788187, %v813_v55  ;;  %v958_v7 = vsub.s32 32, %v957_v42  ;;  %v6727_v51 = vand.u32 3, %v6335_v25  ;;  %v817_v21 = vcvt.s32.f32 %v810_v18 }
 0x142   : > { %v902_v37 = vshll.u32 %v901_v33, 30  ;;  %v956_v41 = vshrl.u32 %v955_v23, 5  ;;  %v8744_v53 = vmov 2475754826   ;;  %v8745_v16 = vmov 2131351028  }
 0x143   : > { %v815_v49 = vand.u32 2147483647, %v814_v17  ;;  %v961_v29 = vshrl.u32 %v8744_v53, %v958_v7  ;;  %v964_v61 = vshrl.u32 %v8745_v16, %v958_v7  ;;  %v967_v24 = vshrl.u32 %v8703_v54, %v958_v7 }
 0x144   : > { %vm1253_vm14 = vcmp.eq.s32.totalorder %v6716_v40, 0  ;;  %v6733_v9 = vsub.s32 %v899_v62, %v902_v37  ;;  %v960_v35 = vshll.u32 %v8708_v46, %v957_v42  ;;  %v970_v25 = vshrl.u32 %v5937_v56, %v958_v7 }
 0x145   : > { %v818_v47 = vmul.f32 %v817_v21, %v815_v49  ;;  %vm1256_vm15 = vcmp.eq.s32.totalorder %v6716_v40, 2  ;;  %v925_v28 = vsub.s32 4, %v901_v33  ;;  %v963_v30 = vshll.u32 %v8744_v53, %v957_v42 }
 0x146   : > { %v966_v4 = vshll.u32 %v8745_v16, %v957_v42  ;;  %v8746_v52 = vxor.u32 2147483648, %v6395_v1  ;;  %v905_v34 = vsub.s32 0, %v6733_v9  ;;  %v962_v62 = vor.u32 %v961_v29, %v960_v35 }
 0x147   : > { %v819_v45 = vxor.u32 2147483648, %v818_v47  ;;  %v969_v18 = vshll.u32 %v8703_v54, %v957_v42  ;;  %v965_v55 = vor.u32 %v964_v61, %v963_v30  ;;  %v972_v17 = vshll.u32 %v5937_v56, %v957_v42 }
 0x148   : > { %v1255_v23 = vsel %vm1253_vm14, %v6388_v2, %v8746_v52  ;;  %v968_v43 = vor.u32 %v967_v24, %v966_v4  ;;  %v973_v49 = vshrl.u32 %v5938_v63, %v958_v7  ;;  %vm1252_vm2 = vcmp.lt.s32.totalorder %v6716_v40, 2 }
 0x149   : > { %v820_v21 = vsel %vm737_vm13, %v819_v45, %v818_v47  ;;  %v5420_v37 = vmin.u32 %v905_v34, %v6733_v9  ;;  %v959_v52 = vshrl.u32 %v8708_v46, %v958_v7  ;;  %v971_v27 = vor.u32 %v970_v25, %v969_v18 }
 0x14a   : > { %v823_v29 = vsel %vm6629_vm0, %v6264_v39, %v820_v21  ;;  %v926_v61 = vsel %vm841_vm12, %v925_v28, %v901_v33  ;;  %v974_v42 = vor.u32 %v973_v49, %v972_v17  ;;  %vm975_vm6 = vcmp.lt.s32.totalorder %v956_v41, 1 }
 0x14b   : > { %5776 = vcosq.f32 %v823_v29  ;;  %v907_v24 = vclz %v5420_v37  ;;  %vm977_vm8 = vcmp.lt.s32.totalorder %v956_v41, 3  ;;  %vm978_vm9 = vcmp.lt.s32.totalorder %v956_v41, 4 }
 0x14c   : > { %5778 = vsinq.f32 %v823_v29  ;;  %v8747_v47 = vand.u32 2147483647, %v6456_v60  ;;  %v979_v7 = vsel %vm975_vm6, %v959_v52, %v962_v62  ;;  %v980_v25 = vsel %vm978_vm9, %v968_v43, 2102212464 }
 0x14d   : > { %v983_v48 = vsel %vm975_vm6, %v962_v62, %v965_v55  ;;  %v5421_v30 = vadd.s32 4294967294, %v907_v24  ;;  %v981_v4 = vsel %vm977_vm8, %v965_v55, %v980_v25  ;;  %v984_v33 = vsel %vm978_vm9, %v971_v27, 920167782 }
 0x14e   : > { %vm6759_vm13 = vcmp.le.f32.partialorder %v8747_v47, 0.7853982  ;;  %v987_v28 = vsel %vm975_vm6, %v965_v55, %v968_v43  ;;  %vm976_vm0 = vcmp.lt.s32.totalorder %v956_v41, 2  ;;  %v985_v45 = vsel %vm977_vm8, %v968_v43, %v984_v33 }
 0x14f   : > { %v988_v34 = vsel %vm978_vm9, %v974_v42, 1326507024  ;;  %v8750_v18 = vxor.u32 2147483648, %v6388_v2  ;;  %vm834_vm10 = vcmp.eq.s32.totalorder %v6718_v22, 2  ;;  %vm5422_vm11 = vcmp.lt.s32.totalorder %v5421_v30, 0 }
 0x150   : > { %v982_v49 = vsel %vm976_vm0, %v979_v7, %v981_v4  ;;  %v986_v62 = vsel %vm976_vm0, %v983_v48, %v985_v45  ;;  %v989_v21 = vsel %vm977_vm8, %v971_v27, %v988_v34  ;;  %vm831_vm1 = vcmp.eq.s32.totalorder %v6718_v22, 0 }
 0x151   : > { %v1258_v17 = vsel %vm1256_vm15, %v8750_v18, %v6395_v1  ;;  %v910_v55 = vsel %vm5422_vm11, 0, %v5421_v30  ;;  %v990_v37 = vsel %vm976_vm0, %v987_v28, %v989_v21  ;;  %vm830_vm14 = vcmp.lt.s32.totalorder %v6718_v22, 2 }
 0x152   : > { %v6774_v43 = vmul.u32.u64.low %v6724_v3, %v986_v62  ;;  %v6775_v52 = vmul.u32.u64.high %v6724_v3, %v986_v62, %v6774_v43  ;;  %v911_v2 = vsub.s32 32, %v910_v55  ;;  %v912_v1 = vshll.u32 %v6733_v9, %v910_v55 }
 0x153   : > { %v915_v29 = vsub.s32 4294967266, %v910_v55  ;;  %v1259_v41 = vsel %vm1252_vm2, %v1255_v23, %v1258_v17  ;;  %vm827_vm15 = vweird.f32 %v6264_v39  ;;  %vm1355_vm6 = vcmp.lt.s32.totalorder %v6727_v51, 2 }
 0x154   : > { %v6784_v27 = vmul.u32.u64.low %v6724_v3, %v990_v37  ;;  %v6785_v42 = vmul.u32.u64.high %v6724_v3, %v990_v37, %v6784_v27  ;;  %v1260_v24 = vsel %vm411_vm5, nan, %v1259_v41  ;;  %v913_v47 = vshrl.u32 %v6722_v13, %v911_v2 }
 0x155   : > { %v916_v7 = vadd.s32 127, %v915_v29  ;;  %vm1356_vm8 = vcmp.eq.s32.totalorder %v6727_v51, 0  ;;  %vm1359_vm9 = vcmp.eq.s32.totalorder %v6727_v51, 2  ;;  %1880 = vst [vmem:[%s6384_s6 + $0x48] sm:$0xff] %v1260_v24  ;;  %v1001_v40 = vadd.s32 1, %v6775_v52  ;;  %v5777_v13 = vpop.eup %5776 }
 0x156   : > { %v8751_v9 = vxor.u32 2147483648, %v6487_v26  ;;  %v8752_v14 = vxor.u32 2147483648, %v6478_v15  ;;  %v1457_v48 = vand.u32 3, %v6482_v36  ;;  %v914_v30 = vor.u32 %v913_v47, %v912_v1  ;;  %v5779_v28 = vpop.eup %5778 }
 0x157   : > { %v917_v4 = vshll.u32 %v916_v7, 23  ;;  %v6804_v51 = vsel %vm6759_vm13, 0, %v926_v61  ;;  %v835_v45 = vxor.u32 2147483648, %v5777_v13  ;;  %v998_v34 = vmul.u32 %v6724_v3, %v982_v49 }
 0x158   : > { %v1358_v23 = vsel %vm1356_vm8, %v6478_v15, %v8751_v9  ;;  %v1361_v25 = vsel %vm1359_vm9, %v8752_v14, %v6487_v26  ;;  %vm1000_vm5 = vc.u32 %v6785_v42, %v6774_v43  ;;  %v832_v26 = vxor.u32 2147483648, %v5779_v28 }
 0x159   : > { %v1362_v33 = vsel %vm1355_vm6, %v1358_v23, %v1361_v25  ;;  %v918_v36 = vor.u32 4788187, %v917_v4  ;;  %v1002_v18 = vsel %vm1000_vm5, %v1001_v40, %v6775_v52  ;;  %v1560_v17 = vand.u32 3, %v6559_v32 }
 0x15a   : > { %v1363_v15 = vsel %vm515_vm7, nan, %v1362_v33  ;;  %v836_v61 = vsel %vm834_vm10, %v835_v45, %v5779_v28  ;;  %v921_v62 = vcvt.s32.f32 %v914_v30  ;;  %v1003_v21 = vadd.s32 %v1002_v18, %v998_v34 }
 0x15b   : > { %1881 = vst [vmem:[%s6384_s6 + $0x50] sm:$0xff] %v1363_v15  ;;  %vm1459_vm2 = vcmp.eq.s32.totalorder %v1457_v48, 0  ;;  %v833_v3 = vsel %vm831_vm1, %v5777_v13, %v832_v26  ;;  %v919_v49 = vand.u32 2147483647, %v918_v36  ;;  %v8753_v20 = vxor.u32 2147483648, %v6594_v58 }
 0x15c   : > { %vm1462_vm7 = vcmp.eq.s32.totalorder %v1457_v48, 2  ;;  %v837_v32 = vsel %vm830_vm14, %v833_v3, %v836_v61  ;;  %v1004_v37 = vadd.s32 536870912, %v1003_v21  ;;  %vm1458_vm0 = vcmp.lt.s32.totalorder %v1457_v48, 2 }
 0x15d   : > { %v1461_v55 = vsel %vm1459_vm2, %v6591_v12, %v8753_v20  ;;  %v8754_v52 = vxor.u32 2147483648, %v6591_v12  ;;  %v838_v1 = vsel %vm827_vm15, nan, %v837_v32  ;;  %v922_v29 = vmul.f32 %v921_v62, %v919_v49 }
 0x15e   : > { %vm1562_vm10 = vcmp.eq.s32.totalorder %v1560_v17, 0  ;;  %v1005_v27 = vshrl.u32 %v1004_v37, 30  ;;  %1052 = vst [vmem:[%s6384_s6 + $0x28] sm:$0xff] %v838_v1  ;;  %vm1565_vm11 = vcmp.eq.s32.totalorder %v1560_v17, 2  ;;  %vm1561_vm1 = vcmp.lt.s32.totalorder %v1560_v17, 2 }
 0x15f   : > { %v1464_v2 = vsel %vm1462_vm7, %v8754_v52, %v6594_v58  ;;  %v1564_v22 = vsel %vm1562_vm10, %v6680_v59, %v728_v31  ;;  %v923_v47 = vxor.u32 2147483648, %v922_v29  ;;  %v8755_v12 = vxor.u32 2147483648, %v6680_v59 }
 0x160   : > { %v1465_v41 = vsel %vm1458_vm0, %v1461_v55, %v1464_v2  ;;  %v1663_v7 = vand.u32 3, %v6654_v8  ;;  %v1006_v40 = vshll.u32 %v1005_v27, 30  ;;  %v932_v23 = vadd.s32 3, %v6804_v51  ;;  %v6849_v8 = vld [vmem:[%s6023_s3 + $0x1] ss:$4 sm:$0xf] }
 0x161   : > { %v1466_v24 = vsel %vm619_vm3, nan, %v1465_v41  ;;  %v1567_v58 = vsel %vm1565_vm11, %v8755_v12, %v6689_v50  ;;  %v924_v38 = vsel %vm841_vm12, %v923_v47, %v922_v29  ;;  %v1029_v50 = vsub.s32 4, %v1005_v27 }
 0x162   : > { %1882 = vst [vmem:[%s6384_s6 + $0x58] sm:$0xff] %v1466_v24  ;;  %v1568_v9 = vsel %vm1561_vm1, %v1564_v22, %v1567_v58  ;;  %vm1665_vm3 = vcmp.eq.s32.totalorder %v1663_v7, 0  ;;  %v927_v14 = vsel %vm6759_vm13, %v6456_v60, %v924_v38  ;;  %v1007_v59 = vsub.s32 %v1003_v21, %v1006_v40 }
 0x163   : > { %v1569_v31 = vsel %vm723_vm4, nan, %v1568_v9  ;;  %v1667_v25 = vsel %vm1665_vm3, %v5777_v13, %v832_v26  ;;  %5780 = vcosq.f32 %v927_v14  ;;  %vm1668_vm14 = vcmp.eq.s32.totalorder %v1663_v7, 2 }
 0x164   : > { %1883 = vst [vmem:[%s6384_s6 + $0x60] sm:$0xff] %v1569_v31  ;;  %5782 = vsinq.f32 %v927_v14  ;;  %v1009_v48 = vsub.s32 0, %v1007_v59  ;;  %vm1664_vm12 = vcmp.lt.s32.totalorder %v1663_v7, 2  ;;  %v1670_v30 = vsel %vm1668_vm14, %v835_v45, %v5779_v28 }
 0x165   : > { %vm945_vm4 = vcmp.lt.s32.totalorder %v6519_v44, 0  ;;  %v1671_v0 = vsel %vm1664_vm12, %v1667_v25, %v1670_v30  ;;  %v6854_v35 = vrot.slane %v6849_v8, %v6025_v5  ;;  %v933_v4 = vand.u32 3, %v932_v23 }
 0x166   : > { %v5424_v33 = vmin.u32 %v1009_v48, %v1007_v59  ;;  %v1030_v13 = vsel %vm945_vm4, %v1029_v50, %v1005_v27  ;;  %v1672_v34 = vsel %vm827_vm15, nan, %v1671_v0  ;;  %v8756_v15 = vand.u32 2147483647, %v6519_v44 }
 0x167   : > { %1884 = vst [vmem:[%s6384_s6 + $0x68] sm:$0xff] %v1672_v34  ;;  %v1766_v26 = vand.u32 3, %v6804_v51  ;;  %v6872_v18 = vmul.f32 %v6854_v35, %v6038_v11  ;;  %vm931_vm6 = vweird.f32 %v6456_v60  ;;  %vm934_vm15 = vcmp.lt.s32.totalorder %v933_v4, 2 }
 0x168   : > { %vm6863_vm13 = vcmp.le.f32.partialorder %v8756_v15, 0.7853982  ;;  %v1011_v45 = vclz %v5424_v33  ;;  %vm935_vm8 = vcmp.eq.s32.totalorder %v933_v4, 0  ;;  %v6877_v17 = vrot.slane %v6849_v8, %v6027_v6 }
 0x169   : > { %v1032_v36 = vsel %vm6863_vm13, 0, %v1030_v13  ;;  %vm938_vm9 = vcmp.eq.s32.totalorder %v933_v4, 2  ;;  %v999_v51 = vadd.s32 %v6774_v43, %v6785_v42  ;;  %v6883_v61 = vrot.slane %v6849_v8, %v6036_v10 }
 0x16a   : > { %v5425_v39 = vadd.s32 4294967294, %v1011_v45  ;;  %v1918_v62 = vand.u32 2147483647, %v6872_v18  ;;  %v1036_v21 = vadd.s32 3, %v1032_v36  ;;  %vm1767_vm2 = vcmp.lt.s32.totalorder %v1766_v26, 2 }
 0x16b   : > { %v1921_v3 = vand.u32 2139095040, %v6872_v18  ;;  %vm1768_vm7 = vcmp.eq.s32.totalorder %v1766_v26, 0  ;;  %vm1771_vm0 = vcmp.eq.s32.totalorder %v1766_v26, 2  ;;  %v6891_v52 = vmul.f32 %v6877_v17, %v6038_v11 }
 0x16c   : > { %vm5426_vm5 = vcmp.lt.s32.totalorder %v5425_v39, 0  ;;  %v1925_v55 = vand.u32 8388607, %v1918_v62  ;;  %v6895_v29 = vmul.f32 %v6883_v61, %v6038_v11  ;;  %v6910_v0 = vand.u32 3, %v1032_v36 }
 0x16d   : > { %v5781_v49 = vpop.eup %5780  ;;  %v1014_v20 = vsel %vm5426_vm5, 0, %v5425_v39  ;;  %v1922_v41 = vshrl.u32 %v1921_v3, 23  ;;  %v2025_v25 = vand.u32 2139095040, %v6891_v52  ;;  %v2022_v30 = vand.u32 2147483647, %v6891_v52 }
 0x16e   : > { %v5783_v32 = vpop.eup %5782  ;;  %v939_v43 = vxor.u32 2147483648, %v5781_v49  ;;  %v1015_v42 = vsub.s32 32, %v1014_v20  ;;  %v1019_v37 = vsub.s32 4294967266, %v1014_v20  ;;  %v1016_v1 = vshll.u32 %v1007_v59, %v1014_v20 }
 0x16f   : > { %v936_v2 = vxor.u32 2147483648, %v5783_v32  ;;  %v5460_v7 = vadd.s32 4294967169, %v1922_v41  ;;  %v1926_v40 = vor.u32 8388608, %v1925_v55  ;;  %v2026_v4 = vshrl.u32 %v2025_v25, 23 }
 0x170   : > { %v940_v27 = vsel %vm938_vm9, %v939_v43, %v5783_v32  ;;  %v1017_v24 = vshrl.u32 %v999_v51, %v1015_v42  ;;  %v1020_v22 = vadd.s32 127, %v1019_v37  ;;  %v1773_v47 = vsel %vm1771_vm0, %v939_v43, %v5783_v32 }
 0x171   : > { %v937_v12 = vsel %vm935_vm8, %v5781_v49, %v936_v2  ;;  %v1770_v58 = vsel %vm1768_vm7, %v5781_v49, %v936_v2  ;;  %v1928_v50 = vadd.s32 1, %v5460_v7  ;;  %v2129_v15 = vand.u32 2139095040, %v6895_v29 }
 0x172   : > { %v941_v9 = vsel %vm934_vm15, %v937_v12, %v940_v27  ;;  %v1018_v38 = vor.u32 %v1017_v24, %v1016_v1  ;;  %v1021_v23 = vshll.u32 %v1020_v22, 23  ;;  %v1774_v31 = vsel %vm1767_vm2, %v1770_v58, %v1773_v47 }
 0x173   : > { %v942_v14 = vsel %vm931_vm6, nan, %v941_v9  ;;  %v1775_v59 = vsel %vm931_vm6, nan, %v1774_v31  ;;  %vm1929_vm10 = vcmp.gt.s32.totalorder %v1928_v50, 0  ;;  %v6913_v45 = vand.u32 3, %v1036_v21 }
 0x174   : > { %v1022_v48 = vor.u32 4788187, %v1021_v23  ;;  %1053 = vst [vmem:[%s6384_s6 + $0x30] sm:$0xff] %v942_v14  ;;  %1885 = vst [vmem:[%s6384_s6 + $0x70] sm:$0xff] %v1775_v59  ;;  %v1025_v13 = vcvt.s32.f32 %v1018_v38  ;;  %v1930_v34 = vsel %vm1929_vm10, %v1928_v50, 0  ;;  %v6915_v39 = vshll.u32 %v1926_v40, 8 }
 0x175   : > { %v1931_v60 = vshrl.u32 %v1930_v34, 5  ;;  %v1932_v26 = vand.u32 31, %v1930_v34  ;;  %v5464_v3 = vadd.s32 4294967169, %v2026_v4  ;;  %v2029_v49 = vand.u32 8388607, %v2022_v30 }
 0x176   : > { %v1023_v33 = vand.u32 2147483647, %v1022_v48  ;;  %v2130_v36 = vshrl.u32 %v2129_v15, 23  ;;  %vm1870_vm12 = vcmp.lt.s32.totalorder %v6910_v0, 2  ;;  %vm1035_vm6 = vweird.f32 %v6519_v44 }
 0x177   : > { %v1933_v20 = vsub.s32 32, %v1932_v26  ;;  %v1935_v55 = vshll.u32 %v8708_v46, %v1932_v26  ;;  %v1938_v32 = vshll.u32 %v8744_v53, %v1932_v26  ;;  %v1941_v43 = vshll.u32 %v8745_v16, %v1932_v26 }
 0x178   : > { %v1026_v51 = vmul.f32 %v1025_v13, %v1023_v33  ;;  %v1944_v21 = vshll.u32 %v8703_v54, %v1932_v26  ;;  %v1947_v37 = vshll.u32 %v5937_v56, %v1932_v26  ;;  %vm1950_vm11 = vcmp.lt.s32.totalorder %v1931_v60, 1 }
 0x179   : > { %v1934_v2 = vshrl.u32 %v8708_v46, %v1933_v20  ;;  %v1936_v1 = vshrl.u32 %v8744_v53, %v1933_v20  ;;  %v1939_v41 = vshrl.u32 %v8745_v16, %v1933_v20  ;;  %v1942_v27 = vshrl.u32 %v8703_v54, %v1933_v20 }
 0x17a   : > { %v1027_v42 = vxor.u32 2147483648, %v1026_v51  ;;  %v1945_v22 = vshrl.u32 %v5937_v56, %v1933_v20  ;;  %v1948_v47 = vshrl.u32 %v5938_v63, %v1933_v20  ;;  %vm1951_vm1 = vcmp.lt.s32.totalorder %v1931_v60, 2 }
 0x17b   : > { %v1937_v58 = vor.u32 %v1936_v1, %v1935_v55  ;;  %v1940_v7 = vor.u32 %v1939_v41, %v1938_v32  ;;  %v1943_v40 = vor.u32 %v1942_v27, %v1941_v43  ;;  %vm1952_vm3 = vcmp.lt.s32.totalorder %v1931_v60, 3 }
 0x17c   : > { %v1028_v24 = vsel %vm945_vm4, %v1027_v42, %v1026_v51  ;;  %v1946_v9 = vor.u32 %v1945_v22, %v1944_v21  ;;  %v1949_v38 = vor.u32 %v1948_v47, %v1947_v37  ;;  %vm1953_vm14 = vcmp.lt.s32.totalorder %v1931_v60, 4 }
 0x17d   : > { %v1031_v12 = vsel %vm6863_vm13, %v6519_v44, %v1028_v24  ;;  %v1954_v23 = vsel %vm1950_vm11, %v1934_v2, %v1937_v58  ;;  %v1958_v31 = vsel %vm1950_vm11, %v1937_v58, %v1940_v7  ;;  %v1955_v14 = vsel %vm1953_vm14, %v1943_v40, 2102212464 }
 0x17e   : > { %5784 = vcosq.f32 %v1031_v12  ;;  %v1959_v59 = vsel %vm1953_vm14, %v1946_v9, 920167782  ;;  %v1962_v50 = vsel %vm1950_vm11, %v1940_v7, %v1943_v40  ;;  %v1963_v25 = vsel %vm1953_vm14, %v1949_v38, 1326507024 }
 0x17f   : > { %5786 = vsinq.f32 %v1031_v12  ;;  %v1956_v28 = vsel %vm1952_vm3, %v1940_v7, %v1955_v14  ;;  %v1960_v48 = vsel %vm1952_vm3, %v1943_v40, %v1959_v59  ;;  %v1964_v4 = vsel %vm1952_vm3, %v1946_v9, %v1963_v25 }
 0x180   : > { %v2032_v33 = vadd.s32 1, %v5464_v3  ;;  %v1961_v13 = vsel %vm1951_vm1, %v1958_v31, %v1960_v48  ;;  %v1965_v34 = vsel %vm1951_vm1, %v1962_v50, %v1964_v4  ;;  %v2030_v15 = vor.u32 8388608, %v2029_v49 }
 0x181   : > { %v2126_v26 = vand.u32 2147483647, %v6895_v29  ;;  %v6942_v51 = vmul.u32.u64.low %v6915_v39, %v1965_v34  ;;  %v6943_v20 = vmul.u32.u64.high %v6915_v39, %v1965_v34, %v6942_v51  ;;  %vm1871_vm4 = vcmp.eq.s32.totalorder %v6910_v0, 0 }
 0x182   : > { %v6946_v55 = vmul.u32.u64.low %v6915_v39, %v1961_v13  ;;  %v6947_v32 = vmul.u32.u64.high %v6915_v39, %v1961_v13, %v6946_v55  ;;  %v1957_v3 = vsel %vm1951_vm1, %v1954_v23, %v1956_v28  ;;  %vm2033_vm13 = vcmp.gt.s32.totalorder %v2032_v33, 0 }
 0x183   : > { %v5468_v43 = vadd.s32 4294967169, %v2130_v36  ;;  %vm1038_vm15 = vcmp.lt.s32.totalorder %v6913_v45, 2  ;;  %vm1039_vm8 = vcmp.eq.s32.totalorder %v6913_v45, 0  ;;  %vm1874_vm9 = vcmp.eq.s32.totalorder %v6910_v0, 2 }
 0x184   : > { %v2034_v49 = vsel %vm2033_vm13, %v2032_v33, 0  ;;  %vm1042_vm5 = vcmp.eq.s32.totalorder %v6913_v45, 2  ;;  %v6960_v42 = vrot.slane %v6849_v8, %v6055_v19  ;;  %v6962_v60 = vshll.u32 %v2030_v15, 8 }
 0x185   : > { %v2036_v21 = vand.u32 31, %v2034_v49  ;;  %v1973_v36 = vmul.u32 %v6915_v39, %v1957_v3  ;;  %vm1975_vm2 = vc.u32 %v6943_v20, %v6946_v55  ;;  %v1976_v37 = vadd.s32 1, %v6947_v32 }
 0x186   : > { %v6970_v2 = vand.u32 8388607, %v2126_v26  ;;  %v6972_v41 = vshrl.u32 %v2034_v49, 5  ;;  %v2136_v24 = vadd.s32 1, %v5468_v43  ;;  %vm7038_vm3 = vcmp.le.f32.partialorder %v1918_v62, 0.7853982 }
 0x187   : > { %v2037_v27 = vsub.s32 32, %v2036_v21  ;;  %v2039_v8 = vshll.u32 %v8708_v46, %v2036_v21  ;;  %v1977_v39 = vsel %vm1975_vm2, %v1976_v37, %v6947_v32  ;;  %v2042_v12 = vshll.u32 %v8744_v53, %v2036_v21 }
 0x188   : > { %v5785_v1 = vpop.eup %5784  ;;  %v2045_v58 = vshll.u32 %v8745_v16, %v2036_v21  ;;  %v1978_v40 = vadd.s32 %v1977_v39, %v1973_v36  ;;  %v2048_v38 = vshll.u32 %v8703_v54, %v2036_v21  ;;  %v2051_v43 = vshll.u32 %v5937_v56, %v2036_v21 }
 0x189   : > { %v5787_v22 = vpop.eup %5786  ;;  %v1043_v47 = vxor.u32 2147483648, %v5785_v1  ;;  %v2040_v9 = vshrl.u32 %v8744_v53, %v2037_v27  ;;  %v2043_v14 = vshrl.u32 %v8745_v16, %v2037_v27  ;;  %v2046_v59 = vshrl.u32 %v8703_v54, %v2037_v27 }
 0x18a   : > { %v1040_v7 = vxor.u32 2147483648, %v5787_v22  ;;  %v1979_v28 = vadd.s32 536870912, %v1978_v40  ;;  %v2049_v3 = vshrl.u32 %v5937_v56, %v2037_v27  ;;  %v2052_v45 = vshrl.u32 %v5938_v63, %v2037_v27 }
 0x18b   : > { %v1044_v23 = vsel %vm1042_vm5, %v1043_v47, %v5787_v22  ;;  %v1876_v31 = vsel %vm1874_vm9, %v1043_v47, %v5787_v22  ;;  %v2041_v48 = vor.u32 %v2040_v9, %v2039_v8  ;;  %v2044_v13 = vor.u32 %v2043_v14, %v2042_v12 }
 0x18c   : > { %v1041_v50 = vsel %vm1039_vm8, %v5785_v1, %v1040_v7  ;;  %v1873_v25 = vsel %vm1871_vm4, %v5785_v1, %v1040_v7  ;;  %v2047_v34 = vor.u32 %v2046_v59, %v2045_v58  ;;  %v1980_v32 = vshrl.u32 %v1979_v28, 30 }
 0x18d   : > { %v1045_v4 = vsel %vm1038_vm15, %v1041_v50, %v1044_v23  ;;  %v1877_v33 = vsel %vm1870_vm12, %v1873_v25, %v1876_v31  ;;  %v2134_v0 = vor.u32 8388608, %v6970_v2  ;;  %vm2137_vm7 = vcmp.gt.s32.totalorder %v2136_v24, 0 }
 0x18e   : > { %v1046_v15 = vsel %vm1035_vm6, nan, %v1045_v4  ;;  %v1878_v51 = vsel %vm1035_vm6, nan, %v1877_v33  ;;  %v1981_v49 = vshll.u32 %v1980_v32, 30  ;;  %v2050_v36 = vor.u32 %v2049_v3, %v2048_v38 }
 0x18f   : > { %1054 = vst [vmem:[%s6384_s6 + $0x38] sm:$0xff] %v1046_v15  ;;  %1886 = vst [vmem:[%s6384_s6 + $0x78] sm:$0xff] %v1878_v51  ;;  %vm2054_vm0 = vcmp.lt.s32.totalorder %v6972_v41, 1  ;;  %vm2057_vm10 = vcmp.lt.s32.totalorder %v6972_v41, 4  ;;  %v2038_v44 = vshrl.u32 %v8708_v46, %v2037_v27  ;;  %v2053_v37 = vor.u32 %v2052_v45, %v2051_v43 }
 0x190   : > { %v2059_v1 = vsel %vm2057_vm10, %v2047_v34, 2102212464  ;;  %v2062_v8 = vsel %vm2054_vm0, %v2041_v48, %v2044_v13  ;;  %v7009_v22 = vsub.s32 %v1978_v40, %v1981_v49  ;;  %vm2056_vm11 = vcmp.lt.s32.totalorder %v6972_v41, 3 }
 0x191   : > { %v2063_v21 = vsel %vm2057_vm10, %v2050_v36, 920167782  ;;  %v2138_v2 = vsel %vm2137_vm7, %v2136_v24, 0  ;;  %vm2055_vm1 = vcmp.lt.s32.totalorder %v6972_v41, 2  ;;  %v2058_v47 = vsel %vm2054_vm0, %v2038_v44, %v2041_v48 }
 0x192   : > { %v2064_v39 = vsel %vm2056_vm11, %v2047_v34, %v2063_v21  ;;  %v2066_v12 = vsel %vm2054_vm0, %v2044_v13, %v2047_v34  ;;  %v1984_v27 = vsub.s32 0, %v7009_v22  ;;  %v2060_v58 = vsel %vm2056_vm11, %v2044_v13, %v2059_v1 }
 0x193   : > { %v2065_v7 = vsel %vm2055_vm1, %v2062_v8, %v2064_v39  ;;  %v2067_v9 = vsel %vm2057_vm10, %v2053_v37, 1326507024  ;;  %v2004_v40 = vsub.s32 4, %v1980_v32  ;;  %v7025_v24 = vmul.f32 %v6854_v35, %v6149_v57 }
 0x194   : > { %v2068_v38 = vsel %vm2056_vm11, %v2050_v36, %v2067_v9  ;;  %v7019_v23 = vmul.u32.u64.low %v6962_v60, %v2065_v7  ;;  %v7020_v31 = vmul.u32.u64.high %v6962_v60, %v2065_v7, %v7019_v23  ;;  %v7029_v14 = vmul.f32 %v6877_v17, %v6149_v57 }
 0x195   : > { %v5461_v59 = vmin.u32 %v1984_v27, %v7009_v22  ;;  %v2069_v50 = vsel %vm2055_vm1, %v2066_v12, %v2068_v38  ;;  %v2061_v41 = vsel %vm2055_vm1, %v2058_v47, %v2060_v58  ;;  %v2140_v48 = vand.u32 31, %v2138_v2 }
 0x196   : > { %v7033_v25 = vmul.u32.u64.low %v6962_v60, %v2069_v50  ;;  %v7034_v28 = vmul.u32.u64.high %v6962_v60, %v2069_v50, %v7033_v25  ;;  %vm1920_vm14 = vcmp.lt.s32.totalorder %v6872_v18, 0  ;;  %v7043_v17 = vshll.u32 %v2134_v0, 8 }
 0x197   : > { %v1986_v35 = vclz %v5461_v59  ;;  %v1974_v33 = vadd.s32 %v6946_v55, %v6943_v20  ;;  %v2005_v13 = vsel %vm1920_vm14, %v2004_v40, %v1980_v32  ;;  %v2080_v34 = vadd.s32 1, %v7020_v31 }
 0x198   : > { %v2141_v15 = vsub.s32 32, %v2140_v48  ;;  %v2077_v62 = vmul.u32 %v6962_v60, %v2061_v41  ;;  %v7051_v3 = vshrl.u32 %v2138_v2, 5  ;;  %v2143_v43 = vshll.u32 %v8708_v46, %v2140_v48 }
 0x199   : > { %v5462_v51 = vadd.s32 4294967294, %v1986_v35  ;;  %vm2079_vm12 = vc.u32 %v7034_v28, %v7019_v23  ;;  %v2146_v20 = vshll.u32 %v8744_v53, %v2140_v48  ;;  %v2149_v55 = vshll.u32 %v8745_v16, %v2140_v48 }
 0x19a   : > { %v2144_v45 = vshrl.u32 %v8744_v53, %v2141_v15  ;;  %v2081_v32 = vsel %vm2079_vm12, %v2080_v34, %v7020_v31  ;;  %v2147_v0 = vshrl.u32 %v8745_v16, %v2141_v15  ;;  %v2150_v60 = vshrl.u32 %v8703_v54, %v2141_v15 }
 0x19b   : > { %vm5463_vm4 = vcmp.lt.s32.totalorder %v5462_v51, 0  ;;  %v2082_v36 = vadd.s32 %v2081_v32, %v2077_v62  ;;  %v2152_v44 = vshll.u32 %v8703_v54, %v2140_v48  ;;  %v2153_v37 = vshrl.u32 %v5937_v56, %v2141_v15 }
 0x19c   : > { %v1989_v49 = vsel %vm5463_vm4, 0, %v5462_v51  ;;  %v2145_v21 = vor.u32 %v2144_v45, %v2143_v43  ;;  %v2155_v2 = vshll.u32 %v5937_v56, %v2140_v48  ;;  %v2148_v12 = vor.u32 %v2147_v0, %v2146_v20 }
 0x19d   : > { %v1990_v1 = vsub.s32 32, %v1989_v49  ;;  %v1994_v8 = vsub.s32 4294967266, %v1989_v49  ;;  %v1991_v47 = vshll.u32 %v7009_v22, %v1989_v49  ;;  %v2083_v39 = vadd.s32 536870912, %v2082_v36 }
 0x19e   : > { %v2156_v27 = vshrl.u32 %v5938_v63, %v2141_v15  ;;  %v2151_v9 = vor.u32 %v2150_v60, %v2149_v55  ;;  %v2154_v40 = vor.u32 %v2153_v37, %v2152_v44  ;;  %v7069_v38 = vsel %vm7038_vm3, 0, %v2005_v13 }
 0x19f   : > { %v1992_v58 = vshrl.u32 %v1974_v33, %v1990_v1  ;;  %v1995_v7 = vadd.s32 127, %v1994_v8  ;;  %v2084_v31 = vshrl.u32 %v2083_v39, 30  ;;  %v2142_v59 = vshrl.u32 %v8708_v46, %v2141_v15 }
 0x1a0   : > { %vm2158_vm13 = vcmp.lt.s32.totalorder %v7051_v3, 1  ;;  %v2157_v22 = vor.u32 %v2156_v27, %v2155_v2  ;;  %vm2159_vm6 = vcmp.lt.s32.totalorder %v7051_v3, 2  ;;  %vm2160_vm15 = vcmp.lt.s32.totalorder %v7051_v3, 3 }
 0x1a1   : > { %v1993_v50 = vor.u32 %v1992_v58, %v1991_v47  ;;  %v1996_v41 = vshll.u32 %v1995_v7, 23  ;;  %v2085_v25 = vshll.u32 %v2084_v31, 30  ;;  %vm2161_vm8 = vcmp.lt.s32.totalorder %v7051_v3, 4 }
 0x1a2   : > { %v2166_v48 = vsel %vm2158_vm13, %v2145_v21, %v2148_v12  ;;  %v7080_v35 = vmul.f32 %v6960_v42, %v6038_v11  ;;  %v2163_v13 = vsel %vm2161_vm8, %v2151_v9, 2102212464  ;;  %v2167_v34 = vsel %vm2161_vm8, %v2154_v40, 920167782 }
 0x1a3   : > { %v1997_v33 = vor.u32 4788187, %v1996_v41  ;;  %v7082_v15 = vsub.s32 %v2082_v36, %v2085_v25  ;;  %v2162_v51 = vsel %vm2158_vm13, %v2142_v59, %v2145_v21  ;;  %v2168_v62 = vsel %vm2160_vm15, %v2151_v9, %v2167_v34 }
 0x1a4   : > { %v2170_v43 = vsel %vm2158_vm13, %v2148_v12, %v2151_v9  ;;  %v2000_v20 = vcvt.s32.f32 %v1993_v50  ;;  %v2169_v55 = vsel %vm2159_vm6, %v2166_v48, %v2168_v62  ;;  %v2171_v32 = vsel %vm2161_vm8, %v2157_v22, 1326507024 }
 0x1a5   : > { %v1998_v45 = vand.u32 2147483647, %v1997_v33  ;;  %v2088_v0 = vsub.s32 0, %v7082_v15  ;;  %v2108_v60 = vsub.s32 4, %v2084_v31  ;;  %v2164_v49 = vsel %vm2160_vm15, %v2148_v12, %v2163_v13 }
 0x1a6   : > { %v2172_v36 = vsel %vm2160_vm15, %v2154_v40, %v2171_v32  ;;  %v7100_v1 = vmul.u32.u64.low %v7043_v17, %v2169_v55  ;;  %v7101_v8 = vmul.u32.u64.high %v7043_v17, %v2169_v55, %v7100_v1  ;;  %v7105_v21 = vmul.f32 %v6883_v61, %v6149_v57 }
 0x1a7   : > { %v2001_v44 = vmul.f32 %v2000_v20, %v1998_v45  ;;  %v2173_v37 = vsel %vm2159_vm6, %v2170_v43, %v2172_v36  ;;  %v5465_v2 = vmin.u32 %v2088_v0, %v7082_v15  ;;  %v2165_v27 = vsel %vm2159_vm6, %v2162_v51, %v2164_v49 }
 0x1a8   : > { %v7109_v47 = vmul.u32.u64.low %v7043_v17, %v2173_v37  ;;  %v7110_v39 = vmul.u32.u64.high %v7043_v17, %v2173_v37, %v7109_v47  ;;  %v2230_v58 = vand.u32 2147483647, %v7080_v35  ;;  %v2233_v7 = vand.u32 2139095040, %v7080_v35 }
 0x1a9   : > { %v2002_v12 = vxor.u32 2147483648, %v2001_v44  ;;  %v2011_v9 = vadd.s32 3, %v7069_v38  ;;  %vm7119_vm9 = vcmp.le.f32.partialorder %v2022_v30, 0.7853982  ;;  %vm2024_vm5 = vcmp.lt.s32.totalorder %v6891_v52, 0 }
 0x1aa   : > { %v2090_v40 = vclz %v5465_v2  ;;  %v2109_v3 = vsel %vm2024_vm5, %v2108_v60, %v2084_v31  ;;  %v2184_v50 = vadd.s32 1, %v7101_v8  ;;  %v2234_v41 = vshrl.u32 %v2233_v7, 23 }
 0x1ab   : > { %v2003_v59 = vsel %vm1920_vm14, %v2002_v12, %v2001_v44  ;;  %v2181_v25 = vmul.u32 %v7043_v17, %v2165_v27  ;;  %vm2183_vm2 = vc.u32 %v7110_v39, %v7100_v1  ;;  %v2237_v13 = vand.u32 8388607, %v2230_v58 }
 0x1ac   : > { %v2006_v22 = vsel %vm7038_vm3, %v6872_v18, %v2003_v59  ;;  %v5466_v30 = vadd.s32 4294967294, %v2090_v40  ;;  %v2185_v48 = vsel %vm2183_vm2, %v2184_v50, %v7101_v8  ;;  %v5472_v33 = vadd.s32 4294967169, %v2234_v41 }
 0x1ad   : > { %5788 = vcosq.f32 %v2006_v22  ;;  %v7139_v31 = vsel %vm7119_vm9, 0, %v2109_v3  ;;  %v2186_v4 = vadd.s32 %v2185_v48, %v2181_v25  ;;  %v2012_v34 = vand.u32 3, %v2011_v9 }
 0x1ae   : > { %5790 = vsinq.f32 %v2006_v22  ;;  %vm5467_vm7 = vcmp.lt.s32.totalorder %v5466_v30, 0  ;;  %v2240_v62 = vadd.s32 1, %v5472_v33  ;;  %v2337_v17 = vand.u32 2139095040, %v7025_v24 }
 0x1af   : > { %v2093_v51 = vsel %vm5467_vm7, 0, %v5466_v30  ;;  %v2078_v43 = vadd.s32 %v7019_v23, %v7034_v28  ;;  %v2187_v55 = vadd.s32 536870912, %v2186_v4  ;;  %v2115_v0 = vadd.s32 3, %v7139_v31 }
 0x1b0   : > { %v2094_v45 = vsub.s32 32, %v2093_v51  ;;  %v2098_v20 = vsub.s32 4294967266, %v2093_v51  ;;  %v2095_v32 = vshll.u32 %v7082_v15, %v2093_v51  ;;  %v2238_v60 = vor.u32 8388608, %v2237_v13 }
 0x1b1   : > { %vm2241_vm0 = vcmp.gt.s32.totalorder %v2240_v62, 0  ;;  %v2188_v44 = vshrl.u32 %v2187_v55, 30  ;;  %vm2128_vm10 = vcmp.lt.s32.totalorder %v6895_v29, 0  ;;  %v2334_v2 = vand.u32 2147483647, %v7025_v24 }
 0x1b2   : > { %v2096_v49 = vshrl.u32 %v2078_v43, %v2094_v45  ;;  %v2099_v36 = vadd.s32 127, %v2098_v20  ;;  %v2242_v37 = vsel %vm2241_vm0, %v2240_v62, 0  ;;  %v2338_v47 = vshrl.u32 %v2337_v17, 23 }
 0x1b3   : > { %v2244_v8 = vand.u32 31, %v2242_v37  ;;  %vm2010_vm11 = vweird.f32 %v6872_v18  ;;  %vm2013_vm1 = vcmp.lt.s32.totalorder %v2012_v34, 2  ;;  %v2189_v15 = vshll.u32 %v2188_v44, 30 }
 0x1b4   : > { %v2097_v23 = vor.u32 %v2096_v49, %v2095_v32  ;;  %v2100_v28 = vshll.u32 %v2099_v36, 23  ;;  %vm2014_vm3 = vcmp.eq.s32.totalorder %v2012_v34, 0  ;;  %vm2017_vm14 = vcmp.eq.s32.totalorder %v2012_v34, 2 }
 0x1b5   : > { %v7149_v12 = vand.u32 3, %v2115_v0  ;;  %v2245_v27 = vsub.s32 32, %v2244_v8  ;;  %v2182_v9 = vadd.s32 %v7100_v1, %v7110_v39  ;;  %v7152_v40 = vsub.s32 %v2186_v4, %v2189_v15 }
 0x1b6   : > { %v2101_v7 = vor.u32 4788187, %v2100_v28  ;;  %v7154_v59 = vshll.u32 %v2238_v60, 8  ;;  %v2212_v50 = vsub.s32 4, %v2188_v44  ;;  %v7158_v41 = vshrl.u32 %v2242_v37, 5 }
 0x1b7   : > { %v7156_v3 = vpop.eup %5788  ;;  %v5476_v22 = vadd.s32 4294967169, %v2338_v47  ;;  %v7162_v30 = vand.u32 8388607, %v2334_v2  ;;  %v2104_v1 = vcvt.s32.f32 %v2097_v23  ;;  %v2192_v39 = vsub.s32 0, %v7152_v40 }
 0x1b8   : > { %v7164_v25 = vpop.eup %5790  ;;  %v8700_v48 = vxor.u32 2147483648, %v7156_v3  ;;  %v2102_v33 = vand.u32 2147483647, %v2101_v7  ;;  %v2247_v4 = vshll.u32 %v8708_v46, %v2244_v8  ;;  %v2250_v51 = vshll.u32 %v8744_v53, %v2244_v8 }
 0x1b9   : > { %v8701_v13 = vxor.u32 2147483648, %v7164_v25  ;;  %v2254_v62 = vshrl.u32 %v8703_v54, %v2245_v27  ;;  %v5469_v45 = vmin.u32 %v2192_v39, %v7152_v40  ;;  %v2253_v20 = vshll.u32 %v8745_v16, %v2244_v8 }
 0x1ba   : > { %v2019_v17 = vsel %vm2017_vm14, %v8700_v48, %v7164_v25  ;;  %v2105_v43 = vmul.f32 %v2104_v1, %v2102_v33  ;;  %v2248_v32 = vshrl.u32 %v8744_v53, %v2245_v27  ;;  %v2251_v0 = vshrl.u32 %v8745_v16, %v2245_v27 }
 0x1bb   : > { %v2016_v55 = vsel %vm2014_vm3, %v7156_v3, %v8701_v13  ;;  %v2257_v60 = vshrl.u32 %v5937_v56, %v2245_v27  ;;  %v2194_v37 = vclz %v5469_v45  ;;  %v2213_v47 = vsel %vm2128_vm10, %v2212_v50, %v2188_v44 }
 0x1bc   : > { %v2020_v49 = vsel %vm2013_vm1, %v2016_v55, %v2019_v17  ;;  %v2106_v36 = vxor.u32 2147483648, %v2105_v43  ;;  %v2246_v28 = vshrl.u32 %v8708_v46, %v2245_v27  ;;  %v2255_v15 = vor.u32 %v2254_v62, %v2253_v20 }
 0x1bd   : > { %v2021_v23 = vsel %vm2010_vm11, nan, %v2020_v49  ;;  %v2256_v7 = vshll.u32 %v8703_v54, %v2244_v8  ;;  %v5470_v1 = vadd.s32 4294967294, %v2194_v37  ;;  %v2259_v34 = vshll.u32 %v5937_v56, %v2244_v8 }
 0x1be   : > { %v2107_v33 = vsel %vm2024_vm5, %v2106_v36, %v2105_v43  ;;  %v2260_v39 = vshrl.u32 %v5938_v63, %v2245_v27  ;;  %2750 = vst [vmem:[%s6384_s6 + $0x80] sm:$0xff] %v2021_v23  ;;  %v2249_v50 = vor.u32 %v2248_v32, %v2247_v4  ;;  %v2252_v17 = vor.u32 %v2251_v0, %v2250_v51 }
 0x1bf   : > { %v2110_v44 = vsel %vm7119_vm9, %v6891_v52, %v2107_v33  ;;  %v2258_v45 = vor.u32 %v2257_v60, %v2256_v7  ;;  %vm5471_vm12 = vcmp.lt.s32.totalorder %v5470_v1, 0  ;;  %vm2262_vm4 = vcmp.lt.s32.totalorder %v7158_v41, 1 }
 0x1c0   : > { %5792 = vcosq.f32 %v2110_v44  ;;  %v2261_v62 = vor.u32 %v2260_v39, %v2259_v34  ;;  %v2197_v43 = vsel %vm5471_vm12, 0, %v5470_v1  ;;  %vm2263_vm13 = vcmp.lt.s32.totalorder %v7158_v41, 2 }
 0x1c1   : > { %5794 = vsinq.f32 %v2110_v44  ;;  %vm2265_vm6 = vcmp.lt.s32.totalorder %v7158_v41, 4  ;;  %v2198_v8 = vsub.s32 32, %v2197_v43  ;;  %v2202_v27 = vsub.s32 4294967266, %v2197_v43 }
 0x1c2   : > { %vm2264_vm15 = vcmp.lt.s32.totalorder %v7158_v41, 3  ;;  %v2267_v61 = vsel %vm2265_vm6, %v2255_v15, 2102212464  ;;  %v2199_v4 = vshll.u32 %v7152_v40, %v2197_v43  ;;  %v2270_v51 = vsel %vm2262_vm4, %v2249_v50, %v2252_v17 }
 0x1c3   : > { %v2271_v20 = vsel %vm2265_vm6, %v2258_v45, 920167782  ;;  %v2274_v55 = vsel %vm2262_vm4, %v2252_v17, %v2255_v15  ;;  %v2200_v32 = vshrl.u32 %v2182_v9, %v2198_v8  ;;  %v2203_v0 = vadd.s32 127, %v2202_v27 }
 0x1c4   : > { %v2272_v60 = vsel %vm2264_vm15, %v2255_v15, %v2271_v20  ;;  %v2275_v49 = vsel %vm2265_vm6, %v2261_v62, 1326507024  ;;  %v2266_v36 = vsel %vm2262_vm4, %v2246_v28, %v2249_v50  ;;  %v2344_v23 = vadd.s32 1, %v5476_v22 }
 0x1c5   : > { %v2273_v37 = vsel %vm2263_vm13, %v2270_v51, %v2272_v60  ;;  %v2276_v40 = vsel %vm2264_vm15, %v2258_v45, %v2275_v49  ;;  %v2201_v7 = vor.u32 %v2200_v32, %v2199_v4  ;;  %v2204_v33 = vshll.u32 %v2203_v0, 23 }
 0x1c6   : > { %v2268_v9 = vsel %vm2264_vm15, %v2252_v17, %v2267_v61  ;;  %v2277_v1 = vsel %vm2263_vm13, %v2274_v55, %v2276_v40  ;;  %vm2114_vm8 = vweird.f32 %v6891_v52  ;;  %vm2117_vm9 = vcmp.lt.s32.totalorder %v7149_v12, 2 }
 0x1c7   : > { %v7223_v15 = vmul.u32.u64.low %v7154_v59, %v2277_v1  ;;  %v7224_v28 = vmul.u32.u64.high %v7154_v59, %v2277_v1, %v7223_v15  ;;  %v7227_v34 = vmul.u32.u64.low %v7154_v59, %v2273_v37  ;;  %v7228_v39 = vmul.u32.u64.high %v7154_v59, %v2273_v37, %v7227_v34 }
 0x1c8   : > { %vm7234_vm5 = vcmp.le.f32.partialorder %v2126_v26, 0.7853982  ;;  %v2205_v44 = vor.u32 4788187, %v2204_v33  ;;  %vm2345_vm2 = vcmp.gt.s32.totalorder %v2344_v23, 0  ;;  %vm2118_vm7 = vcmp.eq.s32.totalorder %v7149_v12, 0 }
 0x1c9   : > { %vm2121_vm0 = vcmp.eq.s32.totalorder %v7149_v12, 2  ;;  %v2269_v50 = vsel %vm2263_vm13, %v2266_v36, %v2268_v9  ;;  %v2346_v17 = vsel %vm2345_vm2, %v2344_v23, 0  ;;  %v2208_v43 = vcvt.s32.f32 %v2201_v7 }
 0x1ca   : > { %v7242_v45 = vpop.eup %5792  ;;  %v2206_v62 = vand.u32 2147483647, %v2205_v44  ;;  %v7246_v26 = vsel %vm7234_vm5, 0, %v2213_v47  ;;  %v2348_v8 = vand.u32 31, %v2346_v17  ;;  %vm2287_vm1 = vc.u32 %v7224_v28, %v7227_v34 }
 0x1cb   : > { %v7248_v27 = vpop.eup %5794  ;;  %v8698_v61 = vxor.u32 2147483648, %v7242_v45  ;;  %v2288_v41 = vadd.s32 1, %v7228_v39  ;;  %v2342_v4 = vor.u32 8388608, %v7162_v30  ;;  %v2285_v55 = vmul.u32 %v7154_v59, %v2269_v50 }
 0x1cc   : > { %v8699_v51 = vxor.u32 2147483648, %v7248_v27  ;;  %v2209_v20 = vmul.f32 %v2208_v43, %v2206_v62  ;;  %v2349_v32 = vsub.s32 32, %v2348_v8  ;;  %v2219_v0 = vadd.s32 3, %v7246_v26 }
 0x1cd   : > { %v2123_v47 = vsel %vm2121_vm0, %v8698_v61, %v7248_v27  ;;  %v2289_v60 = vsel %vm2287_vm1, %v2288_v41, %v7228_v39  ;;  %v2351_v49 = vshll.u32 %v8708_v46, %v2348_v8  ;;  %v2354_v37 = vshll.u32 %v8744_v53, %v2348_v8 }
 0x1ce   : > { %v2120_v30 = vsel %vm2118_vm7, %v7242_v45, %v8699_v51  ;;  %v2210_v59 = vxor.u32 2147483648, %v2209_v20  ;;  %v2290_v36 = vadd.s32 %v2289_v60, %v2285_v55  ;;  %v2352_v23 = vshrl.u32 %v8744_v53, %v2349_v32 }
 0x1cf   : > { %v2124_v40 = vsel %vm2117_vm9, %v2120_v30, %v2123_v47  ;;  %v2355_v7 = vshrl.u32 %v8745_v16, %v2349_v32  ;;  %v2358_v33 = vshrl.u32 %v8703_v54, %v2349_v32  ;;  %v2347_v39 = vshrl.u32 %v2346_v17, 5 }
 0x1d0   : > { %v2125_v9 = vsel %vm2114_vm8, nan, %v2124_v40  ;;  %v2211_v1 = vsel %vm2128_vm10, %v2210_v59, %v2209_v20  ;;  %v2291_v15 = vadd.s32 536870912, %v2290_v36  ;;  %v2353_v12 = vor.u32 %v2352_v23, %v2351_v49 }
 0x1d1   : > { %v2214_v44 = vsel %vm7234_vm5, %v6895_v29, %v2211_v1  ;;  %v2356_v50 = vor.u32 %v2355_v7, %v2354_v37  ;;  %v2357_v62 = vshll.u32 %v8745_v16, %v2348_v8  ;;  %2751 = vst [vmem:[%s6384_s6 + $0x88] sm:$0xff] %v2125_v9  ;;  %v2360_v41 = vshll.u32 %v8703_v54, %v2348_v8 }
 0x1d2   : > { %5796 = vcosq.f32 %v2214_v44  ;;  %v2292_v43 = vshrl.u32 %v2291_v15, 30  ;;  %v2361_v55 = vshrl.u32 %v5937_v56, %v2349_v32  ;;  %v2363_v20 = vshll.u32 %v5937_v56, %v2348_v8 }
 0x1d3   : > { %5798 = vsinq.f32 %v2214_v44  ;;  %v2359_v47 = vor.u32 %v2358_v33, %v2357_v62  ;;  %v2364_v17 = vshrl.u32 %v5938_v63, %v2349_v32  ;;  %vm2232_vm10 = vcmp.lt.s32.totalorder %v7080_v35, 0 }
 0x1d4   : > { %v2293_v22 = vshll.u32 %v2292_v43, 30  ;;  %v2362_v60 = vor.u32 %v2361_v55, %v2360_v41  ;;  %vm2366_vm3 = vcmp.lt.s32.totalorder %v2347_v39, 1  ;;  %v2220_v49 = vand.u32 3, %v2219_v0 }
 0x1d5   : > { %v2365_v30 = vor.u32 %v2364_v17, %v2363_v20  ;;  %vm2369_vm14 = vcmp.lt.s32.totalorder %v2347_v39, 4  ;;  %v2374_v59 = vsel %vm2366_vm3, %v2353_v12, %v2356_v50  ;;  %v2316_v40 = vsub.s32 4, %v2292_v43 }
 0x1d6   : > { %v7291_v37 = vsub.s32 %v2290_v36, %v2293_v22  ;;  %vm2368_vm12 = vcmp.lt.s32.totalorder %v2347_v39, 3  ;;  %v2375_v23 = vsel %vm2369_vm14, %v2362_v60, 920167782  ;;  %vm2367_vm4 = vcmp.lt.s32.totalorder %v2347_v39, 2 }
 0x1d7   : > { %v2376_v8 = vsel %vm2368_vm12, %v2359_v47, %v2375_v23  ;;  %v2382_v7 = vshll.u32 %v2342_v4, 8  ;;  %v2441_v33 = vand.u32 2139095040, %v7029_v14  ;;  %v2371_v0 = vsel %vm2369_vm14, %v2359_v47, 2102212464 }
 0x1d8   : > { %v2296_v9 = vsub.s32 0, %v7291_v37  ;;  %v2377_v1 = vsel %vm2367_vm4, %v2374_v59, %v2376_v8  ;;  %v2378_v15 = vsel %vm2366_vm3, %v2356_v50, %v2359_v47  ;;  %vm2218_vm13 = vweird.f32 %v6895_v29 }
 0x1d9   : > { %v2350_v36 = vshrl.u32 %v8708_v46, %v2349_v32  ;;  %v2379_v44 = vsel %vm2369_vm14, %v2365_v30, 1326507024  ;;  %v7303_v62 = vmul.u32.u64.low %v2382_v7, %v2377_v1  ;;  %v7304_v41 = vmul.u32.u64.high %v2382_v7, %v2377_v1, %v7303_v62 }
 0x1da   : > { %vm7309_vm6 = vcmp.le.f32.partialorder %v2230_v58, 0.7853982  ;;  %v5473_v55 = vmin.u32 %v2296_v9, %v7291_v37  ;;  %v2317_v47 = vsel %vm2232_vm10, %v2316_v40, %v2292_v43  ;;  %v2380_v20 = vsel %vm2368_vm12, %v2362_v60, %v2379_v44 }
 0x1db   : > { %v2370_v32 = vsel %vm2366_vm3, %v2350_v36, %v2353_v12  ;;  %v2372_v17 = vsel %vm2368_vm12, %v2356_v50, %v2371_v0  ;;  %v2381_v22 = vsel %vm2367_vm4, %v2378_v15, %v2380_v20  ;;  %v2442_v30 = vshrl.u32 %v2441_v33, 23 }
 0x1dc   : > { %v7320_v59 = vpop.eup %5796  ;;  %vm2221_vm15 = vcmp.lt.s32.totalorder %v2220_v49, 2  ;;  %vm2225_vm9 = vcmp.eq.s32.totalorder %v2220_v49, 2  ;;  %v2298_v58 = vclz %v5473_v55  ;;  %v8702_v23 = vand.u32 2147483647, %v7029_v14 }
 0x1dd   : > { %v7323_v8 = vpop.eup %5798  ;;  %v8696_v43 = vxor.u32 2147483648, %v7320_v59  ;;  %v7328_v60 = vsel %vm7309_vm6, 0, %v2317_v47  ;;  %v7330_v12 = vmul.u32.u64.low %v2382_v7, %v2381_v22  ;;  %v7331_v50 = vmul.u32.u64.high %v2382_v7, %v2381_v22, %v7330_v12 }
 0x1de   : > { %v8697_v40 = vxor.u32 2147483648, %v7323_v8  ;;  %v5474_v33 = vadd.s32 4294967294, %v2298_v58  ;;  %v2373_v9 = vsel %vm2367_vm4, %v2370_v32, %v2372_v17  ;;  %v5480_v0 = vadd.s32 4294967169, %v2442_v30 }
 0x1df   : > { %vm2222_vm5 = vcmp.eq.s32.totalorder %v2220_v49, 0  ;;  %v2227_v1 = vsel %vm2225_vm9, %v8696_v43, %v7323_v8  ;;  %v2286_v15 = vadd.s32 %v7227_v34, %v7224_v28  ;;  %v2392_v36 = vadd.s32 1, %v7304_v41 }
 0x1e0   : > { %v2224_v44 = vsel %vm2222_vm5, %v7320_v59, %v8697_v40  ;;  %vm5475_vm2 = vcmp.lt.s32.totalorder %v5474_v33, 0  ;;  %v2323_v39 = vadd.s32 3, %v7328_v60  ;;  %v2448_v55 = vadd.s32 1, %v5480_v0 }
 0x1e1   : > { %v2228_v47 = vsel %vm2221_vm15, %v2224_v44, %v2227_v1  ;;  %v2301_v20 = vsel %vm5475_vm2, 0, %v5474_v33  ;;  %v2389_v32 = vmul.u32 %v2382_v7, %v2373_v9  ;;  %vm2391_vm7 = vc.u32 %v7331_v50, %v7303_v62 }
 0x1e2   : > { %v2229_v28 = vsel %vm2218_vm13, nan, %v2228_v47  ;;  %v2302_v34 = vsub.s32 32, %v2301_v20  ;;  %v2306_v17 = vsub.s32 4294967266, %v2301_v20  ;;  %v2445_v22 = vand.u32 8388607, %v8702_v23 }
 0x1e3   : > { %v2303_v30 = vshll.u32 %v7291_v37, %v2301_v20  ;;  %v2393_v58 = vsel %vm2391_vm7, %v2392_v36, %v7304_v41  ;;  %vm2449_vm0 = vcmp.gt.s32.totalorder %v2448_v55, 0  ;;  %v2545_v49 = vand.u32 2139095040, %v7105_v21  ;;  %2752 = vst [vmem:[%s6384_s6 + $0x90] sm:$0xff] %v2229_v28 }
 0x1e4   : > { %v2304_v7 = vshrl.u32 %v2286_v15, %v2302_v34  ;;  %v2307_v12 = vadd.s32 127, %v2306_v17  ;;  %v2394_v33 = vadd.s32 %v2393_v58, %v2389_v32  ;;  %v2450_v9 = vsel %vm2449_vm0, %v2448_v55, 0 }
 0x1e5   : > { %v2452_v0 = vand.u32 31, %v2450_v9  ;;  %v7358_v1 = vmul.f32 %v6960_v42, %v6149_v57  ;;  %v7360_v40 = vand.u32 3, %v2323_v39  ;;  %vm2336_vm1 = vcmp.lt.s32.totalorder %v7025_v24, 0 }
 0x1e6   : > { %v2305_v44 = vor.u32 %v2304_v7, %v2303_v30  ;;  %v2308_v47 = vshll.u32 %v2307_v12, 23  ;;  %v2395_v43 = vadd.s32 536870912, %v2394_v33  ;;  %v2446_v37 = vor.u32 8388608, %v2445_v22 }
 0x1e7   : > { %v2453_v41 = vsub.s32 32, %v2452_v0  ;;  %v7363_v15 = vshrl.u32 %v2450_v9, 5  ;;  %v2546_v32 = vshrl.u32 %v2545_v49, 23  ;;  %v2455_v55 = vshll.u32 %v8708_v46, %v2452_v0 }
 0x1e8   : > { %v2309_v36 = vor.u32 4788187, %v2308_v47  ;;  %v2396_v20 = vshrl.u32 %v2395_v43, 30  ;;  %v2312_v39 = vcvt.s32.f32 %v2305_v44  ;;  %v2458_v7 = vshll.u32 %v8744_v53, %v2452_v0 }
 0x1e9   : > { %v2456_v28 = vshrl.u32 %v8744_v53, %v2453_v41  ;;  %v2459_v42 = vshrl.u32 %v8745_v16, %v2453_v41  ;;  %v2462_v34 = vshrl.u32 %v8703_v54, %v2453_v41  ;;  %v2465_v58 = vshrl.u32 %v5937_v56, %v2453_v41 }
 0x1ea   : > { %v2310_v17 = vand.u32 2147483647, %v2309_v36  ;;  %v2397_v30 = vshll.u32 %v2396_v20, 30  ;;  %v2420_v22 = vsub.s32 4, %v2396_v20  ;;  %v2461_v43 = vshll.u32 %v8745_v16, %v2452_v0 }
 0x1eb   : > { %v2464_v49 = vshll.u32 %v8703_v54, %v2452_v0  ;;  %v2457_v47 = vor.u32 %v2456_v28, %v2455_v55  ;;  %v8705_v61 = vand.u32 2147483647, %v7105_v21  ;;  %vm7378_vm3 = vcmp.le.f32.partialorder %v2334_v2, 0.7853982 }
 0x1ec   : > { %v2313_v12 = vmul.f32 %v2312_v39, %v2310_v17  ;;  %v7373_v9 = vsub.s32 %v2394_v33, %v2397_v30  ;;  %v2460_v36 = vor.u32 %v2459_v42, %v2458_v7  ;;  %v2463_v51 = vor.u32 %v2462_v34, %v2461_v43 }
 0x1ed   : > { %v2466_v48 = vor.u32 %v2465_v58, %v2464_v49  ;;  %v2468_v13 = vshrl.u32 %v5938_v63, %v2453_v41  ;;  %v2467_v33 = vshll.u32 %v5937_v56, %v2452_v0  ;;  %v7385_v17 = vshll.u32 %v2446_v37, 8 }
 0x1ee   : > { %v2314_v23 = vxor.u32 2147483648, %v2313_v12  ;;  %v2400_v54 = vsub.s32 0, %v7373_v9  ;;  %v2421_v55 = vsel %vm2336_vm1, %v2420_v22, %v2396_v20  ;;  %v2454_v2 = vshrl.u32 %v8708_v46, %v2453_v41 }
 0x1ef   : > { %vm2470_vm14 = vcmp.lt.s32.totalorder %v7363_v15, 1  ;;  %v5484_v28 = vadd.s32 4294967169, %v2546_v32  ;;  %v2469_v39 = vor.u32 %v2468_v13, %v2467_v33  ;;  %vm2473_vm12 = vcmp.lt.s32.totalorder %v7363_v15, 4 }
 0x1f0   : > { %v2315_v42 = vsel %vm2232_vm10, %v2314_v23, %v2313_v12  ;;  %v5477_v34 = vmin.u32 %v2400_v54, %v7373_v9  ;;  %v2475_v37 = vsel %vm2473_vm12, %v2463_v51, 2102212464  ;;  %v2478_v41 = vsel %vm2470_vm14, %v2457_v47, %v2460_v36 }
 0x1f1   : > { %v2318_v0 = vsel %vm7309_vm6, %v7080_v35, %v2315_v42  ;;  %v2479_v20 = vsel %vm2473_vm12, %v2466_v48, 920167782  ;;  %vm2471_vm10 = vcmp.lt.s32.totalorder %v7363_v15, 2  ;;  %vm2472_vm4 = vcmp.lt.s32.totalorder %v7363_v15, 3 }
 0x1f2   : > { %5800 = vcosq.f32 %v2318_v0  ;;  %v2402_v23 = vclz %v5477_v34  ;;  %v2474_v54 = vsel %vm2470_vm14, %v2454_v2, %v2457_v47  ;;  %v2480_v13 = vsel %vm2472_vm4, %v2463_v51, %v2479_v20 }
 0x1f3   : > { %5802 = vsinq.f32 %v2318_v0  ;;  %v2482_v4 = vsel %vm2470_vm14, %v2460_v36, %v2463_v51  ;;  %v2476_v30 = vsel %vm2472_vm4, %v2460_v36, %v2475_v37  ;;  %v2481_v58 = vsel %vm2471_vm10, %v2478_v41, %v2480_v13 }
 0x1f4   : > { %v5478_v32 = vadd.s32 4294967294, %v2402_v23  ;;  %v2483_v22 = vsel %vm2473_vm12, %v2469_v39, 1326507024  ;;  %v7415_v43 = vmul.u32.u64.low %v7385_v17, %v2481_v58  ;;  %v7416_v49 = vmul.u32.u64.high %v7385_v17, %v2481_v58, %v7415_v43 }
 0x1f5   : > { %v2484_v7 = vsel %vm2472_vm4, %v2466_v48, %v2483_v22  ;;  %v2552_v12 = vadd.s32 1, %v5484_v28  ;;  %v2390_v47 = vadd.s32 %v7303_v62, %v7331_v50  ;;  %v7423_v51 = vsel %vm7378_vm3, 0, %v2421_v55 }
 0x1f6   : > { %vm5479_vm6 = vcmp.lt.s32.totalorder %v5478_v32, 0  ;;  %v2485_v36 = vsel %vm2471_vm10, %v2482_v4, %v2484_v7  ;;  %v2477_v28 = vsel %vm2471_vm10, %v2474_v54, %v2476_v30  ;;  %vm2322_vm9 = vweird.f32 %v7080_v35 }
 0x1f7   : > { %v2405_v33 = vsel %vm5479_vm6, 0, %v5478_v32  ;;  %v7428_v48 = vmul.u32.u64.low %v7385_v17, %v2485_v36  ;;  %v7429_v2 = vmul.u32.u64.high %v7385_v17, %v2485_v36, %v7428_v48  ;;  %vm2553_vm15 = vcmp.gt.s32.totalorder %v2552_v12, 0 }
 0x1f8   : > { %v2406_v42 = vsub.s32 32, %v2405_v33  ;;  %v2410_v34 = vsub.s32 4294967266, %v2405_v33  ;;  %v2554_v62 = vsel %vm2553_vm15, %v2552_v12, 0  ;;  %v2427_v50 = vadd.s32 3, %v7423_v51 }
 0x1f9   : > { %v2496_v55 = vadd.s32 1, %v7416_v49  ;;  %v2549_v39 = vand.u32 8388607, %v8705_v61  ;;  %v2556_v0 = vand.u32 31, %v2554_v62  ;;  %vm2325_vm5 = vcmp.lt.s32.totalorder %v7360_v40, 2 }
 0x1fa   : > { %v2407_v37 = vshll.u32 %v7373_v9, %v2405_v33  ;;  %v2408_v41 = vshrl.u32 %v2390_v47, %v2406_v42  ;;  %v2411_v20 = vadd.s32 127, %v2410_v34  ;;  %vm2326_vm2 = vcmp.eq.s32.totalorder %v7360_v40, 0 }
 0x1fb   : > { %v2493_v15 = vmul.u32 %v7385_v17, %v2477_v28  ;;  %vm2495_vm7 = vc.u32 %v7429_v2, %v7415_v43  ;;  %v2557_v23 = vsub.s32 32, %v2556_v0  ;;  %vm2329_vm0 = vcmp.eq.s32.totalorder %v7360_v40, 2 }
 0x1fc   : > { %v7444_v54 = vpop.eup %5800  ;;  %v2409_v13 = vor.u32 %v2408_v41, %v2407_v37  ;;  %v2412_v4 = vshll.u32 %v2411_v20, 23  ;;  %v2497_v32 = vsel %vm2495_vm7, %v2496_v55, %v7416_v49  ;;  %v7451_v58 = vand.u32 3, %v2427_v50 }
 0x1fd   : > { %v7448_v30 = vpop.eup %5802  ;;  %v8706_v9 = vxor.u32 2147483648, %v7444_v54  ;;  %v2498_v22 = vadd.s32 %v2497_v32, %v2493_v15  ;;  %v2550_v17 = vor.u32 8388608, %v2549_v39  ;;  %v7454_v47 = vshrl.u32 %v2554_v62, 5 }
 0x1fe   : > { %v8707_v7 = vxor.u32 2147483648, %v7448_v30  ;;  %v2413_v12 = vor.u32 4788187, %v2412_v4  ;;  %v2559_v36 = vshll.u32 %v8708_v46, %v2556_v0  ;;  %v2560_v48 = vshrl.u32 %v8744_v53, %v2557_v23 }
 0x1ff   : > { %v2331_v33 = vsel %vm2329_vm0, %v8706_v9, %v7448_v30  ;;  %v2499_v49 = vadd.s32 536870912, %v2498_v22  ;;  %v2563_v42 = vshrl.u32 %v8745_v16, %v2557_v23  ;;  %v2416_v62 = vcvt.s32.f32 %v2409_v13 }
 0x200   : > { %v2328_v34 = vsel %vm2326_vm2, %v7444_v54, %v8707_v7  ;;  %v2414_v28 = vand.u32 2147483647, %v2413_v12  ;;  %v8769_v50 = vmov 2102212464   ;;  %v2562_v41 = vshll.u32 %v8744_v53, %v2556_v0 }
 0x201   : > { %v2566_v55 = vshrl.u32 %v8769_v50, %v2557_v23  ;;  %v2332_v39 = vsel %vm2325_vm5, %v2328_v34, %v2331_v33  ;;  %v2500_v37 = vshrl.u32 %v2499_v49, 30  ;;  %v2569_v20 = vshrl.u32 %v5937_v56, %v2557_v23 }
 0x202   : > { %v2333_v15 = vsel %vm2322_vm9, nan, %v2332_v39  ;;  %v2417_v4 = vmul.f32 %v2416_v62, %v2414_v28  ;;  %vm2440_vm14 = vcmp.lt.s32.totalorder %v7029_v14, 0  ;;  %v2565_v32 = vshll.u32 %v8745_v16, %v2556_v0 }
 0x203   : > { %v2568_v13 = vshll.u32 %v8769_v50, %v2556_v0  ;;  %v2501_v12 = vshll.u32 %v2500_v37, 30  ;;  %v2561_v61 = vor.u32 %v2560_v48, %v2559_v36  ;;  %v2564_v9 = vor.u32 %v2563_v42, %v2562_v41  ;;  %2753 = vst [vmem:[%s6384_s6 + $0x98] sm:$0xff] %v2333_v15 }
 0x204   : > { %v2572_v40 = vshrl.u32 %v5938_v63, %v2557_v23  ;;  %v2418_v33 = vxor.u32 2147483648, %v2417_v4  ;;  %v2567_v49 = vor.u32 %v2566_v55, %v2565_v32  ;;  %v2571_v7 = vshll.u32 %v5937_v56, %v2556_v0 }
 0x205   : > { %v2570_v34 = vor.u32 %v2569_v20, %v2568_v13  ;;  %v7480_v46 = vsub.s32 %v2498_v22, %v2501_v12  ;;  %v8770_v28 = vmov 683565275   ;;  %v7483_v39 = vshll.u32 %v2550_v17, 8 }
 0x206   : > { %v2558_v62 = vshrl.u32 %v8770_v28, %v2557_v23  ;;  %v2649_v57 = vand.u32 2139095040, %v7358_v1  ;;  %v2419_v36 = vsel %vm2336_vm1, %v2418_v33, %v2417_v4  ;;  %v2524_v48 = vsub.s32 4, %v2500_v37 }
 0x207   : > { %v2573_v42 = vor.u32 %v2572_v40, %v2571_v7  ;;  %vm2574_vm12 = vcmp.lt.s32.totalorder %v7454_v47, 1  ;;  %v2422_v55 = vsel %vm7378_vm3, %v7025_v24, %v2419_v36  ;;  %v2504_v0 = vsub.s32 0, %v7480_v46 }
 0x208   : > { %vm2576_vm10 = vcmp.lt.s32.totalorder %v7454_v47, 3  ;;  %vm2577_vm4 = vcmp.lt.s32.totalorder %v7454_v47, 4  ;;  %5804 = vcosq.f32 %v2422_v55  ;;  %v2582_v22 = vsel %vm2574_vm12, %v2561_v61, %v2564_v9 }
 0x209   : > { %v2579_v23 = vsel %vm2577_vm4, %v2567_v49, 2102212464  ;;  %v2583_v17 = vsel %vm2577_vm4, %v2570_v34, 920167782  ;;  %5806 = vsinq.f32 %v2422_v55  ;;  %v5481_v7 = vmin.u32 %v2504_v0, %v7480_v46 }
 0x20a   : > { %vm2575_vm1 = vcmp.lt.s32.totalorder %v7454_v47, 2  ;;  %v2584_v44 = vsel %vm2576_vm10, %v2567_v49, %v2583_v17  ;;  %v2586_v20 = vsel %vm2574_vm12, %v2564_v9, %v2567_v49  ;;  %v2587_v15 = vsel %vm2577_vm4, %v2573_v42, 1326507024 }
 0x20b   : > { %v2585_v41 = vsel %vm2575_vm1, %v2582_v22, %v2584_v44  ;;  %v8712_v4 = vand.u32 2147483647, %v7358_v1  ;;  %v2506_v32 = vclz %v5481_v7  ;;  %v2525_v13 = vsel %vm2440_vm14, %v2524_v48, %v2500_v37 }
 0x20c   : > { %v2578_v12 = vsel %vm2574_vm12, %v2558_v62, %v2561_v61  ;;  %v2580_v40 = vsel %vm2576_vm10, %v2564_v9, %v2579_v23  ;;  %v2588_v33 = vsel %vm2576_vm10, %v2570_v34, %v2587_v15  ;;  %v2650_v49 = vshrl.u32 %v2649_v57, 23 }
 0x20d   : > { %v7515_v36 = vmul.u32.u64.low %v7483_v39, %v2585_v41  ;;  %v7516_v55 = vmul.u32.u64.high %v7483_v39, %v2585_v41, %v7515_v36  ;;  %v8771_v42 = vand.u32 2147483647, %v7029_v14  ;;  %v5482_v37 = vadd.s32 4294967294, %v2506_v32 }
 0x20e   : > { %v2589_v61 = vsel %vm2575_vm1, %v2586_v20, %v2588_v33  ;;  %vm2429_vm6 = vcmp.lt.s32.totalorder %v7451_v58, 2  ;;  %v5488_v57 = vadd.s32 4294967169, %v2650_v49  ;;  %vm2426_vm15 = vweird.f32 %v7025_v24 }
 0x20f   : > { %vm7520_vm3 = vcmp.le.f32.partialorder %v8771_v42, 0.7853982  ;;  %v7532_v34 = vmul.u32.u64.low %v7483_v39, %v2589_v61  ;;  %v7533_v62 = vmul.u32.u64.high %v7483_v39, %v2589_v61, %v7532_v34  ;;  %vm2430_vm5 = vcmp.eq.s32.totalorder %v7451_v58, 0 }
 0x210   : > { %v7529_v9 = vsel %vm7520_vm3, 0, %v2525_v13  ;;  %vm2433_vm2 = vcmp.eq.s32.totalorder %v7451_v58, 2  ;;  %vm5483_vm7 = vcmp.lt.s32.totalorder %v5482_v37, 0  ;;  %v2581_v48 = vsel %vm2575_vm1, %v2578_v12, %v2580_v40 }
 0x211   : > { %v2509_v23 = vsel %vm5483_vm7, 0, %v5482_v37  ;;  %v2600_v22 = vadd.s32 1, %v7516_v55  ;;  %v2653_v17 = vand.u32 8388607, %v8712_v4  ;;  %v2656_v7 = vadd.s32 1, %v5488_v57 }
 0x212   : > { %v2494_v44 = vadd.s32 %v7415_v43, %v7429_v2  ;;  %v2510_v41 = vsub.s32 32, %v2509_v23  ;;  %v2514_v20 = vsub.s32 4294967266, %v2509_v23  ;;  %v2531_v15 = vadd.s32 3, %v7529_v9  ;;  %v7546_v32 = vpop.eup %5804 }
 0x213   : > { %v2511_v13 = vshll.u32 %v7480_v46, %v2509_v23  ;;  %v2597_v47 = vmul.u32 %v7483_v39, %v2581_v48  ;;  %vm2599_vm0 = vc.u32 %v7533_v62, %v7515_v36  ;;  %vm2657_vm12 = vcmp.gt.s32.totalorder %v2656_v7, 0  ;;  %v7551_v12 = vpop.eup %5806 }
 0x214   : > { %v8713_v40 = vxor.u32 2147483648, %v7546_v32  ;;  %v2512_v33 = vshrl.u32 %v2494_v44, %v2510_v41  ;;  %v2515_v49 = vadd.s32 127, %v2514_v20  ;;  %v2601_v43 = vsel %vm2599_vm0, %v2600_v22, %v7516_v55 }
 0x215   : > { %v8714_v2 = vxor.u32 2147483648, %v7551_v12  ;;  %v2602_v42 = vadd.s32 %v2601_v43, %v2597_v47  ;;  %v2654_v37 = vor.u32 8388608, %v2653_v17  ;;  %v2658_v61 = vsel %vm2657_vm12, %v2656_v7, 0 }
 0x216   : > { %v2435_v46 = vsel %vm2433_vm2, %v8713_v40, %v7551_v12  ;;  %v2513_v39 = vor.u32 %v2512_v33, %v2511_v13  ;;  %v2516_v34 = vshll.u32 %v2515_v49, 23  ;;  %v7562_v57 = vand.u32 3, %v7069_v38 }
 0x217   : > { %v2432_v55 = vsel %vm2430_vm5, %v7546_v32, %v8714_v2  ;;  %v7569_v48 = vand.u32 3, %v2531_v15  ;;  %v2603_v23 = vadd.s32 536870912, %v2602_v42  ;;  %v2660_v22 = vand.u32 31, %v2658_v61 }
 0x218   : > { %v2436_v17 = vsel %vm2429_vm6, %v2432_v55, %v2435_v46  ;;  %v2517_v7 = vor.u32 4788187, %v2516_v34  ;;  %v7574_v44 = vand.u32 3, %v7139_v31  ;;  %v7577_v38 = vand.u32 3, %v7246_v26 }
 0x219   : > { %v2437_v41 = vsel %vm2426_vm15, nan, %v2436_v17  ;;  %v7581_v20 = vshrl.u32 %v2603_v23, 30  ;;  %v2661_v13 = vsub.s32 32, %v2660_v22  ;;  %v7583_v15 = vshll.u32 %v2654_v37, 8 }
 0x21a   : > { %v2518_v47 = vand.u32 2147483647, %v2517_v7  ;;  %v2520_v33 = vcvt.s32.f32 %v2513_v39  ;;  %v7586_v58 = vadd.s32 %v7515_v36, %v7533_v62  ;;  %2754 = vst [vmem:[%s6384_s6 + $0xa0] sm:$0xff] %v2437_v41  ;;  %vm2853_vm10 = vcmp.eq.s32.totalorder %v7562_v57, 0 }
 0x21b   : > { %v2605_v31 = vshll.u32 %v7581_v20, 30  ;;  %v2663_v26 = vshll.u32 %v8770_v28, %v2660_v22  ;;  %v2664_v49 = vshrl.u32 %v8744_v53, %v2661_v13  ;;  %v2669_v43 = vshll.u32 %v8745_v16, %v2660_v22 }
 0x21c   : > { %v2521_v46 = vmul.f32 %v2520_v33, %v2518_v47  ;;  %v2667_v37 = vshrl.u32 %v8745_v16, %v2661_v13  ;;  %v2670_v34 = vshrl.u32 %v8769_v50, %v2661_v13  ;;  %v2673_v39 = vshrl.u32 %v5937_v56, %v2661_v13 }
 0x21d   : > { %v7597_v36 = vsub.s32 %v2602_v42, %v2605_v31  ;;  %v2659_v62 = vshrl.u32 %v2658_v61, 5  ;;  %v2666_v55 = vshll.u32 %v8744_v53, %v2660_v22  ;;  %v8774_v23 = vxor.u32 2147483648, %v7164_v25 }
 0x21e   : > { %v2522_v7 = vxor.u32 2147483648, %v2521_v46  ;;  %v2665_v41 = vor.u32 %v2664_v49, %v2663_v26  ;;  %v2671_v4 = vor.u32 %v2670_v34, %v2669_v43  ;;  %v2672_v47 = vshll.u32 %v8769_v50, %v2660_v22 }
 0x21f   : > { %v2855_v17 = vsel %vm2853_vm10, %v7156_v3, %v8774_v23  ;;  %v2608_v33 = vsub.s32 0, %v7597_v36  ;;  %v2668_v40 = vor.u32 %v2667_v37, %v2666_v55  ;;  %v2675_v2 = vshll.u32 %v5937_v56, %v2660_v22 }
 0x220   : > { %v2676_v42 = vshrl.u32 %v5938_v63, %v2661_v13  ;;  %vm2852_vm4 = vcmp.lt.s32.totalorder %v7562_v57, 2  ;;  %v2523_v61 = vsel %vm2440_vm14, %v2522_v7, %v2521_v46  ;;  %v2662_v31 = vshrl.u32 %v8770_v28, %v2661_v13 }
 0x221   : > { %v2674_v23 = vor.u32 %v2673_v39, %v2672_v47  ;;  %vm2856_vm1 = vcmp.eq.s32.totalorder %v7562_v57, 2  ;;  %v2526_v26 = vsel %vm7520_vm3, %v7029_v14, %v2523_v61  ;;  %v5485_v49 = vmin.u32 %v2608_v33, %v7597_v36 }
 0x222   : > { %v2677_v43 = vor.u32 %v2676_v42, %v2675_v2  ;;  %vm2681_vm6 = vcmp.lt.s32.totalorder %v2659_v62, 4  ;;  %5808 = vcosq.f32 %v2526_v26  ;;  %vm2678_vm5 = vcmp.lt.s32.totalorder %v2659_v62, 1 }
 0x223   : > { %vm2680_vm2 = vcmp.lt.s32.totalorder %v2659_v62, 3  ;;  %v2683_v22 = vsel %vm2681_vm6, %v2671_v4, 2102212464  ;;  %5810 = vsinq.f32 %v2526_v26  ;;  %v2610_v46 = vclz %v5485_v49 }
 0x224   : > { %v2682_v37 = vsel %vm2678_vm5, %v2662_v31, %v2665_v41  ;;  %v2686_v13 = vsel %vm2678_vm5, %v2665_v41, %v2668_v40  ;;  %v2628_v34 = vsub.s32 4, %v7581_v20  ;;  %v2684_v39 = vsel %vm2680_vm2, %v2668_v40, %v2683_v22 }
 0x225   : > { %v2687_v0 = vsel %vm2681_vm6, %v2674_v23, 920167782  ;;  %v2690_v55 = vsel %vm2678_vm5, %v2668_v40, %v2671_v4  ;;  %v5486_v7 = vadd.s32 4294967294, %v2610_v46  ;;  %vm2679_vm14 = vcmp.lt.s32.totalorder %v2659_v62, 2 }
 0x226   : > { %v2688_v2 = vsel %vm2680_vm2, %v2671_v4, %v2687_v0  ;;  %v2691_v47 = vsel %vm2681_vm6, %v2677_v43, 1326507024  ;;  %vm2537_vm3 = vcmp.eq.s32.totalorder %v7569_v48, 2  ;;  %v2685_v33 = vsel %vm2679_vm14, %v2682_v37, %v2684_v39 }
 0x227   : > { %v2689_v42 = vsel %vm2679_vm14, %v2686_v13, %v2688_v2  ;;  %v2692_v61 = vsel %vm2680_vm2, %v2674_v23, %v2691_v47  ;;  %v8775_v41 = vxor.u32 2147483648, %v7156_v3  ;;  %vm2534_vm7 = vcmp.eq.s32.totalorder %v7569_v48, 0 }
 0x228   : > { %vm5487_vm0 = vcmp.lt.s32.totalorder %v5486_v7, 0  ;;  %v2693_v40 = vsel %vm2679_vm14, %v2690_v55, %v2692_v61  ;;  %v7631_v4 = vmul.u32.u64.low %v7583_v15, %v2689_v42  ;;  %v7632_v26 = vmul.u32.u64.high %v7583_v15, %v2689_v42, %v7631_v4 }
 0x229   : > { %v2858_v31 = vsel %vm2856_vm1, %v8775_v41, %v7164_v25  ;;  %vm2533_vm12 = vcmp.lt.s32.totalorder %v7569_v48, 2  ;;  %v2613_v62 = vsel %vm5487_vm0, 0, %v5486_v7  ;;  %vm2530_vm10 = vweird.f32 %v7029_v14 }
 0x22a   : > { %v7637_v23 = vmul.u32.u64.low %v7583_v15, %v2693_v40  ;;  %v7638_v49 = vmul.u32.u64.high %v7583_v15, %v2693_v40, %v7637_v23  ;;  %v2859_v3 = vsel %vm2852_vm4, %v2855_v17, %v2858_v31  ;;  %vm2544_vm1 = vcmp.lt.s32.totalorder %v7105_v21, 0 }
 0x22b   : > { %v2614_v25 = vsub.s32 32, %v2613_v62  ;;  %v2618_v43 = vsub.s32 4294967266, %v2613_v62  ;;  %v2701_v22 = vmul.u32 %v7583_v15, %v2685_v33  ;;  %v2860_v46 = vsel %vm2010_vm11, nan, %v2859_v3 }
 0x22c   : > { %v2615_v37 = vshll.u32 %v7597_v36, %v2613_v62  ;;  %vm2955_vm6 = vcmp.lt.s32.totalorder %v7574_v44, 2  ;;  %vm2956_vm5 = vcmp.eq.s32.totalorder %v7574_v44, 0  ;;  %vm2959_vm2 = vcmp.eq.s32.totalorder %v7574_v44, 2  ;;  %3582 = vst [vmem:[%s6384_s6 + $0xc0] sm:$0xff] %v2860_v46  ;;  %v7657_v18 = vpop.eup %5808 }
 0x22d   : > { %v2616_v57 = vshrl.u32 %v7586_v58, %v2614_v25  ;;  %v2619_v17 = vadd.s32 127, %v2618_v43  ;;  %v2704_v13 = vadd.s32 1, %v7632_v26  ;;  %v8776_v39 = vxor.u32 2147483648, %v7248_v27  ;;  %v7666_v58 = vpop.eup %5810 }
 0x22e   : > { %vm2703_vm11 = vc.u32 %v7638_v49, %v7631_v4  ;;  %v8777_v36 = vxor.u32 2147483648, %v7242_v45  ;;  %vm3058_vm4 = vcmp.lt.s32.totalorder %v7577_v38, 2  ;;  %vm3059_vm14 = vcmp.eq.s32.totalorder %v7577_v38, 0 }
 0x22f   : > { %v2958_v15 = vsel %vm2956_vm5, %v7242_v45, %v8776_v39  ;;  %v2538_v55 = vxor.u32 2147483648, %v7657_v18  ;;  %v2617_v7 = vor.u32 %v2616_v57, %v2615_v37  ;;  %v2620_v2 = vshll.u32 %v2619_v17, 23 }
 0x230   : > { %v2961_v0 = vsel %vm2959_vm2, %v8777_v36, %v7248_v27  ;;  %v2705_v47 = vsel %vm2703_vm11, %v2704_v13, %v7632_v26  ;;  %v2535_v33 = vxor.u32 2147483648, %v7666_v58  ;;  %v8778_v27 = vxor.u32 2147483648, %v7323_v8 }
 0x231   : > { %v2706_v42 = vadd.s32 %v2705_v47, %v2701_v22  ;;  %v2962_v45 = vsel %vm2955_vm6, %v2958_v15, %v2961_v0  ;;  %v2539_v41 = vsel %vm2537_vm3, %v2538_v55, %v7666_v58  ;;  %v2621_v31 = vor.u32 4788187, %v2620_v2 }
 0x232   : > { %v3061_v61 = vsel %vm3059_vm14, %v7320_v59, %v8778_v27  ;;  %v2624_v40 = vcvt.s32.f32 %v2617_v7  ;;  %v2963_v26 = vsel %vm2114_vm8, nan, %v2962_v45  ;;  %v2536_v44 = vsel %vm2534_vm7, %v7657_v18, %v2535_v33 }
 0x233   : > { %v2707_v62 = vadd.s32 536870912, %v2706_v42  ;;  %vm3062_vm0 = vcmp.eq.s32.totalorder %v7577_v38, 2  ;;  %v3160_v23 = vand.u32 3, %v7328_v60  ;;  %3583 = vst [vmem:[%s6384_s6 + $0xc8] sm:$0xff] %v2963_v26  ;;  %v2540_v3 = vsel %vm2533_vm12, %v2536_v44, %v2539_v41 }
 0x234   : > { %v2622_v25 = vand.u32 2147483647, %v2621_v31  ;;  %v8779_v43 = vxor.u32 2147483648, %v7320_v59  ;;  %v3263_v22 = vand.u32 3, %v7423_v51  ;;  %v2541_v46 = vsel %vm2530_vm10, nan, %v2540_v3 }
 0x235   : > { %v2629_v60 = vsel %vm2544_vm1, %v2628_v34, %v7581_v20  ;;  %v2708_v37 = vshrl.u32 %v2707_v62, 30  ;;  %2755 = vst [vmem:[%s6384_s6 + $0xa8] sm:$0xff] %v2541_v46  ;;  %vm3162_vm8 = vcmp.eq.s32.totalorder %v3160_v23, 0  ;;  %vm3165_vm3 = vcmp.eq.s32.totalorder %v3160_v23, 2 }
 0x236   : > { %v3064_v52 = vsel %vm3062_vm0, %v8779_v43, %v7323_v8  ;;  %v2625_v57 = vmul.f32 %v2624_v40, %v2622_v25  ;;  %vm3161_vm7 = vcmp.lt.s32.totalorder %v3160_v23, 2  ;;  %v8780_v51 = vxor.u32 2147483648, %v7448_v30  ;;  %v7734_v26 = vld [vmem:[%s6023_s3 + $0x2] ss:$4 sm:$0xf] }
 0x237   : > { %v3065_v48 = vsel %vm3058_vm4, %v3061_v61, %v3064_v52  ;;  %v2709_v8 = vshll.u32 %v2708_v37, 30  ;;  %v8781_v20 = vxor.u32 2147483648, %v7444_v54  ;;  %v8782_v38 = vand.u32 2147483647, %v7105_v21 }
 0x238   : > { %v3066_v59 = vsel %vm2218_vm13, nan, %v3065_v48  ;;  %v3164_v17 = vsel %vm3162_vm8, %v7444_v54, %v8780_v51  ;;  %v2626_v13 = vxor.u32 2147483648, %v2625_v57  ;;  %vm3265_vm13 = vcmp.eq.s32.totalorder %v3263_v22, 0 }
 0x239   : > { %v3167_v34 = vsel %vm3165_vm3, %v8781_v20, %v7448_v30  ;;  %3584 = vst [vmem:[%s6384_s6 + $0xd0] sm:$0xff] %v3066_v59  ;;  %vm2543_vm12 = vcmp.le.f32.partialorder %v8782_v38, 0.7853982  ;;  %v2710_v15 = vsub.s32 %v2706_v42, %v2709_v8  ;;  %v8783_v0 = vxor.u32 2147483648, %v7551_v12 }
 0x23a   : > { %v3168_v29 = vsel %vm3161_vm7, %v3164_v17, %v3167_v34  ;;  %v2631_v39 = vsel %vm2543_vm12, 0, %v2629_v60  ;;  %v2627_v54 = vsel %vm2544_vm1, %v2626_v13, %v2625_v57  ;;  %vm3268_vm6 = vcmp.eq.s32.totalorder %v3263_v22, 2 }
 0x23b   : > { %v3169_v36 = vsel %vm2322_vm9, nan, %v3168_v29  ;;  %v3267_v7 = vsel %vm3265_vm13, %v7546_v32, %v8783_v0  ;;  %v3366_v30 = vand.u32 3, %v7529_v9  ;;  %v2630_v2 = vsel %vm2543_vm12, %v7105_v21, %v2627_v54 }
 0x23c   : > { %3585 = vst [vmem:[%s6384_s6 + $0xd8] sm:$0xff] %v3169_v36  ;;  %v2712_v47 = vsub.s32 0, %v2710_v15  ;;  %vm3264_vm5 = vcmp.lt.s32.totalorder %v3263_v22, 2  ;;  %v8784_v35 = vxor.u32 2147483648, %v7546_v32  ;;  %5812 = vcosq.f32 %v2630_v2 }
 0x23d   : > { %v2635_v45 = vadd.s32 3, %v2631_v39  ;;  %5814 = vsinq.f32 %v2630_v2  ;;  %vm3368_vm9 = vcmp.eq.s32.totalorder %v3366_v30, 0  ;;  %v2732_v40 = vsub.s32 4, %v2708_v37 }
 0x23e   : > { %v3270_v42 = vsel %vm3268_vm6, %v8784_v35, %v7551_v12  ;;  %v5489_v61 = vmin.u32 %v2712_v47, %v2710_v15  ;;  %v3370_v9 = vsel %vm3368_vm9, %v7657_v18, %v2535_v33  ;;  %vm3371_vm1 = vcmp.eq.s32.totalorder %v3366_v30, 2 }
 0x23f   : > { %v3271_v27 = vsel %vm3264_vm5, %v3267_v7, %v3270_v42  ;;  %v2636_v32 = vand.u32 3, %v2635_v45  ;;  %vm3367_vm2 = vcmp.lt.s32.totalorder %v3366_v30, 2  ;;  %v3373_v12 = vsel %vm3371_vm1, %v2538_v55, %v7666_v58 }
 0x240   : > { %v3272_v41 = vsel %vm2426_vm15, nan, %v3271_v27  ;;  %v2714_v31 = vclz %v5489_v61  ;;  %v3374_v62 = vsel %vm3367_vm2, %v3370_v9, %v3373_v12  ;;  %vm2648_vm15 = vcmp.lt.s32.totalorder %v7358_v1, 0 }
 0x241   : > { %3586 = vst [vmem:[%s6384_s6 + $0xe0] sm:$0xff] %v3272_v41  ;;  %v3375_v24 = vsel %vm2530_vm10, nan, %v3374_v62  ;;  %v3469_v33 = vand.u32 3, %v2631_v39  ;;  %v7744_v23 = vrot.slane %v7734_v26, %v6025_v5  ;;  %vm2634_vm11 = vweird.f32 %v7105_v21 }
 0x242   : > { %v5490_v44 = vadd.s32 4294967294, %v2714_v31  ;;  %v8785_v3 = vand.u32 2147483647, %v7358_v1  ;;  %v2733_v18 = vsel %vm2648_vm15, %v2732_v40, %v2708_v37  ;;  %3587 = vst [vmem:[%s6384_s6 + $0xe8] sm:$0xff] %v3375_v24  ;;  %vm2637_vm0 = vcmp.lt.s32.totalorder %v2636_v32, 2 }
 0x243   : > { %v7758_v58 = vrot.slane %v7734_v26, %v6027_v6  ;;  %v7762_v5 = vmul.f32 %v7744_v23, %v6038_v11  ;;  %vm2638_vm10 = vcmp.eq.s32.totalorder %v2636_v32, 0  ;;  %v2702_v55 = vadd.s32 %v7631_v4, %v7638_v49 }
 0x244   : > { %vm7749_vm4 = vcmp.le.f32.partialorder %v8785_v3, 0.7853982  ;;  %vm5491_vm14 = vcmp.lt.s32.totalorder %v5490_v44, 0  ;;  %vm2641_vm8 = vcmp.eq.s32.totalorder %v2636_v32, 2  ;;  %vm3471_vm3 = vcmp.eq.s32.totalorder %v3469_v33, 0 }
 0x245   : > { %v2717_v14 = vsel %vm5491_vm14, 0, %v5490_v44  ;;  %v2735_v46 = vsel %vm7749_vm4, 0, %v2733_v18  ;;  %vm3474_vm7 = vcmp.eq.s32.totalorder %v3469_v33, 2  ;;  %v7770_v8 = vmul.f32 %v7758_v58, %v6038_v11 }
 0x246   : > { %v2718_v43 = vsub.s32 32, %v2717_v14  ;;  %v2722_v52 = vsub.s32 4294967266, %v2717_v14  ;;  %v5813_v22 = vpop.eup %5812  ;;  %v2719_v37 = vshll.u32 %v2710_v15, %v2717_v14  ;;  %v3621_v4 = vand.u32 2147483647, %v7762_v5 }
 0x247   : > { %v5815_v60 = vpop.eup %5814  ;;  %v2642_v6 = vxor.u32 2147483648, %v5813_v22  ;;  %v3624_v49 = vand.u32 2139095040, %v7762_v5  ;;  %vm3470_vm12 = vcmp.lt.s32.totalorder %v3469_v33, 2  ;;  %v7779_v0 = vrot.slane %v7734_v26, %v6036_v10 }
 0x248   : > { %v2720_v48 = vshrl.u32 %v2702_v55, %v2718_v43  ;;  %v2723_v57 = vadd.s32 127, %v2722_v52  ;;  %v2639_v59 = vxor.u32 2147483648, %v5815_v60  ;;  %v3628_v2 = vand.u32 8388607, %v3621_v4 }
 0x249   : > { %v2643_v51 = vsel %vm2641_vm8, %v2642_v6, %v5815_v60  ;;  %v3476_v34 = vsel %vm3474_vm7, %v2642_v6, %v5815_v60  ;;  %v3625_v29 = vshrl.u32 %v3624_v49, 23  ;;  %v3725_v42 = vand.u32 2147483647, %v7770_v8 }
 0x24a   : > { %v2721_v17 = vor.u32 %v2720_v48, %v2719_v37  ;;  %v2724_v20 = vshll.u32 %v2723_v57, 23  ;;  %v2640_v38 = vsel %vm2638_vm10, %v5813_v22, %v2639_v59  ;;  %v3473_v13 = vsel %vm3471_vm3, %v5813_v22, %v2639_v59 }
 0x24b   : > { %v2644_v39 = vsel %vm2637_vm0, %v2640_v38, %v2643_v51  ;;  %v3477_v36 = vsel %vm3470_vm12, %v3473_v13, %v3476_v34  ;;  %v5525_v30 = vadd.s32 4294967169, %v3625_v29  ;;  %v3728_v45 = vand.u32 2139095040, %v7770_v8 }
 0x24c   : > { %v2725_v15 = vor.u32 4788187, %v2724_v20  ;;  %v2645_v7 = vsel %vm2634_vm11, nan, %v2644_v39  ;;  %v3478_v54 = vsel %vm2634_vm11, nan, %v3477_v36  ;;  %v2728_v35 = vcvt.s32.f32 %v2721_v17 }
 0x24d   : > { %2756 = vst [vmem:[%s6384_s6 + $0xb0] sm:$0xff] %v2645_v7  ;;  %3588 = vst [vmem:[%s6384_s6 + $0xf0] sm:$0xff] %v3478_v54  ;;  %v2739_v10 = vadd.s32 3, %v2735_v46  ;;  %v3629_v27 = vor.u32 8388608, %v3628_v2  ;;  %v3631_v61 = vadd.s32 1, %v5525_v30  ;;  %v7793_v21 = vmul.f32 %v7779_v0, %v6038_v11 }
 0x24e   : > { %v2726_v47 = vand.u32 2147483647, %v2725_v15  ;;  %v3729_v9 = vshrl.u32 %v3728_v45, 23  ;;  %v7797_v31 = vand.u32 8388607, %v3725_v42  ;;  %v7801_v62 = vand.u32 3, %v2735_v46 }
 0x24f   : > { %vm3632_vm13 = vcmp.gt.s32.totalorder %v3631_v61, 0  ;;  %v7799_v44 = vand.u32 3, %v2739_v10  ;;  %v7803_v33 = vshll.u32 %v3629_v27, 8  ;;  %v3832_v55 = vand.u32 2139095040, %v7793_v21 }
 0x250   : > { %v2729_v41 = vmul.f32 %v2728_v35, %v2726_v47  ;;  %v3633_v32 = vsel %vm3632_vm13, %v3631_v61, 0  ;;  %v5529_v12 = vadd.s32 4294967169, %v3729_v9  ;;  %v3733_v14 = vor.u32 8388608, %v7797_v31 }
 0x251   : > { %v3635_v24 = vand.u32 31, %v3633_v32  ;;  %v3634_v18 = vshrl.u32 %v3633_v32, 5  ;;  %vm2745_vm9 = vcmp.eq.s32.totalorder %v7799_v44, 2  ;;  %vm2742_vm2 = vcmp.eq.s32.totalorder %v7799_v44, 0 }
 0x252   : > { %v2730_v40 = vxor.u32 2147483648, %v2729_v41  ;;  %v3735_v46 = vadd.s32 1, %v5529_v12  ;;  %vm2738_vm14 = vweird.f32 %v7358_v1  ;;  %vm3573_vm0 = vcmp.lt.s32.totalorder %v7801_v62, 2 }
 0x253   : > { %v3636_v52 = vsub.s32 32, %v3635_v24  ;;  %v3638_v22 = vshll.u32 %v8770_v28, %v3635_v24  ;;  %v3641_v60 = vshll.u32 %v8744_v53, %v3635_v24  ;;  %v3644_v6 = vshll.u32 %v8745_v16, %v3635_v24 }
 0x254   : > { %v2731_v3 = vsel %vm2648_vm15, %v2730_v40, %v2729_v41  ;;  %v3647_v37 = vshll.u32 %v8769_v50, %v3635_v24  ;;  %v3650_v59 = vshll.u32 %v5937_v56, %v3635_v24  ;;  %vm3653_vm6 = vcmp.lt.s32.totalorder %v3634_v18, 1 }
 0x255   : > { %v2734_v43 = vsel %vm7749_vm4, %v7358_v1, %v2731_v3  ;;  %v3639_v48 = vshrl.u32 %v8744_v53, %v3636_v52  ;;  %v3642_v57 = vshrl.u32 %v8745_v16, %v3636_v52  ;;  %v3637_v25 = vshrl.u32 %v8770_v28, %v3636_v52 }
 0x256   : > { %5816 = vcosq.f32 %v2734_v43  ;;  %v3645_v49 = vshrl.u32 %v8769_v50, %v3636_v52  ;;  %v3648_v51 = vshrl.u32 %v5937_v56, %v3636_v52  ;;  %v3651_v17 = vshrl.u32 %v5938_v63, %v3636_v52 }
 0x257   : > { %5818 = vsinq.f32 %v2734_v43  ;;  %v3640_v20 = vor.u32 %v3639_v48, %v3638_v22  ;;  %v3643_v34 = vor.u32 %v3642_v57, %v3641_v60  ;;  %vm3654_vm5 = vcmp.lt.s32.totalorder %v3634_v18, 2 }
 0x258   : > { %v3646_v38 = vor.u32 %v3645_v49, %v3644_v6  ;;  %v3649_v13 = vor.u32 %v3648_v51, %v3647_v37  ;;  %v3652_v29 = vor.u32 %v3651_v17, %v3650_v59  ;;  %vm3655_vm1 = vcmp.lt.s32.totalorder %v3634_v18, 3 }
 0x259   : > { %vm3656_vm15 = vcmp.lt.s32.totalorder %v3634_v18, 4  ;;  %v3657_v39 = vsel %vm3653_vm6, %v3637_v25, %v3640_v20  ;;  %v3661_v15 = vsel %vm3653_vm6, %v3640_v20, %v3643_v34  ;;  %vm3736_vm11 = vcmp.gt.s32.totalorder %v3735_v46, 0 }
 0x25a   : > { %vm2741_vm4 = vcmp.lt.s32.totalorder %v7799_v44, 2  ;;  %v3658_v36 = vsel %vm3656_vm15, %v3646_v38, 2102212464  ;;  %v3662_v7 = vsel %vm3656_vm15, %v3649_v13, 920167782  ;;  %v3665_v54 = vsel %vm3653_vm6, %v3643_v34, %v3646_v38 }
 0x25b   : > { %v3666_v30 = vsel %vm3656_vm15, %v3652_v29, 1326507024  ;;  %v3659_v2 = vsel %vm3655_vm1, %v3643_v34, %v3658_v36  ;;  %v3663_v47 = vsel %vm3655_vm1, %v3646_v38, %v3662_v7  ;;  %v3737_v45 = vsel %vm3736_vm11, %v3735_v46, 0 }
 0x25c   : > { %v3667_v35 = vsel %vm3655_vm1, %v3649_v13, %v3666_v30  ;;  %v3660_v10 = vsel %vm3654_vm5, %v3657_v39, %v3659_v2  ;;  %v3664_v27 = vsel %vm3654_vm5, %v3661_v15, %v3663_v47  ;;  %v3833_v41 = vshrl.u32 %v3832_v55, 23 }
 0x25d   : > { %v3668_v61 = vsel %vm3654_vm5, %v3665_v54, %v3667_v35  ;;  %v7835_v40 = vmul.u32.u64.low %v7803_v33, %v3664_v27  ;;  %v7836_v32 = vmul.u32.u64.high %v7803_v33, %v3664_v27, %v7835_v40  ;;  %vm3574_vm10 = vcmp.eq.s32.totalorder %v7801_v62, 0 }
 0x25e   : > { %v7831_v9 = vmul.u32.u64.low %v7803_v33, %v3668_v61  ;;  %v7832_v31 = vmul.u32.u64.high %v7803_v33, %v3668_v61, %v7831_v9  ;;  %vm3577_vm8 = vcmp.eq.s32.totalorder %v7801_v62, 2  ;;  %v3739_v24 = vand.u32 31, %v3737_v45 }
 0x25f   : > { %v7842_v55 = vshrl.u32 %v3737_v45, 5  ;;  %v7844_v43 = vshll.u32 %v3733_v14, 8  ;;  %v3829_v52 = vand.u32 2147483647, %v7793_v21  ;;  %v3676_v46 = vmul.u32 %v7803_v33, %v3660_v10 }
 0x260   : > { %v5817_v12 = vpop.eup %5816  ;;  %v3740_v60 = vsub.s32 32, %v3739_v24  ;;  %v5533_v6 = vadd.s32 4294967169, %v3833_v41  ;;  %vm3678_vm3 = vc.u32 %v7832_v31, %v7835_v40  ;;  %v3742_v57 = vshll.u32 %v8770_v28, %v3739_v24 }
 0x261   : > { %v5819_v3 = vpop.eup %5818  ;;  %v2746_v18 = vxor.u32 2147483648, %v5817_v12  ;;  %v3679_v33 = vadd.s32 1, %v7836_v32  ;;  %v3745_v25 = vshll.u32 %v8744_v53, %v3739_v24  ;;  %v3748_v29 = vshll.u32 %v8745_v16, %v3739_v24 }
 0x262   : > { %v2743_v22 = vxor.u32 2147483648, %v5819_v3  ;;  %v3743_v17 = vshrl.u32 %v8744_v53, %v3740_v60  ;;  %v3746_v20 = vshrl.u32 %v8745_v16, %v3740_v60  ;;  %v3749_v15 = vshrl.u32 %v8769_v50, %v3740_v60 }
 0x263   : > { %v2747_v37 = vsel %vm2745_vm9, %v2746_v18, %v5819_v3  ;;  %v3579_v48 = vsel %vm3577_vm8, %v2746_v18, %v5819_v3  ;;  %v3680_v13 = vsel %vm3678_vm3, %v3679_v33, %v7836_v32  ;;  %v3751_v36 = vshll.u32 %v8769_v50, %v3739_v24 }
 0x264   : > { %v2744_v14 = vsel %vm2742_vm2, %v5817_v12, %v2743_v22  ;;  %v3576_v59 = vsel %vm3574_vm10, %v5817_v12, %v2743_v22  ;;  %v3681_v44 = vadd.s32 %v3680_v13, %v3676_v46  ;;  %v3744_v39 = vor.u32 %v3743_v17, %v3742_v57 }
 0x265   : > { %v2748_v49 = vsel %vm2741_vm4, %v2744_v14, %v2747_v37  ;;  %v3580_v51 = vsel %vm3573_vm0, %v3576_v59, %v3579_v48  ;;  %v3747_v62 = vor.u32 %v3746_v20, %v3745_v25  ;;  %v3752_v7 = vshrl.u32 %v5937_v56, %v3740_v60 }
 0x266   : > { %v2749_v34 = vsel %vm2738_vm14, nan, %v2748_v49  ;;  %v3581_v38 = vsel %vm2738_vm14, nan, %v3580_v51  ;;  %v3754_v54 = vshll.u32 %v5937_v56, %v3739_v24  ;;  %v3755_v1 = vshrl.u32 %v5938_v63, %v3740_v60 }
 0x267   : > { %2757 = vst [vmem:[%s6384_s6 + $0xb8] sm:$0xff] %v2749_v34  ;;  %3589 = vst [vmem:[%s6384_s6 + $0xf8] sm:$0xff] %v3581_v38  ;;  %v3682_v30 = vadd.s32 536870912, %v3681_v44  ;;  %v3750_v2 = vor.u32 %v3749_v15, %v3748_v29  ;;  %vm3757_vm7 = vcmp.lt.s32.totalorder %v7842_v55, 1  ;;  %vm3759_vm12 = vcmp.lt.s32.totalorder %v7842_v55, 3 }
 0x268   : > { %v3753_v47 = vor.u32 %v3752_v7, %v3751_v36  ;;  %v3756_v35 = vor.u32 %v3755_v1, %v3754_v54  ;;  %vm3760_vm13 = vcmp.lt.s32.totalorder %v7842_v55, 4  ;;  %v3839_v45 = vadd.s32 1, %v5533_v6 }
 0x269   : > { %v7881_v10 = vshrl.u32 %v3682_v30, 30  ;;  %v3741_v27 = vshrl.u32 %v8770_v28, %v3740_v60  ;;  %v3762_v61 = vsel %vm3760_vm13, %v3750_v2, 2102212464  ;;  %v3765_v41 = vsel %vm3757_vm7, %v3744_v39, %v3747_v62 }
 0x26a   : > { %v3766_v9 = vsel %vm3760_vm13, %v3753_v47, 920167782  ;;  %v3769_v32 = vsel %vm3757_vm7, %v3747_v62, %v3750_v2  ;;  %v3770_v12 = vsel %vm3760_vm13, %v3756_v35, 1326507024  ;;  %vm3840_vm6 = vcmp.gt.s32.totalorder %v3839_v45, 0 }
 0x26b   : > { %v3684_v24 = vshll.u32 %v7881_v10, 30  ;;  %vm3758_vm5 = vcmp.lt.s32.totalorder %v7842_v55, 2  ;;  %v3761_v3 = vsel %vm3757_vm7, %v3741_v27, %v3744_v39  ;;  %v3767_v18 = vsel %vm3759_vm12, %v3750_v2, %v3766_v9 }
 0x26c   : > { %v3763_v22 = vsel %vm3759_vm12, %v3747_v62, %v3762_v61  ;;  %v3768_v46 = vsel %vm3758_vm5, %v3765_v41, %v3767_v18  ;;  %v3771_v60 = vsel %vm3759_vm12, %v3753_v47, %v3770_v12  ;;  %v3841_v6 = vsel %vm3840_vm6, %v3839_v45, 0 }
 0x26d   : > { %v7900_v37 = vrot.slane %v7734_v26, %v6055_v19  ;;  %v3685_v48 = vsub.s32 %v3681_v44, %v3684_v24  ;;  %v3772_v57 = vsel %vm3758_vm5, %v3769_v32, %v3771_v60  ;;  %v7908_v33 = vand.u32 8388607, %v3829_v52 }
 0x26e   : > { %v7903_v14 = vmul.u32.u64.low %v7844_v43, %v3772_v57  ;;  %v7904_v59 = vmul.u32.u64.high %v7844_v43, %v3772_v57, %v7903_v14  ;;  %v3843_v25 = vand.u32 31, %v3841_v6  ;;  %v3764_v51 = vsel %vm3758_vm5, %v3761_v3, %v3763_v22 }
 0x26f   : > { %v3687_v49 = vsub.s32 0, %v3685_v48  ;;  %v7911_v55 = vmul.u32.u64.low %v7844_v43, %v3768_v46  ;;  %v7912_v17 = vmul.u32.u64.high %v7844_v43, %v3768_v46, %v7911_v55  ;;  %v7917_v26 = vmul.f32 %v7900_v37, %v6038_v11 }
 0x270   : > { %v3844_v19 = vsub.s32 32, %v3843_v25  ;;  %v3677_v20 = vadd.s32 %v7835_v40, %v7832_v31  ;;  %v3707_v38 = vsub.s32 4, %v7881_v10  ;;  %v3780_v13 = vmul.u32 %v7844_v43, %v3764_v51 }
 0x271   : > { %8788 = vst [vmem:[#allocation6_spill] sm:$0xff] %v7917_v26  ;;  %v5526_v34 = vmin.u32 %v3687_v49, %v3685_v48  ;;  %v3837_v29 = vor.u32 8388608, %v7908_v33  ;;  %vm3782_vm9 = vc.u32 %v7904_v59, %v7911_v55  ;;  %v7927_v62 = vshrl.u32 %v3841_v6, 5 }
 0x272   : > { %v3847_v44 = vshrl.u32 %v8744_v53, %v3844_v19  ;;  %v3846_v11 = vshll.u32 %v8770_v28, %v3843_v25  ;;  %v3783_v15 = vadd.s32 1, %v7912_v17  ;;  %v3849_v31 = vshll.u32 %v8744_v53, %v3843_v25 }
 0x273   : > { %v3689_v39 = vclz %v5526_v34  ;;  %v3850_v40 = vshrl.u32 %v8745_v16, %v3844_v19  ;;  %v3853_v43 = vshrl.u32 %v8769_v50, %v3844_v19  ;;  %vm3623_vm1 = vcmp.lt.s32.totalorder %v7762_v5, 0 }
 0x274   : > { %v3855_v7 = vshll.u32 %v8769_v50, %v3843_v25  ;;  %v3856_v54 = vshrl.u32 %v5937_v56, %v3844_v19  ;;  %v3859_v1 = vshrl.u32 %v5938_v63, %v3844_v19  ;;  %v3784_v30 = vsel %vm3782_vm9, %v3783_v15, %v7912_v17 }
 0x275   : > { %v5527_v36 = vadd.s32 4294967294, %v3689_v39  ;;  %v3848_v2 = vor.u32 %v3847_v44, %v3846_v11  ;;  %v3852_v47 = vshll.u32 %v8745_v16, %v3843_v25  ;;  %v3858_v35 = vshll.u32 %v5937_v56, %v3843_v25 }
 0x276   : > { %v3785_v45 = vadd.s32 %v3784_v30, %v3780_v13  ;;  %v3851_v27 = vor.u32 %v3850_v40, %v3849_v31  ;;  %v3857_v61 = vor.u32 %v3856_v54, %v3855_v7  ;;  %v3845_v9 = vshrl.u32 %v8770_v28, %v3844_v19 }
 0x277   : > { %vm5528_vm2 = vcmp.lt.s32.totalorder %v5527_v36, 0  ;;  %v3854_v32 = vor.u32 %v3853_v43, %v3852_v47  ;;  %v3860_v12 = vor.u32 %v3859_v1, %v3858_v35  ;;  %vm3864_vm15 = vcmp.lt.s32.totalorder %v7927_v62, 4  ;;  %v8791_v47 = vld [vmem:[#allocation5_spill] sm:$0xff] }
 0x278   : > { %v3692_v41 = vsel %vm5528_vm2, 0, %v5527_v36  ;;  %v3786_v18 = vadd.s32 536870912, %v3785_v45  ;;  %vm3861_vm11 = vcmp.lt.s32.totalorder %v7927_v62, 1  ;;  %vm3863_vm4 = vcmp.lt.s32.totalorder %v7927_v62, 3 }
 0x279   : > { %v3693_v24 = vsub.s32 32, %v3692_v41  ;;  %v3697_v3 = vsub.s32 4294967266, %v3692_v41  ;;  %v3694_v22 = vshll.u32 %v3685_v48, %v3692_v41  ;;  %v3870_v46 = vsel %vm3864_vm15, %v3857_v61, 920167782 }
 0x27a   : > { %v3787_v57 = vshrl.u32 %v3786_v18, 30  ;;  %v3869_v14 = vsel %vm3861_vm11, %v3848_v2, %v3851_v27  ;;  %vm3862_vm14 = vcmp.lt.s32.totalorder %v7927_v62, 2  ;;  %v3866_v33 = vsel %vm3864_vm15, %v3854_v32, 2102212464 }
 0x27b   : > { %v3695_v60 = vshrl.u32 %v3677_v20, %v3693_v24  ;;  %v3698_v6 = vadd.s32 127, %v3697_v3  ;;  %v3871_v25 = vsel %vm3863_vm4, %v3854_v32, %v3870_v46  ;;  %v3874_v49 = vsel %vm3864_vm15, %v3860_v12, 1326507024 }
 0x27c   : > { %v3788_v17 = vshll.u32 %v3787_v57, 30  ;;  %v3873_v19 = vsel %vm3861_vm11, %v3851_v27, %v3854_v32  ;;  %v3708_v20 = vsel %vm3623_vm1, %v3707_v38, %v7881_v10  ;;  %v3872_v34 = vsel %vm3862_vm14, %v3869_v14, %v3871_v25 }
 0x27d   : > { %v3696_v51 = vor.u32 %v3695_v60, %v3694_v22  ;;  %v3699_v48 = vshll.u32 %v3698_v6, 23  ;;  %v3875_v13 = vsel %vm3863_vm4, %v3857_v61, %v3874_v49  ;;  %v3877_v44 = vshll.u32 %v3837_v29, 8 }
 0x27e   : > { %vm7961_vm0 = vcmp.le.f32.partialorder %v3621_v4, 0.7853982  ;;  %v7965_v15 = vsub.s32 %v3785_v45, %v3788_v17  ;;  %v3865_v31 = vsel %vm3861_vm11, %v3845_v9, %v3848_v2  ;;  %v3867_v10 = vsel %vm3863_vm4, %v3851_v27, %v3866_v33 }
 0x27f   : > { %v3700_v11 = vor.u32 4788187, %v3699_v48  ;;  %v3876_v38 = vsel %vm3862_vm14, %v3873_v19, %v3875_v13  ;;  %v7973_v40 = vmul.u32.u64.low %v3877_v44, %v3872_v34  ;;  %v7974_v29 = vmul.u32.u64.high %v3877_v44, %v3872_v34, %v7973_v40 }
 0x280   : > { %v3703_v43 = vcvt.s32.f32 %v3696_v51  ;;  %v7979_v36 = vsel %vm7961_vm0, 0, %v3708_v20  ;;  %v3791_v7 = vsub.s32 0, %v7965_v15  ;;  %v3811_v54 = vsub.s32 4, %v3787_v57 }
 0x281   : > { %v3701_v4 = vand.u32 2147483647, %v3700_v11  ;;  %v7982_v1 = vmul.u32.u64.low %v3877_v44, %v3876_v38  ;;  %v7983_v30 = vmul.u32.u64.high %v3877_v44, %v3876_v38, %v7982_v1  ;;  %v3936_v2 = vand.u32 2139095040, %v7917_v26 }
 0x282   : > { %v7988_v35 = vmul.f32 %v7744_v23, %v8791_v47  ;;  %v5530_v27 = vmin.u32 %v3791_v7, %v7965_v15  ;;  %v3868_v61 = vsel %vm3862_vm14, %v3865_v31, %v3867_v10  ;;  %v7995_v41 = vmul.f32 %v7758_v58, %v8791_v47 }
 0x283   : > { %v3704_v45 = vmul.f32 %v3703_v43, %v3701_v4  ;;  %v3887_v9 = vadd.s32 1, %v7974_v29  ;;  %v3933_v32 = vand.u32 2147483647, %v7917_v26  ;;  %v3937_v12 = vshrl.u32 %v3936_v2, 23 }
 0x284   : > { %v3714_v3 = vadd.s32 3, %v7979_v36  ;;  %vm3727_vm10 = vcmp.lt.s32.totalorder %v7770_v8, 0  ;;  %v3793_v23 = vclz %v5530_v27  ;;  %v3884_v62 = vmul.u32 %v3877_v44, %v3868_v61 }
 0x285   : > { %v3705_v24 = vxor.u32 2147483648, %v3704_v45  ;;  %v3812_v18 = vsel %vm3727_vm10, %v3811_v54, %v3787_v57  ;;  %vm3886_vm8 = vc.u32 %v7983_v30, %v7973_v40  ;;  %v5537_v58 = vadd.s32 4294967169, %v3937_v12 }
 0x286   : > { %vm8009_vm3 = vcmp.le.f32.partialorder %v3725_v42, 0.7853982  ;;  %v5531_v60 = vadd.s32 4294967294, %v3793_v23  ;;  %v3888_v6 = vsel %vm3886_vm8, %v3887_v9, %v7974_v29  ;;  %v3940_v33 = vand.u32 8388607, %v3933_v32 }
 0x287   : > { %v3706_v22 = vsel %vm3623_vm1, %v3705_v24, %v3704_v45  ;;  %v3889_v14 = vadd.s32 %v3888_v6, %v3884_v62  ;;  %v3943_v25 = vadd.s32 1, %v5537_v58  ;;  %v8019_v49 = vand.u32 3, %v3714_v3 }
 0x288   : > { %v3709_v57 = vsel %vm7961_vm0, %v7762_v5, %v3706_v22  ;;  %vm5532_vm7 = vcmp.lt.s32.totalorder %v5531_v60, 0  ;;  %v8023_v42 = vsel %vm8009_vm3, 0, %v3812_v18  ;;  %v3781_v17 = vadd.s32 %v7911_v55, %v7904_v59 }
 0x289   : > { %5820 = vcosq.f32 %v3709_v57  ;;  %v3796_v51 = vsel %vm5532_vm7, 0, %v5531_v60  ;;  %v3890_v48 = vadd.s32 536870912, %v3889_v14  ;;  %vm3944_vm12 = vcmp.gt.s32.totalorder %v3943_v25, 0 }
 0x28a   : > { %5822 = vsinq.f32 %v3709_v57  ;;  %v3797_v19 = vsub.s32 32, %v3796_v51  ;;  %v3801_v20 = vsub.s32 4294967266, %v3796_v51  ;;  %v3945_v34 = vsel %vm3944_vm12, %v3943_v25, 0 }
 0x28b   : > { %v3818_v13 = vadd.s32 3, %v8023_v42  ;;  %vm8030_vm13 = vcmp.le.f32.partialorder %v3829_v52, 0.7853982  ;;  %v3891_v39 = vshrl.u32 %v3890_v48, 30  ;;  %v3941_v11 = vor.u32 8388608, %v3940_v33 }
 0x28c   : > { %v3947_v31 = vand.u32 31, %v3945_v34  ;;  %v3798_v10 = vshll.u32 %v7965_v15, %v3796_v51  ;;  %v3799_v38 = vshrl.u32 %v3781_v17, %v3797_v19  ;;  %v3802_v29 = vadd.s32 127, %v3801_v20 }
 0x28d   : > { %v4040_v59 = vand.u32 2139095040, %v7988_v35  ;;  %vm3831_vm6 = vcmp.lt.s32.totalorder %v7793_v21, 0  ;;  %v3892_v55 = vshll.u32 %v3891_v39, 30  ;;  %v3915_v4 = vsub.s32 4, %v3891_v39 }
 0x28e   : > { %v3948_v43 = vsub.s32 32, %v3947_v31  ;;  %vm3716_vm5 = vcmp.lt.s32.totalorder %v8019_v49, 2  ;;  %vm3717_vm9 = vcmp.eq.s32.totalorder %v8019_v49, 0  ;;  %vm3720_vm1 = vcmp.eq.s32.totalorder %v8019_v49, 2 }
 0x28f   : > { %v3800_v52 = vor.u32 %v3799_v38, %v3798_v10  ;;  %v3803_v7 = vshll.u32 %v3802_v29, 23  ;;  %vm3713_vm2 = vweird.f32 %v7762_v5  ;;  %v8041_v15 = vand.u32 3, %v3818_v13 }
 0x290   : > { %v3885_v54 = vadd.s32 %v7973_v40, %v7983_v30  ;;  %v8045_v1 = vsub.s32 %v3889_v14, %v3892_v55  ;;  %v8047_v2 = vshll.u32 %v3941_v11, 8  ;;  %v8049_v27 = vshrl.u32 %v3945_v34, 5 }
 0x291   : > { %v3804_v45 = vor.u32 4788187, %v3803_v7  ;;  %v3950_v61 = vshll.u32 %v8770_v28, %v3947_v31  ;;  %v4041_v9 = vshrl.u32 %v4040_v59, 23  ;;  %v3916_v24 = vsel %vm3831_vm6, %v3915_v4, %v3891_v39 }
 0x292   : > { %v3895_v12 = vsub.s32 0, %v8045_v1  ;;  %v3951_v3 = vshrl.u32 %v8744_v53, %v3948_v43  ;;  %v3953_v23 = vshll.u32 %v8744_v53, %v3947_v31  ;;  %v3807_v18 = vcvt.s32.f32 %v3800_v52 }
 0x293   : > { %v8057_v40 = vpop.eup %5820  ;;  %v3805_v30 = vand.u32 2147483647, %v3804_v45  ;;  %v3949_v62 = vshrl.u32 %v8770_v28, %v3948_v43  ;;  %v3956_v58 = vshll.u32 %v8745_v16, %v3947_v31  ;;  %v3954_v57 = vshrl.u32 %v8745_v16, %v3948_v43 }
 0x294   : > { %v8061_v22 = vpop.eup %5822  ;;  %v8722_v60 = vxor.u32 2147483648, %v8057_v40  ;;  %v5534_v6 = vmin.u32 %v3895_v12, %v8045_v1  ;;  %v3957_v14 = vshrl.u32 %v8769_v50, %v3948_v43  ;;  %v8070_v51 = vsel %vm8030_vm13, 0, %v3916_v24 }
 0x295   : > { %v8723_v33 = vxor.u32 2147483648, %v8061_v22  ;;  %v3808_v25 = vmul.f32 %v3807_v18, %v3805_v30  ;;  %v3960_v48 = vshrl.u32 %v5937_v56, %v3948_v43  ;;  %v3952_v20 = vor.u32 %v3951_v3, %v3950_v61 }
 0x296   : > { %v3722_v17 = vsel %vm3720_vm1, %v8722_v60, %v8061_v22  ;;  %v3897_v19 = vclz %v5534_v6  ;;  %v3959_v34 = vshll.u32 %v8769_v50, %v3947_v31  ;;  %v3962_v11 = vshll.u32 %v5937_v56, %v3947_v31 }
 0x297   : > { %v3719_v13 = vsel %vm3717_vm9, %v8057_v40, %v8723_v33  ;;  %v3809_v39 = vxor.u32 2147483648, %v3808_v25  ;;  %v3963_v10 = vshrl.u32 %v5938_v63, %v3948_v43  ;;  %v3955_v59 = vor.u32 %v3954_v57, %v3953_v23 }
 0x298   : > { %v3723_v38 = vsel %vm3716_vm5, %v3719_v13, %v3722_v17  ;;  %v5535_v29 = vadd.s32 4294967294, %v3897_v19  ;;  %v3958_v55 = vor.u32 %v3957_v14, %v3956_v58  ;;  %v3961_v7 = vor.u32 %v3960_v48, %v3959_v34 }
 0x299   : > { %v3724_v4 = vsel %vm3713_vm2, nan, %v3723_v38  ;;  %v3810_v52 = vsel %vm3727_vm10, %v3809_v39, %v3808_v25  ;;  %v3964_v45 = vor.u32 %v3963_v10, %v3962_v11  ;;  %vm3965_vm11 = vcmp.lt.s32.totalorder %v8049_v27, 1 }
 0x29a   : > { %v3813_v31 = vsel %vm8009_vm3, %v7770_v8, %v3810_v52  ;;  %vm5536_vm15 = vcmp.lt.s32.totalorder %v5535_v29, 0  ;;  %vm3966_vm4 = vcmp.lt.s32.totalorder %v8049_v27, 2  ;;  %4453 = vst [vmem:[%s6384_s6 + $0x100] sm:$0xff] %v3724_v4  ;;  %vm3967_vm14 = vcmp.lt.s32.totalorder %v8049_v27, 3 }
 0x29b   : > { %5824 = vcosq.f32 %v3813_v31  ;;  %v3900_v49 = vsel %vm5536_vm15, 0, %v5535_v29  ;;  %vm3968_vm0 = vcmp.lt.s32.totalorder %v8049_v27, 4  ;;  %v3973_v12 = vsel %vm3965_vm11, %v3952_v20, %v3955_v59 }
 0x29c   : > { %5826 = vsinq.f32 %v3813_v31  ;;  %v3901_v43 = vsub.s32 32, %v3900_v49  ;;  %v3905_v61 = vsub.s32 4294967266, %v3900_v49  ;;  %v3970_v46 = vsel %vm3968_vm0, %v3958_v55, 2102212464 }
 0x29d   : > { %v3974_v24 = vsel %vm3968_vm0, %v3961_v7, 920167782  ;;  %v3977_v3 = vsel %vm3965_vm11, %v3955_v59, %v3958_v55  ;;  %v3978_v23 = vsel %vm3968_vm0, %v3964_v45, 1326507024  ;;  %v3902_v30 = vshll.u32 %v8045_v1, %v3900_v49 }
 0x29e   : > { %v3903_v18 = vshrl.u32 %v3885_v54, %v3901_v43  ;;  %v3906_v58 = vadd.s32 127, %v3905_v61  ;;  %v3975_v6 = vsel %vm3967_vm14, %v3958_v55, %v3974_v24  ;;  %v3969_v57 = vsel %vm3965_vm11, %v3949_v62, %v3952_v20 }
 0x29f   : > { %v3976_v14 = vsel %vm3966_vm4, %v3973_v12, %v3975_v6  ;;  %v3979_v25 = vsel %vm3967_vm14, %v3961_v7, %v3978_v23  ;;  %v5541_v48 = vadd.s32 4294967169, %v4041_v9  ;;  %v3971_v1 = vsel %vm3967_vm14, %v3955_v59, %v3970_v46 }
 0x2a0   : > { %v3904_v17 = vor.u32 %v3903_v18, %v3902_v30  ;;  %v3907_v19 = vshll.u32 %v3906_v58, 23  ;;  %v3980_v54 = vsel %vm3966_vm4, %v3977_v3, %v3979_v25  ;;  %v8128_v9 = vmul.f32 %v7779_v0, %v8791_v47 }
 0x2a1   : > { %v8118_v34 = vmul.u32.u64.low %v8047_v2, %v3980_v54  ;;  %v8119_v13 = vmul.u32.u64.high %v8047_v2, %v3980_v54, %v8118_v34  ;;  %v8122_v62 = vmul.u32.u64.low %v8047_v2, %v3976_v14  ;;  %v8123_v20 = vmul.u32.u64.high %v8047_v2, %v3976_v14, %v8122_v62 }
 0x2a2   : > { %vm3817_vm10 = vweird.f32 %v7770_v8  ;;  %v3908_v39 = vor.u32 4788187, %v3907_v19  ;;  %v4047_v11 = vadd.s32 1, %v5541_v48  ;;  %vm3820_vm8 = vcmp.lt.s32.totalorder %v8041_v15, 2 }
 0x2a3   : > { %v3922_v10 = vadd.s32 3, %v8070_v51  ;;  %v3972_v38 = vsel %vm3966_vm4, %v3969_v57, %v3971_v1  ;;  %v4037_v29 = vand.u32 2147483647, %v7988_v35  ;;  %vm3821_vm3 = vcmp.eq.s32.totalorder %v8041_v15, 0 }
 0x2a4   : > { %v3909_v59 = vand.u32 2147483647, %v3908_v39  ;;  %v3911_v55 = vcvt.s32.f32 %v3904_v17  ;;  %vm4048_vm7 = vcmp.gt.s32.totalorder %v4047_v11, 0  ;;  %vm3824_vm12 = vcmp.eq.s32.totalorder %v8041_v15, 2 }
 0x2a5   : > { %v8137_v0 = vpop.eup %5824  ;;  %vm3990_vm5 = vc.u32 %v8119_v13, %v8122_v62  ;;  %v3991_v4 = vadd.s32 1, %v8123_v20  ;;  %v4049_v52 = vsel %vm4048_vm7, %v4047_v11, 0  ;;  %v3988_v31 = vmul.u32 %v8047_v2, %v3972_v38 }
 0x2a6   : > { %v8143_v7 = vpop.eup %5826  ;;  %v8717_v27 = vxor.u32 2147483648, %v8137_v0  ;;  %v3912_v45 = vmul.f32 %v3911_v55, %v3909_v59  ;;  %v4051_v49 = vand.u32 31, %v4049_v52  ;;  %v8148_v61 = vand.u32 3, %v3922_v10 }
 0x2a7   : > { %v8718_v43 = vxor.u32 2147483648, %v8143_v7  ;;  %v3992_v12 = vsel %vm3990_vm5, %v3991_v4, %v8123_v20  ;;  %v4044_v46 = vand.u32 8388607, %v4037_v29  ;;  %vm3935_vm9 = vcmp.lt.s32.totalorder %v7917_v26, 0 }
 0x2a8   : > { %v3826_v24 = vsel %vm3824_vm12, %v8717_v27, %v8143_v7  ;;  %v3913_v3 = vxor.u32 2147483648, %v3912_v45  ;;  %v3993_v23 = vadd.s32 %v3992_v12, %v3988_v31  ;;  %v4052_v30 = vsub.s32 32, %v4051_v49 }
 0x2a9   : > { %v3823_v2 = vsel %vm3821_vm3, %v8137_v0, %v8718_v43  ;;  %v4050_v18 = vshrl.u32 %v4049_v52, 5  ;;  %v4054_v58 = vshll.u32 %v8770_v28, %v4051_v49  ;;  %v4144_v6 = vand.u32 2139095040, %v7995_v41 }
 0x2aa   : > { %v3827_v57 = vsel %vm3820_vm8, %v3823_v2, %v3826_v24  ;;  %v3914_v14 = vsel %vm3831_vm6, %v3913_v3, %v3912_v45  ;;  %v3994_v25 = vadd.s32 536870912, %v3993_v23  ;;  %v4057_v48 = vshll.u32 %v8744_v53, %v4051_v49 }
 0x2ab   : > { %v3828_v17 = vsel %vm3817_vm10, nan, %v3827_v57  ;;  %v3917_v19 = vsel %vm8030_vm13, %v7793_v21, %v3914_v14  ;;  %v4055_v1 = vshrl.u32 %v8744_v53, %v4052_v30  ;;  %v4058_v54 = vshrl.u32 %v8745_v16, %v4052_v30 }
 0x2ac   : > { %5828 = vcosq.f32 %v3917_v19  ;;  %v3995_v15 = vshrl.u32 %v3994_v25, 30  ;;  %v4060_v34 = vshll.u32 %v8745_v16, %v4051_v49  ;;  %v4061_v20 = vshrl.u32 %v8769_v50, %v4052_v30  ;;  %4454 = vst [vmem:[%s6384_s6 + $0x108] sm:$0xff] %v3828_v17 }
 0x2ad   : > { %5830 = vsinq.f32 %v3917_v19  ;;  %vm8181_vm6 = vcmp.le.f32.partialorder %v3933_v32, 0.7853982  ;;  %v4056_v44 = vor.u32 %v4055_v1, %v4054_v58  ;;  %v4063_v11 = vshll.u32 %v8769_v50, %v4051_v49 }
 0x2ae   : > { %v4064_v10 = vshrl.u32 %v5937_v56, %v4052_v30  ;;  %v3996_v38 = vshll.u32 %v3995_v15, 30  ;;  %v4019_v59 = vsub.s32 4, %v3995_v15  ;;  %v4059_v55 = vor.u32 %v4058_v54, %v4057_v48 }
 0x2af   : > { %v4062_v4 = vor.u32 %v4061_v20, %v4060_v34  ;;  %v4045_v52 = vor.u32 8388608, %v4044_v46  ;;  %v4066_v31 = vshll.u32 %v5937_v56, %v4051_v49  ;;  %v4067_v12 = vshrl.u32 %v5938_v63, %v4052_v30 }
 0x2b0   : > { %v4065_v45 = vor.u32 %v4064_v10, %v4063_v11  ;;  %v8189_v24 = vsub.s32 %v3993_v23, %v3996_v38  ;;  %v4053_v32 = vshrl.u32 %v8770_v28, %v4052_v30  ;;  %vm4072_vm13 = vcmp.lt.s32.totalorder %v4050_v18, 4 }
 0x2b1   : > { %v4145_v3 = vshrl.u32 %v4144_v6, 23  ;;  %v4068_v2 = vor.u32 %v4067_v12, %v4066_v31  ;;  %vm4069_vm1 = vcmp.lt.s32.totalorder %v4050_v18, 1  ;;  %vm4070_vm15 = vcmp.lt.s32.totalorder %v4050_v18, 2 }
 0x2b2   : > { %v4074_v58 = vsel %vm4072_vm13, %v4062_v4, 2102212464  ;;  %v3999_v57 = vsub.s32 0, %v8189_v24  ;;  %v4020_v46 = vsel %vm3935_vm9, %v4019_v59, %v3995_v15  ;;  %vm4071_vm11 = vcmp.lt.s32.totalorder %v4050_v18, 3 }
 0x2b3   : > { %v4077_v14 = vsel %vm4069_vm1, %v4056_v44, %v4059_v55  ;;  %v4073_v49 = vsel %vm4069_vm1, %v4053_v32, %v4056_v44  ;;  %v4078_v25 = vsel %vm4072_vm13, %v4065_v45, 920167782  ;;  %v4081_v48 = vsel %vm4069_vm1, %v4059_v55, %v4062_v4 }
 0x2b4   : > { %v4082_v23 = vsel %vm4072_vm13, %v4068_v2, 1326507024  ;;  %v5538_v17 = vmin.u32 %v3999_v57, %v8189_v24  ;;  %v4075_v30 = vsel %vm4071_vm11, %v4059_v55, %v4074_v58  ;;  %v4079_v19 = vsel %vm4071_vm11, %v4062_v4, %v4078_v25 }
 0x2b5   : > { %v4083_v6 = vsel %vm4071_vm11, %v4065_v45, %v4082_v23  ;;  %v4080_v1 = vsel %vm4070_vm15, %v4077_v14, %v4079_v19  ;;  %v4085_v34 = vshll.u32 %v4045_v52, 8  ;;  %v5545_v20 = vadd.s32 4294967169, %v4145_v3 }
 0x2b6   : > { %v4084_v54 = vsel %vm4070_vm15, %v4081_v48, %v4083_v6  ;;  %v8198_v11 = vpop.eup %5828  ;;  %vm3921_vm4 = vweird.f32 %v7793_v21  ;;  %vm3928_vm14 = vcmp.eq.s32.totalorder %v8148_v61, 2  ;;  %v4001_v15 = vclz %v5538_v17 }
 0x2b7   : > { %v8204_v44 = vsel %vm8181_vm6, 0, %v4020_v46  ;;  %v8206_v10 = vpop.eup %5830  ;;  %v8715_v38 = vxor.u32 2147483648, %v8198_v11  ;;  %v4076_v59 = vsel %vm4070_vm15, %v4073_v49, %v4075_v30  ;;  %vm3925_vm0 = vcmp.eq.s32.totalorder %v8148_v61, 0 }
 0x2b8   : > { %v8210_v55 = vmul.u32.u64.low %v4085_v34, %v4084_v54  ;;  %v8211_v4 = vmul.u32.u64.high %v4085_v34, %v4084_v54, %v8210_v55  ;;  %v8716_v52 = vxor.u32 2147483648, %v8206_v10  ;;  %v5539_v45 = vadd.s32 4294967294, %v4001_v15 }
 0x2b9   : > { %v8214_v31 = vmul.u32.u64.low %v4085_v34, %v4080_v1  ;;  %v8215_v12 = vmul.u32.u64.high %v4085_v34, %v4080_v1, %v8214_v31  ;;  %v3930_v32 = vsel %vm3928_vm14, %v8715_v38, %v8206_v10  ;;  %v4141_v3 = vand.u32 2147483647, %v7995_v41 }
 0x2ba   : > { %v4151_v18 = vadd.s32 1, %v5545_v20  ;;  %vm3924_vm8 = vcmp.lt.s32.totalorder %v8148_v61, 2  ;;  %v3927_v2 = vsel %vm3925_vm0, %v8198_v11, %v8716_v52  ;;  %v3989_v58 = vadd.s32 %v8122_v62, %v8119_v13 }
 0x2bb   : > { %vm5540_vm3 = vcmp.lt.s32.totalorder %v5539_v45, 0  ;;  %v3931_v57 = vsel %vm3924_vm8, %v3927_v2, %v3930_v32  ;;  %v4026_v14 = vadd.s32 3, %v8204_v44  ;;  %v4092_v49 = vmul.u32 %v4085_v34, %v4076_v59 }
 0x2bc   : > { %v4004_v46 = vsel %vm5540_vm3, 0, %v5539_v45  ;;  %v3932_v25 = vsel %vm3921_vm4, nan, %v3931_v57  ;;  %vm4094_vm7 = vc.u32 %v8211_v4, %v8214_v31  ;;  %v4095_v61 = vadd.s32 1, %v8215_v12 }
 0x2bd   : > { %v4005_v48 = vsub.s32 32, %v4004_v46  ;;  %v4009_v23 = vsub.s32 4294967266, %v4004_v46  ;;  %v4148_v17 = vand.u32 8388607, %v4141_v3  ;;  %vm4152_vm12 = vcmp.gt.s32.totalorder %v4151_v18, 0  ;;  %4455 = vst [vmem:[%s6384_s6 + $0x110] sm:$0xff] %v3932_v25 }
 0x2be   : > { %v4248_v13 = vand.u32 2139095040, %v8128_v9  ;;  %v4006_v62 = vshll.u32 %v8189_v24, %v4004_v46  ;;  %v4153_v6 = vsel %vm4152_vm12, %v4151_v18, 0  ;;  %v4096_v1 = vsel %vm4094_vm7, %v4095_v61, %v8215_v12 }
 0x2bf   : > { %v4007_v30 = vshrl.u32 %v3989_v58, %v4005_v48  ;;  %v4010_v19 = vadd.s32 127, %v4009_v23  ;;  %v4155_v54 = vand.u32 31, %v4153_v6  ;;  %v4097_v15 = vadd.s32 %v4096_v1, %v4092_v49 }
 0x2c0   : > { %v8241_v59 = vand.u32 3, %v4026_v14  ;;  %v4149_v55 = vor.u32 8388608, %v4148_v17  ;;  %v8719_v32 = vand.u32 2147483647, %v8128_v9  ;;  %v4249_v24 = vshrl.u32 %v4248_v13, 23 }
 0x2c1   : > { %v4008_v34 = vor.u32 %v4007_v30, %v4006_v62  ;;  %v4011_v20 = vshll.u32 %v4010_v19, 23  ;;  %v4156_v45 = vsub.s32 32, %v4155_v54  ;;  %v4098_v57 = vadd.s32 536870912, %v4097_v15 }
 0x2c2   : > { %v4158_v25 = vshll.u32 %v8770_v28, %v4155_v54  ;;  %vm4039_vm5 = vcmp.lt.s32.totalorder %v7988_v35, 0  ;;  %v4161_v12 = vshll.u32 %v8744_v53, %v4155_v54  ;;  %v4154_v61 = vshrl.u32 %v4153_v6, 5 }
 0x2c3   : > { %v4012_v2 = vor.u32 4788187, %v4011_v20  ;;  %v4159_v18 = vshrl.u32 %v8744_v53, %v4156_v45  ;;  %v4162_v58 = vshrl.u32 %v8745_v16, %v4156_v45  ;;  %v4165_v46 = vshrl.u32 %v8769_v50, %v4156_v45 }
 0x2c4   : > { %v4015_v49 = vcvt.s32.f32 %v4008_v34  ;;  %v4099_v48 = vshrl.u32 %v4098_v57, 30  ;;  %v4168_v23 = vshrl.u32 %v5937_v56, %v4156_v45  ;;  %v4164_v17 = vshll.u32 %v8745_v16, %v4155_v54 }
 0x2c5   : > { %v4013_v14 = vand.u32 2147483647, %v4012_v2  ;;  %v4167_v13 = vshll.u32 %v8769_v50, %v4155_v54  ;;  %v4171_v62 = vshrl.u32 %v5938_v63, %v4156_v45  ;;  %v4160_v1 = vor.u32 %v4159_v18, %v4158_v25 }
 0x2c6   : > { %v4100_v19 = vshll.u32 %v4099_v48, 30  ;;  %v4163_v20 = vor.u32 %v4162_v58, %v4161_v12  ;;  %vm8256_vm13 = vcmp.le.f32.partialorder %v4037_v29, 0.7853982  ;;  %v4166_v34 = vor.u32 %v4165_v46, %v4164_v17 }
 0x2c7   : > { %v4016_v30 = vmul.f32 %v4015_v49, %v4013_v14  ;;  %v4169_v2 = vor.u32 %v4168_v23, %v4167_v13  ;;  %v4170_v6 = vshll.u32 %v5937_v56, %v4155_v54  ;;  %v8261_v57 = vshll.u32 %v4149_v55, 8 }
 0x2c8   : > { %v8263_v27 = vsub.s32 %v4097_v15, %v4100_v19  ;;  %v4123_v43 = vsub.s32 4, %v4099_v48  ;;  %v5549_v14 = vadd.s32 4294967169, %v4249_v24  ;;  %v4157_v25 = vshrl.u32 %v8770_v28, %v4156_v45 }
 0x2c9   : > { %v4017_v52 = vxor.u32 2147483648, %v4016_v30  ;;  %v4172_v18 = vor.u32 %v4171_v62, %v4170_v6  ;;  %vm4173_vm1 = vcmp.lt.s32.totalorder %v4154_v61, 1  ;;  %vm4174_vm15 = vcmp.lt.s32.totalorder %v4154_v61, 2 }
 0x2ca   : > { %v4103_v12 = vsub.s32 0, %v8263_v27  ;;  %vm4176_vm11 = vcmp.lt.s32.totalorder %v4154_v61, 4  ;;  %v4181_v54 = vsel %vm4173_vm1, %v4160_v1, %v4163_v20  ;;  %vm4175_vm14 = vcmp.lt.s32.totalorder %v4154_v61, 3 }
 0x2cb   : > { %v4018_v29 = vsel %vm3935_vm9, %v4017_v52, %v4016_v30  ;;  %v4178_v55 = vsel %vm4176_vm11, %v4166_v34, 2102212464  ;;  %v4182_v24 = vsel %vm4176_vm11, %v4169_v2, 920167782  ;;  %v4124_v58 = vsel %vm4039_vm5, %v4123_v43, %v4099_v48 }
 0x2cc   : > { %v4021_v15 = vsel %vm8181_vm6, %v7917_v26, %v4018_v29  ;;  %v5542_v45 = vmin.u32 %v4103_v12, %v8263_v27  ;;  %v4183_v46 = vsel %vm4175_vm14, %v4166_v34, %v4182_v24  ;;  %v4185_v49 = vsel %vm4173_vm1, %v4163_v20, %v4166_v34 }
 0x2cd   : > { %5832 = vcosq.f32 %v4021_v15  ;;  %v4184_v52 = vsel %vm4174_vm15, %v4181_v54, %v4183_v46  ;;  %v4186_v23 = vsel %vm4176_vm11, %v4172_v18, 1326507024  ;;  %v4177_v39 = vsel %vm4173_vm1, %v4157_v25, %v4160_v1 }
 0x2ce   : > { %5834 = vsinq.f32 %v4021_v15  ;;  %v4105_v17 = vclz %v5542_v45  ;;  %v4179_v13 = vsel %vm4175_vm14, %v4163_v20, %v4178_v55  ;;  %v4252_v62 = vand.u32 8388607, %v8719_v32 }
 0x2cf   : > { %v4187_v30 = vsel %vm4175_vm14, %v4169_v2, %v4186_v23  ;;  %v8282_v19 = vmul.u32.u64.low %v8261_v57, %v4184_v52  ;;  %v8283_v6 = vmul.u32.u64.high %v8261_v57, %v4184_v52, %v8282_v19  ;;  %v4255_v43 = vadd.s32 1, %v5549_v14 }
 0x2d0   : > { %v5543_v48 = vadd.s32 4294967294, %v4105_v17  ;;  %v8288_v29 = vsel %vm8256_vm13, 0, %v4124_v58  ;;  %v4188_v34 = vsel %vm4174_vm15, %v4185_v49, %v4187_v30  ;;  %v8293_v1 = vmul.f32 %v7900_v37, %v8791_v47 }
 0x2d1   : > { %v8296_v20 = vmul.u32.u64.low %v8261_v57, %v4188_v34  ;;  %v8297_v2 = vmul.u32.u64.high %v8261_v57, %v4188_v34, %v8296_v20  ;;  %vm4256_vm9 = vcmp.gt.s32.totalorder %v4255_v43, 0  ;;  %vm4028_vm6 = vcmp.lt.s32.totalorder %v8241_v59, 2 }
 0x2d2   : > { %vm5544_vm0 = vcmp.lt.s32.totalorder %v5543_v48, 0  ;;  %v4180_v14 = vsel %vm4174_vm15, %v4177_v39, %v4179_v13  ;;  %v4253_v25 = vor.u32 8388608, %v4252_v62  ;;  %v4257_v18 = vsel %vm4256_vm9, %v4255_v43, 0 }
 0x2d3   : > { %vm4025_vm8 = vweird.f32 %v7917_v26  ;;  %v4108_v12 = vsel %vm5544_vm0, 0, %v5543_v48  ;;  %v4130_v54 = vadd.s32 3, %v8288_v29  ;;  %v4199_v37 = vadd.s32 1, %v8283_v6 }
 0x2d4   : > { %v4259_v47 = vand.u32 31, %v4257_v18  ;;  %vm4029_vm3 = vcmp.eq.s32.totalorder %v8241_v59, 0  ;;  %v4093_v15 = vadd.s32 %v8214_v31, %v8211_v4  ;;  %v4109_v55 = vsub.s32 32, %v4108_v12 }
 0x2d5   : > { %v4113_v24 = vsub.s32 4294967266, %v4108_v12  ;;  %vm4032_vm7 = vcmp.eq.s32.totalorder %v8241_v59, 2  ;;  %v4110_v61 = vshll.u32 %v8263_v27, %v4108_v12  ;;  %v4196_v45 = vmul.u32 %v8261_v57, %v4180_v14 }
 0x2d6   : > { %vm4198_vm12 = vc.u32 %v8297_v2, %v8282_v19  ;;  %v4111_v46 = vshrl.u32 %v4093_v15, %v4109_v55  ;;  %v4260_v23 = vsub.s32 32, %v4259_v47  ;;  %v8318_v31 = vand.u32 3, %v4130_v54 }
 0x2d7   : > { %v8312_v58 = vpop.eup %5832  ;;  %v4114_v52 = vadd.s32 127, %v4113_v24  ;;  %v4200_v49 = vsel %vm4198_vm12, %v4199_v37, %v8283_v6  ;;  %v8320_v27 = vshll.u32 %v4253_v25, 8  ;;  %v4352_v30 = vand.u32 2139095040, %v8293_v1 }
 0x2d8   : > { %v8315_v17 = vpop.eup %5834  ;;  %v8720_v4 = vxor.u32 2147483648, %v8312_v58  ;;  %v4201_v39 = vadd.s32 %v4200_v49, %v4196_v45  ;;  %v4112_v13 = vor.u32 %v4111_v46, %v4110_v61  ;;  %vm4143_vm1 = vcmp.lt.s32.totalorder %v7995_v41, 0 }
 0x2d9   : > { %v8721_v57 = vxor.u32 2147483648, %v8315_v17  ;;  %v4115_v62 = vshll.u32 %v4114_v52, 23  ;;  %v8330_v48 = vshrl.u32 %v4257_v18, 5  ;;  %v4262_v34 = vshll.u32 %v8770_v28, %v4259_v47 }
 0x2da   : > { %v4034_v6 = vsel %vm4032_vm7, %v8720_v4, %v8315_v17  ;;  %v4202_v43 = vadd.s32 536870912, %v4201_v39  ;;  %v4263_v25 = vshrl.u32 %v8744_v53, %v4260_v23  ;;  %v4266_v12 = vshrl.u32 %v8745_v16, %v4260_v23 }
 0x2db   : > { %v4031_v20 = vsel %vm4029_vm3, %v8312_v58, %v8721_v57  ;;  %v4116_v14 = vor.u32 4788187, %v4115_v62  ;;  %v4119_v37 = vcvt.s32.f32 %v4112_v13  ;;  %v4269_v15 = vshrl.u32 %v8769_v50, %v4260_v23 }
 0x2dc   : > { %v4035_v54 = vsel %vm4028_vm6, %v4031_v20, %v4034_v6  ;;  %v4203_v18 = vshrl.u32 %v4202_v43, 30  ;;  %vm8347_vm15 = vcmp.le.f32.partialorder %v4141_v3, 0.7853982  ;;  %v4271_v45 = vshll.u32 %v8769_v50, %v4259_v47 }
 0x2dd   : > { %v4036_v55 = vsel %vm4025_vm8, nan, %v4035_v54  ;;  %v4117_v24 = vand.u32 2147483647, %v4116_v14  ;;  %v4272_v46 = vshrl.u32 %v5937_v56, %v4260_v23  ;;  %v4265_v52 = vshll.u32 %v8744_v53, %v4259_v47 }
 0x2de   : > { %v4204_v59 = vshll.u32 %v4203_v18, 30  ;;  %v4268_v49 = vshll.u32 %v8745_v16, %v4259_v47  ;;  %v4275_v13 = vshrl.u32 %v5938_v63, %v4260_v23  ;;  %4456 = vst [vmem:[%s6384_s6 + $0x118] sm:$0xff] %v4036_v55  ;;  %v4227_v6 = vsub.s32 4, %v4203_v18 }
 0x2df   : > { %v4120_v62 = vmul.f32 %v4119_v37, %v4117_v24  ;;  %v4273_v43 = vor.u32 %v4272_v46, %v4271_v45  ;;  %v4274_v3 = vshll.u32 %v5937_v56, %v4259_v47  ;;  %v4264_v14 = vor.u32 %v4263_v25, %v4262_v34 }
 0x2e0   : > { %v8358_v20 = vsub.s32 %v4201_v39, %v4204_v59  ;;  %v4267_v54 = vor.u32 %v4266_v12, %v4265_v52  ;;  %v4270_v32 = vor.u32 %v4269_v15, %v4268_v49  ;;  %v4261_v57 = vshrl.u32 %v8770_v28, %v4260_v23 }
 0x2e1   : > { %v4121_v4 = vxor.u32 2147483648, %v4120_v62  ;;  %v4276_v60 = vor.u32 %v4275_v13, %v4274_v3  ;;  %v4353_v33 = vshrl.u32 %v4352_v30, 23  ;;  %vm4277_vm11 = vcmp.lt.s32.totalorder %v8330_v48, 1 }
 0x2e2   : > { %v4207_v26 = vsub.s32 0, %v8358_v20  ;;  %vm4278_vm14 = vcmp.lt.s32.totalorder %v8330_v48, 2  ;;  %vm4280_vm9 = vcmp.lt.s32.totalorder %v8330_v48, 4  ;;  %v4228_v39 = vsel %vm4143_vm1, %v4227_v6, %v4203_v18 }
 0x2e3   : > { %v4122_v47 = vsel %vm4039_vm5, %v4121_v4, %v4120_v62  ;;  %vm4279_vm6 = vcmp.lt.s32.totalorder %v8330_v48, 3  ;;  %v4286_v34 = vsel %vm4280_vm9, %v4273_v43, 920167782  ;;  %v4282_v25 = vsel %vm4280_vm9, %v4270_v32, 2102212464 }
 0x2e4   : > { %v4125_v23 = vsel %vm8256_vm13, %v7988_v35, %v4122_v47  ;;  %v5546_v30 = vmin.u32 %v4207_v26, %v8358_v20  ;;  %v4285_v12 = vsel %vm4277_vm11, %v4264_v14, %v4267_v54  ;;  %v4287_v4 = vsel %vm4279_vm6, %v4270_v32, %v4286_v34 }
 0x2e5   : > { %5836 = vcosq.f32 %v4125_v23  ;;  %v4289_v37 = vsel %vm4277_vm11, %v4267_v54, %v4270_v32  ;;  %v4290_v18 = vsel %vm4280_vm9, %v4276_v60, 1326507024  ;;  %v8382_v38 = vsel %vm8347_vm15, 0, %v4228_v39 }
 0x2e6   : > { %5838 = vsinq.f32 %v4125_v23  ;;  %v4209_v15 = vclz %v5546_v30  ;;  %v4281_v26 = vsel %vm4277_vm11, %v4261_v57, %v4264_v14  ;;  %v4283_v55 = vsel %vm4279_vm6, %v4267_v54, %v4282_v25 }
 0x2e7   : > { %v4288_v24 = vsel %vm4278_vm14, %v4285_v12, %v4287_v4  ;;  %v4291_v45 = vsel %vm4279_vm6, %v4273_v43, %v4290_v18  ;;  %v5553_v32 = vadd.s32 4294967169, %v4353_v33  ;;  %v4349_v13 = vand.u32 2147483647, %v8293_v1 }
 0x2e8   : > { %v5547_v60 = vadd.s32 4294967294, %v4209_v15  ;;  %v4292_v46 = vsel %vm4278_vm14, %v4289_v37, %v4291_v45  ;;  %v8395_v59 = vmul.u32.u64.low %v8320_v27, %v4288_v24  ;;  %v8396_v52 = vmul.u32.u64.high %v8320_v27, %v4288_v24, %v8395_v59 }
 0x2e9   : > { %v8399_v57 = vmul.u32.u64.low %v8320_v27, %v4292_v46  ;;  %v8400_v49 = vmul.u32.u64.high %v8320_v27, %v4292_v46, %v8399_v57  ;;  %v4359_v62 = vadd.s32 1, %v5553_v32  ;;  %v4284_v6 = vsel %vm4278_vm14, %v4281_v26, %v4283_v55 }
 0x2ea   : > { %vm5548_vm5 = vcmp.lt.s32.totalorder %v5547_v60, 0  ;;  %vm4132_vm13 = vcmp.lt.s32.totalorder %v8318_v31, 2  ;;  %vm4133_vm0 = vcmp.eq.s32.totalorder %v8318_v31, 0  ;;  %v4234_v43 = vadd.s32 3, %v8382_v38 }
 0x2eb   : > { %v4212_v33 = vsel %vm5548_vm5, 0, %v5547_v60  ;;  %vm4360_vm3 = vcmp.gt.s32.totalorder %v4359_v62, 0  ;;  %vm4129_vm7 = vweird.f32 %v7988_v35  ;;  %v4197_v3 = vadd.s32 %v8282_v19, %v8297_v2 }
 0x2ec   : > { %v4213_v14 = vsub.s32 32, %v4212_v33  ;;  %v4217_v54 = vsub.s32 4294967266, %v4212_v33  ;;  %v4303_v47 = vadd.s32 1, %v8396_v52  ;;  %v4300_v48 = vmul.u32 %v8320_v27, %v4284_v6 }
 0x2ed   : > { %vm4302_vm12 = vc.u32 %v8400_v49, %v8395_v59  ;;  %v4356_v39 = vand.u32 8388607, %v4349_v13  ;;  %v4361_v34 = vsel %vm4360_vm3, %v4359_v62, 0  ;;  %v4214_v23 = vshll.u32 %v8358_v20, %v4212_v33 }
 0x2ee   : > { %v4215_v30 = vshrl.u32 %v4197_v3, %v4213_v14  ;;  %v4218_v25 = vadd.s32 127, %v4217_v54  ;;  %v4304_v12 = vsel %vm4302_vm12, %v4303_v47, %v8396_v52  ;;  %vm4136_vm11 = vcmp.eq.s32.totalorder %v8318_v31, 2 }
 0x2ef   : > { %v8418_v4 = vpop.eup %5836  ;;  %v8421_v19 = vand.u32 3, %v4234_v43  ;;  %v4305_v2 = vadd.s32 %v4304_v12, %v4300_v48  ;;  %v4363_v27 = vand.u32 31, %v4361_v34  ;;  %v8427_v20 = vand.u32 3, %v7979_v36 }
 0x2f0   : > { %v8423_v37 = vpop.eup %5838  ;;  %v4137_v18 = vxor.u32 2147483648, %v8418_v4  ;;  %v4216_v15 = vor.u32 %v4215_v30, %v4214_v23  ;;  %v4219_v26 = vshll.u32 %v4218_v25, 23  ;;  %v8431_v32 = vand.u32 3, %v8023_v42 }
 0x2f1   : > { %v4134_v55 = vxor.u32 2147483648, %v8423_v37  ;;  %v4306_v24 = vadd.s32 536870912, %v4305_v2  ;;  %v4364_v45 = vsub.s32 32, %v4363_v27  ;;  %v4357_v52 = vor.u32 8388608, %v4356_v39 }
 0x2f2   : > { %v4138_v60 = vsel %vm4136_vm11, %v4137_v18, %v8423_v37  ;;  %v4220_v46 = vor.u32 4788187, %v4219_v26  ;;  %v8437_v57 = vand.u32 3, %v8070_v51  ;;  %v8445_v62 = vadd.s32 %v8395_v59, %v8400_v49 }
 0x2f3   : > { %v4135_v36 = vsel %vm4133_vm0, %v8418_v4, %v4134_v55  ;;  %v8447_v42 = vshrl.u32 %v4306_v24, 30  ;;  %v4367_v6 = vshrl.u32 %v8744_v53, %v4364_v45  ;;  %v4223_v51 = vcvt.s32.f32 %v4216_v15 }
 0x2f4   : > { %v4139_v33 = vsel %vm4132_vm13, %v4135_v36, %v4138_v60  ;;  %v4221_v43 = vand.u32 2147483647, %v4220_v46  ;;  %v4370_v3 = vshrl.u32 %v8745_v16, %v4364_v45  ;;  %v4362_v47 = vshrl.u32 %v4361_v34, 5 }
 0x2f5   : > { %v4140_v14 = vsel %vm4129_vm7, nan, %v4139_v33  ;;  %v4308_v54 = vshll.u32 %v8447_v42, 30  ;;  %v4366_v59 = vshll.u32 %v8770_v28, %v4363_v27  ;;  %v4369_v48 = vshll.u32 %v8744_v53, %v4363_v27 }
 0x2f6   : > { %v4224_v49 = vmul.f32 %v4223_v51, %v4221_v43  ;;  %v4372_v39 = vshll.u32 %v8745_v16, %v4363_v27  ;;  %v4373_v31 = vshrl.u32 %v8769_v50, %v4364_v45  ;;  %4457 = vst [vmem:[%s6384_s6 + $0x120] sm:$0xff] %v4140_v14  ;;  %v4375_v25 = vshll.u32 %v8769_v50, %v4363_v27 }
 0x2f7   : > { %v8461_v23 = vsub.s32 %v4305_v2, %v4308_v54  ;;  %v4368_v30 = vor.u32 %v4367_v6, %v4366_v59  ;;  %v4376_v12 = vshrl.u32 %v5937_v56, %v4364_v45  ;;  %v4371_v26 = vor.u32 %v4370_v3, %v4369_v48 }
 0x2f8   : > { %v4225_v15 = vxor.u32 2147483648, %v4224_v49  ;;  %v4374_v34 = vor.u32 %v4373_v31, %v4372_v39  ;;  %v4379_v24 = vshrl.u32 %v5938_v63, %v4364_v45  ;;  %v4378_v16 = vshll.u32 %v5937_v56, %v4363_v27 }
 0x2f9   : > { %v4311_v60 = vsub.s32 0, %v8461_v23  ;;  %v4377_v53 = vor.u32 %v4376_v12, %v4375_v25  ;;  %v8468_v46 = vshll.u32 %v4357_v52, 8  ;;  %v4365_v36 = vshrl.u32 %v8770_v28, %v4364_v45 }
 0x2fa   : > { %v4226_v2 = vsel %vm4143_vm1, %v4225_v15, %v4224_v49  ;;  %vm4381_vm14 = vcmp.lt.s32.totalorder %v4362_v47, 1  ;;  %vm4555_vm9 = vcmp.lt.s32.totalorder %v8427_v20, 2  ;;  %vm4556_vm6 = vcmp.eq.s32.totalorder %v8427_v20, 0 }
 0x2fb   : > { %v4229_v63 = vsel %vm8347_vm15, %v7995_v41, %v4226_v2  ;;  %v5550_v50 = vmin.u32 %v4311_v60, %v8461_v23  ;;  %v4380_v6 = vor.u32 %v4379_v24, %v4378_v16  ;;  %vm4384_vm5 = vcmp.lt.s32.totalorder %v4362_v47, 4 }
 0x2fc   : > { %5840 = vcosq.f32 %v4229_v63  ;;  %v4386_v56 = vsel %vm4384_vm5, %v4374_v34, 2102212464  ;;  %v4389_v27 = vsel %vm4381_vm14, %v4368_v30, %v4371_v26  ;;  %v4390_v28 = vsel %vm4384_vm5, %v4377_v53, 920167782 }
 0x2fd   : > { %5842 = vsinq.f32 %v4229_v63  ;;  %v4313_v45 = vclz %v5550_v50  ;;  %vm4383_vm1 = vcmp.lt.s32.totalorder %v4362_v47, 3  ;;  %v4385_v52 = vsel %vm4381_vm14, %v4365_v36, %v4368_v30 }
 0x2fe   : > { %vm4382_vm13 = vcmp.lt.s32.totalorder %v4362_v47, 2  ;;  %v4387_v33 = vsel %vm4383_vm1, %v4371_v26, %v4386_v56  ;;  %v4391_v61 = vsel %vm4383_vm1, %v4374_v34, %v4390_v28  ;;  %v4393_v43 = vsel %vm4381_vm14, %v4371_v26, %v4374_v34 }
 0x2ff   : > { %v5551_v51 = vadd.s32 4294967294, %v4313_v45  ;;  %v4331_v3 = vsub.s32 4, %v8447_v42  ;;  %v4392_v14 = vsel %vm4382_vm13, %v4389_v27, %v4391_v61  ;;  %v4394_v54 = vsel %vm4384_vm5, %v4380_v6, 1326507024 }
 0x300   : > { %vm4240_vm15 = vcmp.eq.s32.totalorder %v8421_v19, 2  ;;  %v4388_v59 = vsel %vm4382_vm13, %v4385_v52, %v4387_v33  ;;  %v4395_v49 = vsel %vm4383_vm1, %v4377_v53, %v4394_v54  ;;  %vm4237_vm0 = vcmp.eq.s32.totalorder %v8421_v19, 0 }
 0x301   : > { %v8488_v48 = vmul.u32.u64.low %v8468_v46, %v4392_v14  ;;  %v8489_v39 = vmul.u32.u64.high %v8468_v46, %v4392_v14, %v8488_v48  ;;  %vm5552_vm3 = vcmp.lt.s32.totalorder %v5551_v51, 0  ;;  %v4396_v31 = vsel %vm4382_vm13, %v4393_v43, %v4395_v49 }
 0x302   : > { %v8802_v30 = vxor.u32 2147483648, %v8061_v22  ;;  %vm4559_vm12 = vcmp.eq.s32.totalorder %v8427_v20, 2  ;;  %vm4236_vm11 = vcmp.lt.s32.totalorder %v8421_v19, 2  ;;  %v4316_v25 = vsel %vm5552_vm3, 0, %v5551_v51 }
 0x303   : > { %v8501_v12 = vmul.u32.u64.low %v8468_v46, %v4396_v31  ;;  %v8502_v15 = vmul.u32.u64.high %v8468_v46, %v4396_v31, %v8501_v12  ;;  %v8803_v26 = vxor.u32 2147483648, %v8057_v40  ;;  %vm4233_vm14 = vweird.f32 %v7995_v41 }
 0x304   : > { %v4558_v47 = vsel %vm4556_vm6, %v8057_v40, %v8802_v30  ;;  %v4317_v24 = vsub.s32 32, %v4316_v25  ;;  %v4321_v60 = vsub.s32 4294967266, %v4316_v25  ;;  %v4404_v53 = vmul.u32 %v8468_v46, %v4388_v59 }
 0x305   : > { %v4561_v34 = vsel %vm4559_vm12, %v8803_v26, %v8061_v22  ;;  %v4318_v2 = vshll.u32 %v8461_v23, %v4316_v25  ;;  %v4407_v36 = vadd.s32 1, %v8489_v39  ;;  %vm4659_vm6 = vcmp.eq.s32.totalorder %v8431_v32, 0 }
 0x306   : > { %v4562_v16 = vsel %vm4555_vm9, %v4558_v47, %v4561_v34  ;;  %v4319_v40 = vshrl.u32 %v8445_v62, %v4317_v24  ;;  %v4322_v22 = vadd.s32 127, %v4321_v60  ;;  %v8804_v50 = vxor.u32 2147483648, %v8143_v7  ;;  %v8522_v20 = vpop.eup %5840 }
 0x307   : > { %v4563_v63 = vsel %vm3713_vm2, nan, %v4562_v16  ;;  %vm4662_vm5 = vcmp.eq.s32.totalorder %v8431_v32, 2  ;;  %vm4406_vm9 = vc.u32 %v8502_v15, %v8488_v48  ;;  %vm4658_vm1 = vcmp.lt.s32.totalorder %v8431_v32, 2  ;;  %v8531_v62 = vpop.eup %5842 }
 0x308   : > { %v4661_v6 = vsel %vm4659_vm6, %v8137_v0, %v8804_v50  ;;  %5285 = vst [vmem:[%s6384_s6 + $0x140] sm:$0xff] %v4563_v63  ;;  %v8805_v5 = vxor.u32 2147483648, %v8137_v0  ;;  %vm4761_vm2 = vcmp.lt.s32.totalorder %v8437_v57, 2  ;;  %v4241_v46 = vxor.u32 2147483648, %v8522_v20 }
 0x309   : > { %v4320_v56 = vor.u32 %v4319_v40, %v4318_v2  ;;  %v4323_v27 = vshll.u32 %v4322_v22, 23  ;;  %v4408_v28 = vsel %vm4406_vm9, %v4407_v36, %v8489_v39  ;;  %v4238_v45 = vxor.u32 2147483648, %v8531_v62 }
 0x30a   : > { %v4664_v23 = vsel %vm4662_vm5, %v8805_v5, %v8143_v7  ;;  %v4409_v52 = vadd.s32 %v4408_v28, %v4404_v53  ;;  %vm4762_vm13 = vcmp.eq.s32.totalorder %v8437_v57, 0  ;;  %v4242_v0 = vsel %vm4240_vm15, %v4241_v46, %v8531_v62 }
 0x30b   : > { %v4665_v33 = vsel %vm4658_vm1, %v4661_v6, %v4664_v23  ;;  %v4324_v7 = vor.u32 4788187, %v4323_v27  ;;  %v4327_v32 = vcvt.s32.f32 %v4320_v56  ;;  %v4239_v43 = vsel %vm4237_vm0, %v8522_v20, %v4238_v45 }
 0x30c   : > { %v4666_v61 = vsel %vm3817_vm10, nan, %v4665_v33  ;;  %v4410_v51 = vadd.s32 536870912, %v4409_v52  ;;  %v8806_v14 = vxor.u32 2147483648, %v8206_v10  ;;  %vm4765_vm3 = vcmp.eq.s32.totalorder %v8437_v57, 2 }
 0x30d   : > { %5286 = vst [vmem:[%s6384_s6 + $0x148] sm:$0xff] %v4666_v61  ;;  %v4243_v59 = vsel %vm4236_vm11, %v4239_v43, %v4242_v0  ;;  %v4325_v49 = vand.u32 2147483647, %v4324_v7  ;;  %v8807_v8 = vxor.u32 2147483648, %v8198_v11  ;;  %v4863_v31 = vand.u32 3, %v8204_v44 }
 0x30e   : > { %v4764_v54 = vsel %vm4762_vm13, %v8198_v11, %v8806_v14  ;;  %v4244_v30 = vsel %vm4233_vm14, nan, %v4243_v59  ;;  %v8560_v47 = vshrl.u32 %v4410_v51, 30  ;;  %v4966_v12 = vand.u32 3, %v8288_v29 }
 0x30f   : > { %v4767_v39 = vsel %vm4765_vm3, %v8807_v8, %v8206_v10  ;;  %vm4247_vm10 = vcmp.lt.s32.totalorder %v8128_v9, 0  ;;  %v4328_v19 = vmul.f32 %v4327_v32, %v4325_v49  ;;  %4458 = vst [vmem:[%s6384_s6 + $0x128] sm:$0xff] %v4244_v30  ;;  %vm4865_vm15 = vcmp.eq.s32.totalorder %v4863_v31, 0 }
 0x310   : > { %v4768_v25 = vsel %vm4761_vm2, %v4764_v54, %v4767_v39  ;;  %v4332_v44 = vsel %vm4247_vm10, %v4331_v3, %v8447_v42  ;;  %v4412_v10 = vshll.u32 %v8560_v47, 30  ;;  %v8808_v57 = vxor.u32 2147483648, %v8315_v17 }
 0x311   : > { %v4769_v11 = vsel %vm3921_vm4, nan, %v4768_v25  ;;  %vm4868_vm0 = vcmp.eq.s32.totalorder %v4863_v31, 2  ;;  %v4329_v26 = vxor.u32 2147483648, %v4328_v19  ;;  %vm4864_vm12 = vcmp.lt.s32.totalorder %v4863_v31, 2 }
 0x312   : > { %v4867_v29 = vsel %vm4865_vm15, %v8312_v58, %v8808_v57  ;;  %5287 = vst [vmem:[%s6384_s6 + $0x150] sm:$0xff] %v4769_v11  ;;  %v8809_v21 = vxor.u32 2147483648, %v8312_v58  ;;  %vm4968_vm4 = vcmp.eq.s32.totalorder %v4966_v12, 0  ;;  %v8810_v24 = vand.u32 2147483647, %v8128_v9 }
 0x313   : > { %v4413_v42 = vsub.s32 %v4409_v52, %v4412_v10  ;;  %v4970_v60 = vsel %vm4968_vm4, %v8418_v4, %v4134_v55  ;;  %v4330_v53 = vsel %vm4247_vm10, %v4329_v26, %v4328_v19  ;;  %vm4971_vm6 = vcmp.eq.s32.totalorder %v4966_v12, 2 }
 0x314   : > { %v4870_v34 = vsel %vm4868_vm0, %v8809_v21, %v8315_v17  ;;  %vm4246_vm11 = vcmp.le.f32.partialorder %v8810_v24, 0.7853982  ;;  %vm4967_vm5 = vcmp.lt.s32.totalorder %v4966_v12, 2  ;;  %v4973_v63 = vsel %vm4971_vm6, %v4137_v18, %v8423_v37 }
 0x315   : > { %v4871_v3 = vsel %vm4864_vm12, %v4867_v29, %v4870_v34  ;;  %v4334_v16 = vsel %vm4246_vm11, 0, %v4332_v44  ;;  %v4333_v58 = vsel %vm4246_vm11, %v8128_v9, %v4330_v53  ;;  %v4415_v17 = vsub.s32 0, %v4413_v42 }
 0x316   : > { %v4872_v36 = vsel %vm4025_vm8, nan, %v4871_v3  ;;  %5844 = vcosq.f32 %v4333_v58  ;;  %v4974_v55 = vsel %vm4967_vm5, %v4970_v60, %v4973_v63  ;;  %v5069_v40 = vand.u32 3, %v8382_v38 }
 0x317   : > { %5288 = vst [vmem:[%s6384_s6 + $0x158] sm:$0xff] %v4872_v36  ;;  %5846 = vsinq.f32 %v4333_v58  ;;  %v5554_v22 = vmin.u32 %v4415_v17, %v4413_v42  ;;  %v4975_v50 = vsel %vm4129_vm7, nan, %v4974_v55  ;;  %v4338_v6 = vadd.s32 3, %v4334_v16 }
 0x318   : > { %5289 = vst [vmem:[%s6384_s6 + $0x160] sm:$0xff] %v4975_v50  ;;  %vm5071_vm8 = vcmp.eq.s32.totalorder %v5069_v40, 0  ;;  %vm5074_vm9 = vcmp.eq.s32.totalorder %v5069_v40, 2  ;;  %vm5070_vm1 = vcmp.lt.s32.totalorder %v5069_v40, 2  ;;  %v5172_v27 = vand.u32 3, %v4334_v16 }
 0x319   : > { %v4417_v5 = vclz %v5554_v22  ;;  %v5073_v4 = vsel %vm5071_vm8, %v8522_v20, %v4238_v45  ;;  %v5076_v37 = vsel %vm5074_vm9, %v4241_v46, %v8531_v62  ;;  %v4339_v23 = vand.u32 3, %v4338_v6 }
 0x31a   : > { %v5077_v38 = vsel %vm5070_vm1, %v5073_v4, %v5076_v37  ;;  %v4405_v28 = vadd.s32 %v8488_v48, %v8502_v15  ;;  %vm5174_vm3 = vcmp.eq.s32.totalorder %v5172_v27, 0  ;;  %vm5173_vm15 = vcmp.lt.s32.totalorder %v5172_v27, 2 }
 0x31b   : > { %v5555_v18 = vadd.s32 4294967294, %v4417_v5  ;;  %v5078_v56 = vsel %vm4233_vm14, nan, %v5077_v38  ;;  %vm4341_vm7 = vcmp.eq.s32.totalorder %v4339_v23, 0  ;;  %vm4344_vm13 = vcmp.eq.s32.totalorder %v4339_v23, 2 }
 0x31c   : > { %5290 = vst [vmem:[%s6384_s6 + $0x168] sm:$0xff] %v5078_v56  ;;  %vm5177_vm14 = vcmp.eq.s32.totalorder %v5172_v27, 2  ;;  %vm4340_vm10 = vcmp.lt.s32.totalorder %v4339_v23, 2  ;;  %vm4337_vm0 = vweird.f32 %v8128_v9  ;;  %v4435_v25 = vsub.s32 4, %v8560_v47 }
 0x31d   : > { %vm5556_vm2 = vcmp.lt.s32.totalorder %v5555_v18, 0  ;;  %vm4351_vm12 = vcmp.lt.s32.totalorder %v8293_v1, 0  ;;  %vm4350_vm4 = vcmp.le.f32.partialorder %v4349_v13, 0.7853982 }
 0x31e   : > { %v4420_v35 = vsel %vm5556_vm2, 0, %v5555_v18  ;;  %v4436_v19 = vsel %vm4351_vm12, %v4435_v25, %v8560_v47  ;;  %vm4441_vm2 = vweird.f32 %v8293_v1 }
 0x31f   : > { %v4421_v52 = vsub.s32 32, %v4420_v35  ;;  %v4425_v33 = vsub.s32 4294967266, %v4420_v35  ;;  %v4422_v62 = vshll.u32 %v4413_v42, %v4420_v35  ;;  %v4438_v44 = vsel %vm4350_vm4, 0, %v4436_v19 }
 0x320   : > { %v5845_v45 = vpop.eup %5844  ;;  %v4442_v10 = vadd.s32 3, %v4438_v44  ;;  %v5275_v29 = vand.u32 3, %v4438_v44 }
 0x321   : > { %v5847_v0 = vpop.eup %5846  ;;  %v4345_v20 = vxor.u32 2147483648, %v5845_v45  ;;  %v4423_v46 = vshrl.u32 %v4405_v28, %v4421_v52  ;;  %v4426_v7 = vadd.s32 127, %v4425_v33 }
 0x322   : > { %v4342_v32 = vxor.u32 2147483648, %v5847_v0  ;;  %v4443_v57 = vand.u32 3, %v4442_v10  ;;  %vm5280_vm6 = vcmp.eq.s32.totalorder %v5275_v29, 2  ;;  %vm5277_vm8 = vcmp.eq.s32.totalorder %v5275_v29, 0 }
 0x323   : > { %v4346_v41 = vsel %vm4344_vm13, %v4345_v20, %v5847_v0  ;;  %v4424_v61 = vor.u32 %v4423_v46, %v4422_v62  ;;  %v4427_v43 = vshll.u32 %v4426_v7, 23  ;;  %v5179_v51 = vsel %vm5177_vm14, %v4345_v20, %v5847_v0 }
 0x324   : > { %v4343_v48 = vsel %vm4341_vm7, %v5845_v45, %v4342_v32  ;;  %v5176_v15 = vsel %vm5174_vm3, %v5845_v45, %v4342_v32  ;;  %vm4448_vm11 = vcmp.eq.s32.totalorder %v4443_v57, 2  ;;  %vm4445_vm5 = vcmp.eq.s32.totalorder %v4443_v57, 0 }
 0x325   : > { %v4347_v14 = vsel %vm4340_vm10, %v4343_v48, %v4346_v41  ;;  %v4428_v54 = vor.u32 4788187, %v4427_v43  ;;  %v5180_v59 = vsel %vm5173_vm15, %v5176_v15, %v5179_v51  ;;  %v4431_v31 = vcvt.s32.f32 %v4424_v61 }
 0x326   : > { %v4348_v49 = vsel %vm4337_vm0, nan, %v4347_v14  ;;  %v5181_v8 = vsel %vm4337_vm0, nan, %v5180_v59  ;;  %vm4444_vm9 = vcmp.lt.s32.totalorder %v4443_v57, 2  ;;  %vm5276_vm1 = vcmp.lt.s32.totalorder %v5275_v29, 2 }
 0x327   : > { %v4429_v39 = vand.u32 2147483647, %v4428_v54  ;;  %4459 = vst [vmem:[%s6384_s6 + $0x130] sm:$0xff] %v4348_v49  ;;  %5291 = vst [vmem:[%s6384_s6 + $0x170] sm:$0xff] %v5181_v8 }
 0x329   : > { %v4432_v30 = vmul.f32 %v4431_v31, %v4429_v39 }
 0x32b   : > { %v4433_v12 = vxor.u32 2147483648, %v4432_v30 }
 0x32d   : > { %v4434_v9 = vsel %vm4351_vm12, %v4433_v12, %v4432_v30 }
 0x32e   : > { %v4437_v11 = vsel %vm4350_vm4, %v8293_v1, %v4434_v9 }
 0x32f   : > { %5848 = vcosq.f32 %v4437_v11 }
 0x330   : > { %5850 = vsinq.f32 %v4437_v11 }
 0x339   : > { %v5849_v26 = vpop.eup %5848 }
 0x33a   : > { %v5851_v21 = vpop.eup %5850  ;;  %v4449_v34 = vxor.u32 2147483648, %v5849_v26 }
 0x33b   : > { %v4446_v24 = vxor.u32 2147483648, %v5851_v21 }
 0x33c   : > { %v4450_v13 = vsel %vm4448_vm11, %v4449_v34, %v5851_v21  ;;  %v5282_v47 = vsel %vm5280_vm6, %v4449_v34, %v5851_v21 }
 0x33d   : > { %v4447_v42 = vsel %vm4445_vm5, %v5849_v26, %v4446_v24  ;;  %v5279_v3 = vsel %vm5277_vm8, %v5849_v26, %v4446_v24 }
 0x33e   : > { %v4451_v60 = vsel %vm4444_vm9, %v4447_v42, %v4450_v13  ;;  %v5283_v53 = vsel %vm5276_vm1, %v5279_v3, %v5282_v47 }
 0x33f   : > { %v4452_v16 = vsel %vm4441_vm2, nan, %v4451_v60  ;;  %v5284_v2 = vsel %vm4441_vm2, nan, %v5283_v53 }
 0x340   : > { %4460 = vst [vmem:[%s6384_s6 + $0x138] sm:$0xff] %v4452_v16  ;;  %5292 = vst [vmem:[%s6384_s6 + $0x178] sm:$0xff] %v5284_v2 }
 0x341   : > { %5865 = shalt.err (!%p5862_p5)
}
 0x342   : > { %s5866_s26 = scalar_lea.hbm %s8623_s16, 6144  ;;  %s5870_s29 = scalar_lea.hbm %s8680_s2, 12288 }
 0x343   : > { %p5867_p6 = scmp.ne.s32.totalorder %s8623_s16, %s5866_s26  ;;  %p5871_p10 = scmp.lt.u32.totalorder %s8623_s16, %s8680_s2 }
 0x344   : > { %p5872_p11 = scmp.lt.u32.totalorder %s5870_s29, %s5866_s26  ;;  %p5874_p13 = scmp.lt.u32.totalorder %s5866_s26, %s8623_s16 }
 0x345   : > { %p5868_p7 = pnand %p5867_p6, %p5997_p4 }
 0x346   : > { %p5873_p12 = por %p5872_p11, %p5871_p10 }
 0x347   : > { %p5869_p9 = pneg %p5868_p7 }
 0x348   : > { %p5875_p0 = por %p5874_p13, %p5873_p12 }
 0x34a   : > { %p5876_p1 = pnand %p5875_p0, %p5869_p9 }
 0x34c   : > { %5879 = shalt.err (!%p5876_p1)
}
 0x34d   : > { %s5940_s4 = smov 512   ;;  %s5941_s5 = smov 32  }
 0x34e   : > { %5691 = dma.vmem_to_hbm [thread:$0]  (%p5997_p4), %s8626_s8, 6144, %s8623_s16, %s8632_s18, %s5940_s4, %s5940_s4, %s5941_s5  }
 0x34f PF: > { %p5697_p2 = scmp.ge.s32.totalorder %s5930_s14, 2  ;;  %s5324_s6 = sand.u32 1, %s5910_s9  }
 0x350   : > { %s5325_s7 = scalar_lea.sflag [#allocation3], %s5324_s6 }
 0x351   : > { %p5694_p3 = pnand %p5697_p2, %p6004_p8 }
 0x353   : > { %5905 = dma.done.wait (!%p5694_p3), %s5325_s7, 6144  }
 0x354   : > { %5907 = vsyncadd (!%p5694_p3), %s5325_s7, 4294961152  ;;  %s15_s14 = sadd.s32 1, %s5930_s14   ;;  %s8812_s9 = smov %s5914_s10 }
 0x355   : > { %p12_p5 = scmp.ge.s32.totalorder %s15_s14, 4   ;;  %s8813_s10 = smov %s5918_s11 }
 0x356   : > { %s8814_s11 = smov %s6010_s22  ;;  %s8815_s12 = smov %s5926_s13 }
 0x357   : > { %s8816_s13 = smov %s8818_s17  ;;  %14 = sbr.rel (!%p12_p5) target bundleno = 4 (0x4), region = 65 }
 0x35e   :  { %5330 = vsyncpa [#allocation3], 1 }
 0x35f   :  { %5332 = vsyncpa [#allocation3 + $0x1], 1 }

</bundles_post_ra>
